<compile_context>
chip_gen: v6e
topology: v6e:2x2x1
jax: 0.10.0
libtpu: 0.0.40
codegen_flags: <defaults>
</compile_context>

<pallas_src>
import functools

import jax
import jax.numpy as jnp
from jax.experimental import pallas as pl
from jax.experimental.pallas import tpu as pltpu


LANES = 128          # channel dims are padded to a multiple of the lane width
MAX_TILE_M = 256     # fixed row tile: large M pipelines over >= 2 blocks
MAX_TILE_K = 512     # K larger than this is split over the reduction grid axis


def _round_up(x, m):
    return (x + m - 1) // m * m


def _pad_rows(m):
    """Row padding rule: multiples of MAX_TILE_M for big M, of 8 for small M."""
    return _round_up(m, MAX_TILE_M) if m > MAX_TILE_M else _round_up(m, 8)


# ---------------------------------------------------------------------------
# Pallas kernel: fused (X @ W) + bias [+ addend] [, ReLU] with K-tiled
# accumulation in an f32 VMEM scratch.
# ---------------------------------------------------------------------------
def _fused_matmul_kernel(*refs, apply_relu, has_addend):
    if has_addend:
        x_ref, w_ref, b_ref, a_ref, o_ref, acc_ref = refs
    else:
        x_ref, w_ref, b_ref, o_ref, acc_ref = refs

    @pl.when(pl.program_id(2) == 0)
    def _init():
        acc_ref[...] = jnp.zeros_like(acc_ref)

    acc_ref[...] += jnp.dot(x_ref[...], w_ref[...],
                            preferred_element_type=jnp.float32)

    @pl.when(pl.program_id(2) == pl.num_programs(2) - 1)
    def _finalize():
        out = acc_ref[...] + b_ref[...]
        if has_addend:
            out = out + a_ref[...].astype(jnp.float32)
        if apply_relu:
            out = jnp.maximum(out, 0.0)
        o_ref[...] = out.astype(o_ref.dtype)


def fused_matmul(x2d, w2d, b2d, *, apply_relu, out_dtype, addend=None):
    """out[(Mp, Cp)] = relu?( x2d @ w2d + b2d [+ addend] ).

    Operands must already be padded: Mp % 8 == 0 (and % 256 == 0 if > 256),
    Kp % 128 == 0, Cp % 128 == 0.  x2d / w2d are bf16 MXU operands,
    b2d / addend are f32 epilogue terms.
    """
    Mp, Kp = x2d.shape
    Kp2, Cp = w2d.shape
    assert Kp == Kp2 and Mp % 8 == 0 and Kp % LANES == 0 and Cp % LANES == 0

    tile_m = Mp if Mp <= MAX_TILE_M else MAX_TILE_M
    assert Mp % tile_m == 0
    if Cp <= 256:
        tile_n = Cp
    else:
        tile_n = 256 if Cp % 256 == 0 else LANES
    if Kp <= MAX_TILE_K:
        tile_k = Kp
    elif Kp % 512 == 0:
        tile_k = 512
    elif Kp % 256 == 0:
        tile_k = 256
    else:
        tile_k = LANES
    grid = (Mp // tile_m, Cp // tile_n, Kp // tile_k)

    in_specs = [
        pl.BlockSpec((tile_m, tile_k), lambda i, j, k: (i, k)),
        pl.BlockSpec((tile_k, tile_n), lambda i, j, k: (k, j)),
        pl.BlockSpec((1, tile_n), lambda i, j, k: (0, j)),
    ]
    inputs = [x2d, w2d, b2d]
    has_addend = addend is not None
    if has_addend:
        in_specs.append(pl.BlockSpec((tile_m, tile_n), lambda i, j, k: (i, j)))
        inputs.append(addend)

    out_bytes = jnp.dtype(out_dtype).itemsize
    # double-buffered inputs + double-buffered output + f32 accumulator
    vmem_est = (2 * (tile_m * tile_k * x2d.dtype.itemsize
                     + tile_k * tile_n * w2d.dtype.itemsize
                     + tile_n * 4)
                + (2 * tile_m * tile_n * addend.dtype.itemsize if has_addend else 0)
                + 2 * tile_m * tile_n * out_bytes
                + tile_m * tile_n * 4)
    vmem_limit = int(min(32 * 1024 * 1024, max(16 * 1024 * 1024, 2 * vmem_est)))

    bytes_accessed = (x2d.size * x2d.dtype.itemsize
                      + w2d.size * w2d.dtype.itemsize
                      + b2d.size * b2d.dtype.itemsize
                      + (addend.size * addend.dtype.itemsize if has_addend else 0)
                      + Mp * Cp * out_bytes)
    cost = pl.CostEstimate(flops=2 * Mp * Kp * Cp,
                           transcendentals=0,
                           bytes_accessed=int(bytes_accessed))

    return pl.pallas_call(
        functools.partial(_fused_matmul_kernel,
                          apply_relu=apply_relu, has_addend=has_addend),
        out_shape=jax.ShapeDtypeStruct((Mp, Cp), out_dtype),
        grid_spec=pltpu.PrefetchScalarGridSpec(
            num_scalar_prefetch=0,
            grid=grid,
            in_specs=in_specs,
            out_specs=pl.BlockSpec((tile_m, tile_n), lambda i, j, k: (i, j)),
            scratch_shapes=[pltpu.VMEM((tile_m, tile_n), jnp.float32)],
        ),
        compiler_params=pltpu.CompilerParams(
            dimension_semantics=("parallel", "parallel", "arbitrary"),
            vmem_limit_bytes=vmem_limit),
        cost_estimate=cost,
    )(*inputs)


# ---------------------------------------------------------------------------
# Glue: im2col patch extraction and nearest-neighbour resize (data movement)
# ---------------------------------------------------------------------------
def im2col(x, k, stride, pad, dilation):
    """x: (N, H, W, C) -> patches (N, Ho, Wo, k*k*C) plus output spatial size."""
    N, H, W, C = x.shape
    xp = jnp.pad(x, ((0, 0), (pad, pad), (pad, pad), (0, 0)))
    Ho = (H + 2 * pad - dilation * (k - 1) - 1) // stride + 1
    Wo = (W + 2 * pad - dilation * (k - 1) - 1) // stride + 1
    cols = []
    for i in range(k):
        for j in range(k):
            hi = i * dilation
            wj = j * dilation
            cols.append(
                xp[:, hi:hi + stride * (Ho - 1) + 1:stride,
                      wj:wj + stride * (Wo - 1) + 1:stride, :])
    return jnp.concatenate(cols, axis=-1), Ho, Wo


def nearest_resize(x, out_h, out_w):
    """PyTorch NF.interpolate(mode='nearest') on NHWC (floor index rule)."""
    N, H, W, C = x.shape
    hi = (jnp.arange(out_h) * H) // out_h
    wi = (jnp.arange(out_w) * W) // out_w
    return x[:, hi][:, :, wi]


# ---------------------------------------------------------------------------
# Lane-padded activation container: flat (Mp, 128) buffer + logical shape
# ---------------------------------------------------------------------------
def _make_act(flat, n, h, w, c):
    return {"flat": flat, "n": n, "h": h, "w": w, "c": c}


def act_nhwc(a):
    """Real-channel NHWC view (lazy; fuses into the next gather/consumer)."""
    n, h, w, c = a["n"], a["h"], a["w"], a["c"]
    return a["flat"][:n * h * w, :c].reshape(n, h, w, c)


def act_nhwc_padded(a):
    """NHWC view keeping all (zero-padded) 128 channel lanes."""
    n, h, w = a["n"], a["h"], a["w"]
    return a["flat"][:n * h * w].reshape(n, h, w, a["flat"].shape[1])


# ---------------------------------------------------------------------------
# Layer wrappers
# ---------------------------------------------------------------------------
def conv_bn_relu(x_nhwc, p):
    """Conv2d(no bias) + folded eval-mode BN + ReLU -> lane-padded bf16 act."""
    k, s, pad, d = p["k"], p["stride"], p["pad"], p["dil"]
    n = x_nhwc.shape[0]
    cin = p["cin"]
    patches, ho, wo = im2col(x_nhwc.astype(jnp.bfloat16), k, s, pad, d)
    m = n * ho * wo
    kdim = k * k * cin
    mp = _pad_rows(m)
    kp = p["w2d"].shape[0]
    x2d = jnp.pad(patches.reshape(m, kdim), ((0, mp - m), (0, kp - kdim)))
    y = fused_matmul(x2d, p["w2d"], p["b2d"],
                     apply_relu=True, out_dtype=jnp.bfloat16)
    return _make_act(y, n, ho, wo, p["cout"])


def lateral_conv(a, p, *, addend=None, out_dtype=jnp.float32):
    """1x1 Conv2d (with bias) on a lane-padded activation; optionally fuses a
    residual addend ((Mp, 128) f32) into the kernel epilogue."""
    x2d = a["flat"].astype(jnp.bfloat16)
    y = fused_matmul(x2d, p["w2d"], p["b2d"],
                     apply_relu=False, out_dtype=out_dtype, addend=addend)
    return _make_act(y, a["n"], a["h"], a["w"], p["cout"])


def upsampled_addend(a, out_h, out_w, target_rows):
    """Nearest-upsample a lane-padded activation, flatten, pad rows."""
    up = nearest_resize(act_nhwc_padded(a), out_h, out_w)
    m = a["n"] * out_h * out_w
    flat = up.reshape(m, up.shape[-1]).astype(jnp.float32)
    return jnp.pad(flat, ((0, target_rows - m), (0, 0)))


# ---------------------------------------------------------------------------
# Deterministic parameter construction (weights folded + padded ONCE here)
# ---------------------------------------------------------------------------
def make_cbr_params(key, k, cin, cout, stride, dil=1):
    k1, k2, k3, k4, k5 = jax.random.split(key, 5)
    fan_in = k * k * cin
    w = jax.random.normal(k1, (cout, cin, k, k), jnp.float32) / jnp.sqrt(float(fan_in))
    gamma = 1.0 + 0.1 * jax.random.normal(k2, (cout,), jnp.float32)
    beta = 0.1 * jax.random.normal(k3, (cout,), jnp.float32)
    mean = 0.1 * jax.random.normal(k4, (cout,), jnp.float32)
    var = 1.0 + 0.1 * jax.random.uniform(k5, (cout,), jnp.float32)
    eps = 1e-5
    scale = gamma / jnp.sqrt(var + eps)       # eval-mode BN -> per-channel affine
    bias = beta - mean * scale
    # (Cout, Cin, kh, kw) -> (kh, kw, Cin, Cout) -> (k*k*Cin, Cout); matches the
    # im2col tap ordering [(i, j) outer, channel inner].  BN scale folded in.
    w2d = jnp.transpose(w, (2, 3, 1, 0)).reshape(fan_in, cout) * scale[None, :]
    kp = _round_up(fan_in, LANES)
    cp = _round_up(cout, LANES)
    w2d = jnp.pad(w2d, ((0, kp - fan_in), (0, cp - cout))).astype(jnp.bfloat16)
    b2d = jnp.pad(bias[None, :], ((0, 0), (0, cp - cout))).astype(jnp.float32)
    return dict(w2d=w2d, b2d=b2d, k=k, stride=stride,
                pad=(k - 1) * dil // 2, dil=dil, cin=cin, cout=cout)


def make_lateral_params(key, cin, cout):
    k1, k2 = jax.random.split(key, 2)
    w = jax.random.normal(k1, (cout, cin), jnp.float32) / jnp.sqrt(float(cin))
    b = 0.1 * jax.random.normal(k2, (cout,), jnp.float32)
    kp = _round_up(cin, LANES)     # lateral convs read the lane-padded buffer
    cp = _round_up(cout, LANES)
    w2d = jnp.pad(w.T, ((0, kp - cin), (0, cp - cout))).astype(jnp.bfloat16)
    b2d = jnp.pad(b[None, :], ((0, 0), (0, cp - cout))).astype(jnp.float32)
    return dict(w2d=w2d, b2d=b2d, cout=cout)


def make_fpn_params(key, base_channel):
    keys = jax.random.split(key, 14)
    bc = base_channel
    return {
        "conv0_0": make_cbr_params(keys[0], 7, 3, bc * 1, 1, dil=2),
        "conv0_1": make_cbr_params(keys[1], 3, bc * 1, bc * 1, 1),
        "conv1_0": make_cbr_params(keys[2], 5, bc * 1, bc * 2, 2),
        "conv1_1": make_cbr_params(keys[3], 3, bc * 2, bc * 2, 1),
        "conv1_2": make_cbr_params(keys[4], 3, bc * 2, bc * 2, 1),
        "conv2_0": make_cbr_params(keys[5], 5, bc * 2, bc * 4, 2),
        "conv2_1": make_cbr_params(keys[6], 3, bc * 4, bc * 4, 1),
        "conv3_0": make_cbr_params(keys[7], 5, bc * 4, bc * 8, 2),
        "conv3_1": make_cbr_params(keys[8], 3, bc * 8, bc * 8, 1),
        "conv_l3": make_lateral_params(keys[9], bc * 8, bc * 8),
        "conv_l3_2": make_lateral_params(keys[10], bc * 8, bc * 4),
        "conv_l2": make_lateral_params(keys[11], bc * 4, bc * 4),
        "conv_l2_1": make_lateral_params(keys[12], bc * 4, bc * 2),
        "conv_l1": make_lateral_params(keys[13], bc * 2, bc * 2),
    }


# ---------------------------------------------------------------------------
# FPN forward
# ---------------------------------------------------------------------------
def fpn_forward(x_nchw, params):
    x = jnp.transpose(x_nchw, (0, 2, 3, 1))          # NCHW -> NHWC
    a = conv_bn_relu(x, params["conv0_0"])
    a = conv_bn_relu(act_nhwc(a), params["conv0_1"])
    a = conv_bn_relu(act_nhwc(a), params["conv1_0"])
    a = conv_bn_relu(act_nhwc(a), params["conv1_1"])
    a = conv_bn_relu(act_nhwc(a), params["conv1_2"])
    l1 = a
    a = conv_bn_relu(act_nhwc(a), params["conv2_0"])
    a = conv_bn_relu(act_nhwc(a), params["conv2_1"])
    l2 = a
    a = conv_bn_relu(act_nhwc(a), params["conv3_0"])
    a = conv_bn_relu(act_nhwc(a), params["conv3_1"])
    l3 = a

    # Top-down path: 1x1 conv commutes exactly with nearest upsampling, so the
    # reducing convs run at the coarse resolution (4x fewer rows) and the
    # residual add is fused into the lateral-conv kernel epilogue.
    o3 = lateral_conv(l3, params["conv_l3"])                       # 64ch @ l3
    t3 = lateral_conv(o3, params["conv_l3_2"])                     # 32ch @ l3
    add2 = upsampled_addend(t3, l2["h"], l2["w"], l2["flat"].shape[0])
    o2 = lateral_conv(l2, params["conv_l2"], addend=add2)          # 32ch @ l2
    t2 = lateral_conv(o2, params["conv_l2_1"])                     # 16ch @ l2
    add1 = upsampled_addend(t2, l1["h"], l1["w"], l1["flat"].shape[0])
    o1 = lateral_conv(l1, params["conv_l1"], addend=add1)          # 16ch @ l1

    def out_nchw(act):
        return jnp.transpose(act_nhwc(act), (0, 3, 1, 2))

    return {3: out_nchw(o3), 2: out_nchw(o2), 1: out_nchw(o1)}


if __name__ == "__main__":
    key = jax.random.PRNGKey(0)
    k_param, k_input = jax.random.split(key)

    BASE_CHANNEL = 8           # hparams.feature_extractor_channel_scale
    N, C, H, W = 2, 3, 16, 16  # input is RGB (Conv2d input_channel = 3)

    params = make_fpn_params(k_param, BASE_CHANNEL)
    x = jax.random.normal(k_input, (N, C, H, W), jnp.float32)

    fwd = jax.jit(functools.partial(fpn_forward, params=params))
    outs = jax.block_until_ready(fwd(x))

    # shape sanity checks matching the PyTorch module
    assert outs[3].shape == (N, BASE_CHANNEL * 8, H // 8, W // 8)
    assert outs[2].shape == (N, BASE_CHANNEL * 4, H // 4, W // 4)
    assert outs[1].shape == (N, BASE_CHANNEL * 2, H // 2, W // 2)
    assert all(bool(jnp.isfinite(o).all()) for o in outs.values())

    print("KERNEL_OK")
</pallas_src>

<mosaic_0001>
module attributes {stable_mosaic.version = 11 : i64} {
  func.func @_fused_matmul_kernel(%arg0: i32, %arg1: i32, %arg2: i32, %arg3: memref<256x256xbf16, #tpu.memory_space<vmem>>, %arg4: memref<256x128xbf16, #tpu.memory_space<vmem>>, %arg5: memref<1x128xf32, #tpu.memory_space<vmem>>, %arg6: memref<256x128xbf16, #tpu.memory_space<vmem>>, %arg7: memref<256x128xf32, #tpu.memory_space<vmem>>) attributes {dimension_semantics = [#tpu.dimension_semantics<parallel>, #tpu.dimension_semantics<parallel>, #tpu.dimension_semantics<arbitrary>], iteration_bounds = array<i64: 2, 1, 1>, scalar_prefetch = 0 : i64, scratch_operands = 1 : i64, tpu.core_type = #tpu.core_type<tc>, window_params = [{transform_indices = @transform_0, window_bounds = array<i64: 256, 256>}, {transform_indices = @transform_1, window_bounds = array<i64: 256, 128>}, {transform_indices = @transform_2, window_bounds = array<i64: 1, 128>}, {transform_indices = @transform_3, window_bounds = array<i64: 256, 128>}]} {
    %c0_i32 = arith.constant 0 : i32
    %0 = arith.cmpi eq, %arg2, %c0_i32 : i32
    %1 = arith.extui %0 : i1 to i32
    %c0_i32_0 = arith.constant 0 : i32
    %2 = arith.cmpi ne, %1, %c0_i32_0 : i32
    scf.if %2 {
      %cst_10 = arith.constant 0.000000e+00 : f32
      %12 = vector.broadcast %cst_10 : f32 to vector<256x128xf32>
      %c0_11 = arith.constant 0 : index
      %c0_12 = arith.constant 0 : index
      %13 = vector.load %arg7[%c0_11, %c0_12] : memref<256x128xf32, #tpu.memory_space<vmem>>, vector<256x128xf32>
      tpu.vector_store %arg7[%c0_11, %c0_12], %12 {strides = array<i32>} : memref<256x128xf32, #tpu.memory_space<vmem>>, vector<256x128xf32>,
    } else {
    }
    %c0 = arith.constant 0 : index
    %c0_1 = arith.constant 0 : index
    %3 = vector.load %arg7[%c0, %c0_1] : memref<256x128xf32, #tpu.memory_space<vmem>>, vector<256x128xf32>
    %c0_2 = arith.constant 0 : index
    %c0_3 = arith.constant 0 : index
    %4 = vector.load %arg3[%c0_2, %c0_3] : memref<256x256xbf16, #tpu.memory_space<vmem>>, vector<256x256xbf16>
    %c0_4 = arith.constant 0 : index
    %c0_5 = arith.constant 0 : index
    %5 = vector.load %arg4[%c0_4, %c0_5] : memref<256x128xbf16, #tpu.memory_space<vmem>>, vector<256x128xbf16>
    %cst = arith.constant dense<0.000000e+00> : vector<256x128xf32>
    %6 = tpu.matmul %4, %5, %cst {dimension_numbers = #tpu.dot_dimension_numbers<[1], [0], [0], [1], [0, 0, 1, 1], [], []>} : vector<256x256xbf16>, vector<256x128xbf16>, vector<256x128xf32> -> vector<256x128xf32>
    %7 = arith.addf %3, %6 : vector<256x128xf32>
    %c0_6 = arith.constant 0 : index
    %c0_7 = arith.constant 0 : index
    %8 = vector.load %arg7[%c0_6, %c0_7] : memref<256x128xf32, #tpu.memory_space<vmem>>, vector<256x128xf32>
    tpu.vector_store %arg7[%c0_6, %c0_7], %7 {strides = array<i32>} : memref<256x128xf32, #tpu.memory_space<vmem>>, vector<256x128xf32>,
    %c0_i32_8 = arith.constant 0 : i32
    %9 = arith.cmpi eq, %arg2, %c0_i32_8 : i32
    %10 = arith.extui %9 : i1 to i32
    %c0_i32_9 = arith.constant 0 : i32
    %11 = arith.cmpi ne, %10, %c0_i32_9 : i32
    scf.if %11 {
      %c0_10 = arith.constant 0 : index
      %c0_11 = arith.constant 0 : index
      %12 = vector.load %arg7[%c0_10, %c0_11] : memref<256x128xf32, #tpu.memory_space<vmem>>, vector<256x128xf32>
      %c0_12 = arith.constant 0 : index
      %c0_13 = arith.constant 0 : index
      %13 = vector.load %arg5[%c0_12, %c0_13] : memref<1x128xf32, #tpu.memory_space<vmem>>, vector<1x128xf32>
      %14 = vector.broadcast %13 : vector<1x128xf32> to vector<256x128xf32>
      %15 = arith.addf %12, %14 : vector<256x128xf32>
      %cst_14 = arith.constant 0.000000e+00 : f32
      %16 = vector.broadcast %cst_14 : f32 to vector<256x128xf32>
      %17 = arith.maximumf %15, %16 : vector<256x128xf32>
      %18 = arith.truncf %17 : vector<256x128xf32> to vector<256x128xbf16>
      %c0_15 = arith.constant 0 : index
      %c0_16 = arith.constant 0 : index
      %19 = vector.load %arg6[%c0_15, %c0_16] : memref<256x128xbf16, #tpu.memory_space<vmem>>, vector<256x128xbf16>
      tpu.vector_store %arg6[%c0_15, %c0_16], %18 {strides = array<i32>} : memref<256x128xbf16, #tpu.memory_space<vmem>>, vector<256x128xbf16>,
    } else {
    }
    return
  }
  func.func @transform_0(%arg0: i32, %arg1: i32, %arg2: i32) -> (i32, i32) {
    %c0_i32 = arith.constant 0 : i32
    return %arg0, %arg2 : i32, i32
  }
  func.func @transform_1(%arg0: i32, %arg1: i32, %arg2: i32) -> (i32, i32) {
    %c0_i32 = arith.constant 0 : i32
    return %arg2, %arg1 : i32, i32
  }
  func.func @transform_2(%arg0: i32, %arg1: i32, %arg2: i32) -> (i32, i32) {
    %c0_i32 = arith.constant 0 : i32
    %c0_i32_0 = arith.constant 0 : i32
    return %c0_i32, %arg1 : i32, i32
  }
  func.func @transform_3(%arg0: i32, %arg1: i32, %arg2: i32) -> (i32, i32) {
    %c0_i32 = arith.constant 0 : i32
    return %arg0, %arg1 : i32, i32
  }
}

module attributes {stable_mosaic.version = 11 : i64} {
  func.func @_fused_matmul_kernel(%arg0: i32, %arg1: i32, %arg2: i32, %arg3: memref<256x128xbf16, #tpu.memory_space<vmem>>, %arg4: memref<128x128xbf16, #tpu.memory_space<vmem>>, %arg5: memref<1x128xf32, #tpu.memory_space<vmem>>, %arg6: memref<256x128xbf16, #tpu.memory_space<vmem>>, %arg7: memref<256x128xf32, #tpu.memory_space<vmem>>) attributes {dimension_semantics = [#tpu.dimension_semantics<parallel>, #tpu.dimension_semantics<parallel>, #tpu.dimension_semantics<arbitrary>], iteration_bounds = array<i64: 2, 1, 1>, scalar_prefetch = 0 : i64, scratch_operands = 1 : i64, tpu.core_type = #tpu.core_type<tc>, window_params = [{transform_indices = @transform_0, window_bounds = array<i64: 256, 128>}, {transform_indices = @transform_1, window_bounds = array<i64: 128, 128>}, {transform_indices = @transform_2, window_bounds = array<i64: 1, 128>}, {transform_indices = @transform_3, window_bounds = array<i64: 256, 128>}]} {
    %c0_i32 = arith.constant 0 : i32
    %0 = arith.cmpi eq, %arg2, %c0_i32 : i32
    %1 = arith.extui %0 : i1 to i32
    %c0_i32_0 = arith.constant 0 : i32
    %2 = arith.cmpi ne, %1, %c0_i32_0 : i32
    scf.if %2 {
      %cst_10 = arith.constant 0.000000e+00 : f32
      %12 = vector.broadcast %cst_10 : f32 to vector<256x128xf32>
      %c0_11 = arith.constant 0 : index
      %c0_12 = arith.constant 0 : index
      %13 = vector.load %arg7[%c0_11, %c0_12] : memref<256x128xf32, #tpu.memory_space<vmem>>, vector<256x128xf32>
      tpu.vector_store %arg7[%c0_11, %c0_12], %12 {strides = array<i32>} : memref<256x128xf32, #tpu.memory_space<vmem>>, vector<256x128xf32>,
    } else {
    }
    %c0 = arith.constant 0 : index
    %c0_1 = arith.constant 0 : index
    %3 = vector.load %arg7[%c0, %c0_1] : memref<256x128xf32, #tpu.memory_space<vmem>>, vector<256x128xf32>
    %c0_2 = arith.constant 0 : index
    %c0_3 = arith.constant 0 : index
    %4 = vector.load %arg3[%c0_2, %c0_3] : memref<256x128xbf16, #tpu.memory_space<vmem>>, vector<256x128xbf16>
    %c0_4 = arith.constant 0 : index
    %c0_5 = arith.constant 0 : index
    %5 = vector.load %arg4[%c0_4, %c0_5] : memref<128x128xbf16, #tpu.memory_space<vmem>>, vector<128x128xbf16>
    %cst = arith.constant dense<0.000000e+00> : vector<256x128xf32>
    %6 = tpu.matmul %4, %5, %cst {dimension_numbers = #tpu.dot_dimension_numbers<[1], [0], [0], [1], [0, 0, 1, 1], [], []>} : vector<256x128xbf16>, vector<128x128xbf16>, vector<256x128xf32> -> vector<256x128xf32>
    %7 = arith.addf %3, %6 : vector<256x128xf32>
    %c0_6 = arith.constant 0 : index
    %c0_7 = arith.constant 0 : index
    %8 = vector.load %arg7[%c0_6, %c0_7] : memref<256x128xf32, #tpu.memory_space<vmem>>, vector<256x128xf32>
    tpu.vector_store %arg7[%c0_6, %c0_7], %7 {strides = array<i32>} : memref<256x128xf32, #tpu.memory_space<vmem>>, vector<256x128xf32>,
    %c0_i32_8 = arith.constant 0 : i32
    %9 = arith.cmpi eq, %arg2, %c0_i32_8 : i32
    %10 = arith.extui %9 : i1 to i32
    %c0_i32_9 = arith.constant 0 : i32
    %11 = arith.cmpi ne, %10, %c0_i32_9 : i32
    scf.if %11 {
      %c0_10 = arith.constant 0 : index
      %c0_11 = arith.constant 0 : index
      %12 = vector.load %arg7[%c0_10, %c0_11] : memref<256x128xf32, #tpu.memory_space<vmem>>, vector<256x128xf32>
      %c0_12 = arith.constant 0 : index
      %c0_13 = arith.constant 0 : index
      %13 = vector.load %arg5[%c0_12, %c0_13] : memref<1x128xf32, #tpu.memory_space<vmem>>, vector<1x128xf32>
      %14 = vector.broadcast %13 : vector<1x128xf32> to vector<256x128xf32>
      %15 = arith.addf %12, %14 : vector<256x128xf32>
      %cst_14 = arith.constant 0.000000e+00 : f32
      %16 = vector.broadcast %cst_14 : f32 to vector<256x128xf32>
      %17 = arith.maximumf %15, %16 : vector<256x128xf32>
      %18 = arith.truncf %17 : vector<256x128xf32> to vector<256x128xbf16>
      %c0_15 = arith.constant 0 : index
      %c0_16 = arith.constant 0 : index
      %19 = vector.load %arg6[%c0_15, %c0_16] : memref<256x128xbf16, #tpu.memory_space<vmem>>, vector<256x128xbf16>
      tpu.vector_store %arg6[%c0_15, %c0_16], %18 {strides = array<i32>} : memref<256x128xbf16, #tpu.memory_space<vmem>>, vector<256x128xbf16>,
    } else {
    }
    return
  }
  func.func @transform_0(%arg0: i32, %arg1: i32, %arg2: i32) -> (i32, i32) {
    %c0_i32 = arith.constant 0 : i32
    return %arg0, %arg2 : i32, i32
  }
  func.func @transform_1(%arg0: i32, %arg1: i32, %arg2: i32) -> (i32, i32) {
    %c0_i32 = arith.constant 0 : i32
    return %arg2, %arg1 : i32, i32
  }
  func.func @transform_2(%arg0: i32, %arg1: i32, %arg2: i32) -> (i32, i32) {
    %c0_i32 = arith.constant 0 : i32
    %c0_i32_0 = arith.constant 0 : i32
    return %c0_i32, %arg1 : i32, i32
  }
  func.func @transform_3(%arg0: i32, %arg1: i32, %arg2: i32) -> (i32, i32) {
    %c0_i32 = arith.constant 0 : i32
    return %arg0, %arg1 : i32, i32
  }
}

module attributes {stable_mosaic.version = 11 : i64} {
  func.func @_fused_matmul_kernel(%arg0: i32, %arg1: i32, %arg2: i32, %arg3: memref<128x256xbf16, #tpu.memory_space<vmem>>, %arg4: memref<256x128xbf16, #tpu.memory_space<vmem>>, %arg5: memref<1x128xf32, #tpu.memory_space<vmem>>, %arg6: memref<128x128xbf16, #tpu.memory_space<vmem>>, %arg7: memref<128x128xf32, #tpu.memory_space<vmem>>) attributes {dimension_semantics = [#tpu.dimension_semantics<parallel>, #tpu.dimension_semantics<parallel>, #tpu.dimension_semantics<arbitrary>], iteration_bounds = array<i64: 1, 1, 1>, scalar_prefetch = 0 : i64, scratch_operands = 1 : i64, tpu.core_type = #tpu.core_type<tc>, window_params = [{transform_indices = @transform_0, window_bounds = array<i64: 128, 256>}, {transform_indices = @transform_1, window_bounds = array<i64: 256, 128>}, {transform_indices = @transform_2, window_bounds = array<i64: 1, 128>}, {transform_indices = @transform_3, window_bounds = array<i64: 128, 128>}]} {
    %c0_i32 = arith.constant 0 : i32
    %0 = arith.cmpi eq, %arg2, %c0_i32 : i32
    %1 = arith.extui %0 : i1 to i32
    %c0_i32_0 = arith.constant 0 : i32
    %2 = arith.cmpi ne, %1, %c0_i32_0 : i32
    scf.if %2 {
      %cst_10 = arith.constant 0.000000e+00 : f32
      %12 = vector.broadcast %cst_10 : f32 to vector<128x128xf32>
      %c0_11 = arith.constant 0 : index
      %c0_12 = arith.constant 0 : index
      %13 = vector.load %arg7[%c0_11, %c0_12] : memref<128x128xf32, #tpu.memory_space<vmem>>, vector<128x128xf32>
      tpu.vector_store %arg7[%c0_11, %c0_12], %12 {strides = array<i32>} : memref<128x128xf32, #tpu.memory_space<vmem>>, vector<128x128xf32>,
    } else {
    }
    %c0 = arith.constant 0 : index
    %c0_1 = arith.constant 0 : index
    %3 = vector.load %arg7[%c0, %c0_1] : memref<128x128xf32, #tpu.memory_space<vmem>>, vector<128x128xf32>
    %c0_2 = arith.constant 0 : index
    %c0_3 = arith.constant 0 : index
    %4 = vector.load %arg3[%c0_2, %c0_3] : memref<128x256xbf16, #tpu.memory_space<vmem>>, vector<128x256xbf16>
    %c0_4 = arith.constant 0 : index
    %c0_5 = arith.constant 0 : index
    %5 = vector.load %arg4[%c0_4, %c0_5] : memref<256x128xbf16, #tpu.memory_space<vmem>>, vector<256x128xbf16>
    %cst = arith.constant dense<0.000000e+00> : vector<128x128xf32>
    %6 = tpu.matmul %4, %5, %cst {dimension_numbers = #tpu.dot_dimension_numbers<[1], [0], [0], [1], [0, 0, 1, 1], [], []>} : vector<128x256xbf16>, vector<256x128xbf16>, vector<128x128xf32> -> vector<128x128xf32>
    %7 = arith.addf %3, %6 : vector<128x128xf32>
    %c0_6 = arith.constant 0 : index
    %c0_7 = arith.constant 0 : index
    %8 = vector.load %arg7[%c0_6, %c0_7] : memref<128x128xf32, #tpu.memory_space<vmem>>, vector<128x128xf32>
    tpu.vector_store %arg7[%c0_6, %c0_7], %7 {strides = array<i32>} : memref<128x128xf32, #tpu.memory_space<vmem>>, vector<128x128xf32>,
    %c0_i32_8 = arith.constant 0 : i32
    %9 = arith.cmpi eq, %arg2, %c0_i32_8 : i32
    %10 = arith.extui %9 : i1 to i32
    %c0_i32_9 = arith.constant 0 : i32
    %11 = arith.cmpi ne, %10, %c0_i32_9 : i32
    scf.if %11 {
      %c0_10 = arith.constant 0 : index
      %c0_11 = arith.constant 0 : index
      %12 = vector.load %arg7[%c0_10, %c0_11] : memref<128x128xf32, #tpu.memory_space<vmem>>, vector<128x128xf32>
      %c0_12 = arith.constant 0 : index
      %c0_13 = arith.constant 0 : index
      %13 = vector.load %arg5[%c0_12, %c0_13] : memref<1x128xf32, #tpu.memory_space<vmem>>, vector<1x128xf32>
      %14 = vector.broadcast %13 : vector<1x128xf32> to vector<128x128xf32>
      %15 = arith.addf %12, %14 : vector<128x128xf32>
      %cst_14 = arith.constant 0.000000e+00 : f32
      %16 = vector.broadcast %cst_14 : f32 to vector<128x128xf32>
      %17 = arith.maximumf %15, %16 : vector<128x128xf32>
      %18 = arith.truncf %17 : vector<128x128xf32> to vector<128x128xbf16>
      %c0_15 = arith.constant 0 : index
      %c0_16 = arith.constant 0 : index
      %19 = vector.load %arg6[%c0_15, %c0_16] : memref<128x128xbf16, #tpu.memory_space<vmem>>, vector<128x128xbf16>
      tpu.vector_store %arg6[%c0_15, %c0_16], %18 {strides = array<i32>} : memref<128x128xbf16, #tpu.memory_space<vmem>>, vector<128x128xbf16>,
    } else {
    }
    return
  }
  func.func @transform_0(%arg0: i32, %arg1: i32, %arg2: i32) -> (i32, i32) {
    %c0_i32 = arith.constant 0 : i32
    return %arg0, %arg2 : i32, i32
  }
  func.func @transform_1(%arg0: i32, %arg1: i32, %arg2: i32) -> (i32, i32) {
    %c0_i32 = arith.constant 0 : i32
    return %arg2, %arg1 : i32, i32
  }
  func.func @transform_2(%arg0: i32, %arg1: i32, %arg2: i32) -> (i32, i32) {
    %c0_i32 = arith.constant 0 : i32
    %c0_i32_0 = arith.constant 0 : i32
    return %c0_i32, %arg1 : i32, i32
  }
  func.func @transform_3(%arg0: i32, %arg1: i32, %arg2: i32) -> (i32, i32) {
    %c0_i32 = arith.constant 0 : i32
    return %arg0, %arg1 : i32, i32
  }
}

module attributes {stable_mosaic.version = 11 : i64} {
  func.func @_fused_matmul_kernel(%arg0: i32, %arg1: i32, %arg2: i32, %arg3: memref<32x512xbf16, #tpu.memory_space<vmem>>, %arg4: memref<512x128xbf16, #tpu.memory_space<vmem>>, %arg5: memref<1x128xf32, #tpu.memory_space<vmem>>, %arg6: memref<32x128xbf16, #tpu.memory_space<vmem>>, %arg7: memref<32x128xf32, #tpu.memory_space<vmem>>) attributes {dimension_semantics = [#tpu.dimension_semantics<parallel>, #tpu.dimension_semantics<parallel>, #tpu.dimension_semantics<arbitrary>], iteration_bounds = array<i64: 1, 1, 1>, scalar_prefetch = 0 : i64, scratch_operands = 1 : i64, tpu.core_type = #tpu.core_type<tc>, window_params = [{transform_indices = @transform_0, window_bounds = array<i64: 32, 512>}, {transform_indices = @transform_1, window_bounds = array<i64: 512, 128>}, {transform_indices = @transform_2, window_bounds = array<i64: 1, 128>}, {transform_indices = @transform_3, window_bounds = array<i64: 32, 128>}]} {
    %c0_i32 = arith.constant 0 : i32
    %0 = arith.cmpi eq, %arg2, %c0_i32 : i32
    %1 = arith.extui %0 : i1 to i32
    %c0_i32_0 = arith.constant 0 : i32
    %2 = arith.cmpi ne, %1, %c0_i32_0 : i32
    scf.if %2 {
      %cst_10 = arith.constant 0.000000e+00 : f32
      %12 = vector.broadcast %cst_10 : f32 to vector<32x128xf32>
      %c0_11 = arith.constant 0 : index
      %c0_12 = arith.constant 0 : index
      %13 = vector.load %arg7[%c0_11, %c0_12] : memref<32x128xf32, #tpu.memory_space<vmem>>, vector<32x128xf32>
      tpu.vector_store %arg7[%c0_11, %c0_12], %12 {strides = array<i32>} : memref<32x128xf32, #tpu.memory_space<vmem>>, vector<32x128xf32>,
    } else {
    }
    %c0 = arith.constant 0 : index
    %c0_1 = arith.constant 0 : index
    %3 = vector.load %arg7[%c0, %c0_1] : memref<32x128xf32, #tpu.memory_space<vmem>>, vector<32x128xf32>
    %c0_2 = arith.constant 0 : index
    %c0_3 = arith.constant 0 : index
    %4 = vector.load %arg3[%c0_2, %c0_3] : memref<32x512xbf16, #tpu.memory_space<vmem>>, vector<32x512xbf16>
    %c0_4 = arith.constant 0 : index
    %c0_5 = arith.constant 0 : index
    %5 = vector.load %arg4[%c0_4, %c0_5] : memref<512x128xbf16, #tpu.memory_space<vmem>>, vector<512x128xbf16>
    %cst = arith.constant dense<0.000000e+00> : vector<32x128xf32>
    %6 = tpu.matmul %4, %5, %cst {dimension_numbers = #tpu.dot_dimension_numbers<[1], [0], [0], [1], [0, 0, 1, 1], [], []>} : vector<32x512xbf16>, vector<512x128xbf16>, vector<32x128xf32> -> vector<32x128xf32>
    %7 = arith.addf %3, %6 : vector<32x128xf32>
    %c0_6 = arith.constant 0 : index
    %c0_7 = arith.constant 0 : index
    %8 = vector.load %arg7[%c0_6, %c0_7] : memref<32x128xf32, #tpu.memory_space<vmem>>, vector<32x128xf32>
    tpu.vector_store %arg7[%c0_6, %c0_7], %7 {strides = array<i32>} : memref<32x128xf32, #tpu.memory_space<vmem>>, vector<32x128xf32>,
    %c0_i32_8 = arith.constant 0 : i32
    %9 = arith.cmpi eq, %arg2, %c0_i32_8 : i32
    %10 = arith.extui %9 : i1 to i32
    %c0_i32_9 = arith.constant 0 : i32
    %11 = arith.cmpi ne, %10, %c0_i32_9 : i32
    scf.if %11 {
      %c0_10 = arith.constant 0 : index
      %c0_11 = arith.constant 0 : index
      %12 = vector.load %arg7[%c0_10, %c0_11] : memref<32x128xf32, #tpu.memory_space<vmem>>, vector<32x128xf32>
      %c0_12 = arith.constant 0 : index
      %c0_13 = arith.constant 0 : index
      %13 = vector.load %arg5[%c0_12, %c0_13] : memref<1x128xf32, #tpu.memory_space<vmem>>, vector<1x128xf32>
      %14 = vector.broadcast %13 : vector<1x128xf32> to vector<32x128xf32>
      %15 = arith.addf %12, %14 : vector<32x128xf32>
      %cst_14 = arith.constant 0.000000e+00 : f32
      %16 = vector.broadcast %cst_14 : f32 to vector<32x128xf32>
      %17 = arith.maximumf %15, %16 : vector<32x128xf32>
      %18 = arith.truncf %17 : vector<32x128xf32> to vector<32x128xbf16>
      %c0_15 = arith.constant 0 : index
      %c0_16 = arith.constant 0 : index
      %19 = vector.load %arg6[%c0_15, %c0_16] : memref<32x128xbf16, #tpu.memory_space<vmem>>, vector<32x128xbf16>
      tpu.vector_store %arg6[%c0_15, %c0_16], %18 {strides = array<i32>} : memref<32x128xbf16, #tpu.memory_space<vmem>>, vector<32x128xbf16>,
    } else {
    }
    return
  }
  func.func @transform_0(%arg0: i32, %arg1: i32, %arg2: i32) -> (i32, i32) {
    %c0_i32 = arith.constant 0 : i32
    return %arg0, %arg2 : i32, i32
  }
  func.func @transform_1(%arg0: i32, %arg1: i32, %arg2: i32) -> (i32, i32) {
    %c0_i32 = arith.constant 0 : i32
    return %arg2, %arg1 : i32, i32
  }
  func.func @transform_2(%arg0: i32, %arg1: i32, %arg2: i32) -> (i32, i32) {
    %c0_i32 = arith.constant 0 : i32
    %c0_i32_0 = arith.constant 0 : i32
    return %c0_i32, %arg1 : i32, i32
  }
  func.func @transform_3(%arg0: i32, %arg1: i32, %arg2: i32) -> (i32, i32) {
    %c0_i32 = arith.constant 0 : i32
    return %arg0, %arg1 : i32, i32
  }
}

module attributes {stable_mosaic.version = 11 : i64} {
  func.func @_fused_matmul_kernel(%arg0: i32, %arg1: i32, %arg2: i32, %arg3: memref<32x384xbf16, #tpu.memory_space<vmem>>, %arg4: memref<384x128xbf16, #tpu.memory_space<vmem>>, %arg5: memref<1x128xf32, #tpu.memory_space<vmem>>, %arg6: memref<32x128xbf16, #tpu.memory_space<vmem>>, %arg7: memref<32x128xf32, #tpu.memory_space<vmem>>) attributes {dimension_semantics = [#tpu.dimension_semantics<parallel>, #tpu.dimension_semantics<parallel>, #tpu.dimension_semantics<arbitrary>], iteration_bounds = array<i64: 1, 1, 1>, scalar_prefetch = 0 : i64, scratch_operands = 1 : i64, tpu.core_type = #tpu.core_type<tc>, window_params = [{transform_indices = @transform_0, window_bounds = array<i64: 32, 384>}, {transform_indices = @transform_1, window_bounds = array<i64: 384, 128>}, {transform_indices = @transform_2, window_bounds = array<i64: 1, 128>}, {transform_indices = @transform_3, window_bounds = array<i64: 32, 128>}]} {
    %c0_i32 = arith.constant 0 : i32
    %0 = arith.cmpi eq, %arg2, %c0_i32 : i32
    %1 = arith.extui %0 : i1 to i32
    %c0_i32_0 = arith.constant 0 : i32
    %2 = arith.cmpi ne, %1, %c0_i32_0 : i32
    scf.if %2 {
      %cst_10 = arith.constant 0.000000e+00 : f32
      %12 = vector.broadcast %cst_10 : f32 to vector<32x128xf32>
      %c0_11 = arith.constant 0 : index
      %c0_12 = arith.constant 0 : index
      %13 = vector.load %arg7[%c0_11, %c0_12] : memref<32x128xf32, #tpu.memory_space<vmem>>, vector<32x128xf32>
      tpu.vector_store %arg7[%c0_11, %c0_12], %12 {strides = array<i32>} : memref<32x128xf32, #tpu.memory_space<vmem>>, vector<32x128xf32>,
    } else {
    }
    %c0 = arith.constant 0 : index
    %c0_1 = arith.constant 0 : index
    %3 = vector.load %arg7[%c0, %c0_1] : memref<32x128xf32, #tpu.memory_space<vmem>>, vector<32x128xf32>
    %c0_2 = arith.constant 0 : index
    %c0_3 = arith.constant 0 : index
    %4 = vector.load %arg3[%c0_2, %c0_3] : memref<32x384xbf16, #tpu.memory_space<vmem>>, vector<32x384xbf16>
    %c0_4 = arith.constant 0 : index
    %c0_5 = arith.constant 0 : index
    %5 = vector.load %arg4[%c0_4, %c0_5] : memref<384x128xbf16, #tpu.memory_space<vmem>>, vector<384x128xbf16>
    %cst = arith.constant dense<0.000000e+00> : vector<32x128xf32>
    %6 = tpu.matmul %4, %5, %cst {dimension_numbers = #tpu.dot_dimension_numbers<[1], [0], [0], [1], [0, 0, 1, 1], [], []>} : vector<32x384xbf16>, vector<384x128xbf16>, vector<32x128xf32> -> vector<32x128xf32>
    %7 = arith.addf %3, %6 : vector<32x128xf32>
    %c0_6 = arith.constant 0 : index
    %c0_7 = arith.constant 0 : index
    %8 = vector.load %arg7[%c0_6, %c0_7] : memref<32x128xf32, #tpu.memory_space<vmem>>, vector<32x128xf32>
    tpu.vector_store %arg7[%c0_6, %c0_7], %7 {strides = array<i32>} : memref<32x128xf32, #tpu.memory_space<vmem>>, vector<32x128xf32>,
    %c0_i32_8 = arith.constant 0 : i32
    %9 = arith.cmpi eq, %arg2, %c0_i32_8 : i32
    %10 = arith.extui %9 : i1 to i32
    %c0_i32_9 = arith.constant 0 : i32
    %11 = arith.cmpi ne, %10, %c0_i32_9 : i32
    scf.if %11 {
      %c0_10 = arith.constant 0 : index
      %c0_11 = arith.constant 0 : index
      %12 = vector.load %arg7[%c0_10, %c0_11] : memref<32x128xf32, #tpu.memory_space<vmem>>, vector<32x128xf32>
      %c0_12 = arith.constant 0 : index
      %c0_13 = arith.constant 0 : index
      %13 = vector.load %arg5[%c0_12, %c0_13] : memref<1x128xf32, #tpu.memory_space<vmem>>, vector<1x128xf32>
      %14 = vector.broadcast %13 : vector<1x128xf32> to vector<32x128xf32>
      %15 = arith.addf %12, %14 : vector<32x128xf32>
      %cst_14 = arith.constant 0.000000e+00 : f32
      %16 = vector.broadcast %cst_14 : f32 to vector<32x128xf32>
      %17 = arith.maximumf %15, %16 : vector<32x128xf32>
      %18 = arith.truncf %17 : vector<32x128xf32> to vector<32x128xbf16>
      %c0_15 = arith.constant 0 : index
      %c0_16 = arith.constant 0 : index
      %19 = vector.load %arg6[%c0_15, %c0_16] : memref<32x128xbf16, #tpu.memory_space<vmem>>, vector<32x128xbf16>
      tpu.vector_store %arg6[%c0_15, %c0_16], %18 {strides = array<i32>} : memref<32x128xbf16, #tpu.memory_space<vmem>>, vector<32x128xbf16>,
    } else {
    }
    return
  }
  func.func @transform_0(%arg0: i32, %arg1: i32, %arg2: i32) -> (i32, i32) {
    %c0_i32 = arith.constant 0 : i32
    return %arg0, %arg2 : i32, i32
  }
  func.func @transform_1(%arg0: i32, %arg1: i32, %arg2: i32) -> (i32, i32) {
    %c0_i32 = arith.constant 0 : i32
    return %arg2, %arg1 : i32, i32
  }
  func.func @transform_2(%arg0: i32, %arg1: i32, %arg2: i32) -> (i32, i32) {
    %c0_i32 = arith.constant 0 : i32
    %c0_i32_0 = arith.constant 0 : i32
    return %c0_i32, %arg1 : i32, i32
  }
  func.func @transform_3(%arg0: i32, %arg1: i32, %arg2: i32) -> (i32, i32) {
    %c0_i32 = arith.constant 0 : i32
    return %arg0, %arg1 : i32, i32
  }
}

module attributes {stable_mosaic.version = 11 : i64} {
  func.func @_fused_matmul_kernel(%arg0: i32, %arg1: i32, %arg2: i32, %arg3: memref<8x128xbf16, #tpu.memory_space<vmem>>, %arg4: memref<128x128xbf16, #tpu.memory_space<vmem>>, %arg5: memref<1x128xf32, #tpu.memory_space<vmem>>, %arg6: memref<8x128xbf16, #tpu.memory_space<vmem>>, %arg7: memref<8x128xf32, #tpu.memory_space<vmem>>) attributes {dimension_semantics = [#tpu.dimension_semantics<parallel>, #tpu.dimension_semantics<parallel>, #tpu.dimension_semantics<arbitrary>], iteration_bounds = array<i64: 1, 1, 7>, scalar_prefetch = 0 : i64, scratch_operands = 1 : i64, tpu.core_type = #tpu.core_type<tc>, window_params = [{transform_indices = @transform_0, window_bounds = array<i64: 8, 128>}, {transform_indices = @transform_1, window_bounds = array<i64: 128, 128>}, {transform_indices = @transform_2, window_bounds = array<i64: 1, 128>}, {transform_indices = @transform_3, window_bounds = array<i64: 8, 128>}]} {
    %c0_i32 = arith.constant 0 : i32
    %0 = arith.cmpi eq, %arg2, %c0_i32 : i32
    %1 = arith.extui %0 : i1 to i32
    %c0_i32_0 = arith.constant 0 : i32
    %2 = arith.cmpi ne, %1, %c0_i32_0 : i32
    scf.if %2 {
      %cst_9 = arith.constant 0.000000e+00 : f32
      %12 = vector.broadcast %cst_9 : f32 to vector<8x128xf32>
      %c0_10 = arith.constant 0 : index
      %c0_11 = arith.constant 0 : index
      %13 = vector.load %arg7[%c0_10, %c0_11] : memref<8x128xf32, #tpu.memory_space<vmem>>, vector<8x128xf32>
      tpu.vector_store %arg7[%c0_10, %c0_11], %12 {strides = array<i32>} : memref<8x128xf32, #tpu.memory_space<vmem>>, vector<8x128xf32>,
    } else {
    }
    %c0 = arith.constant 0 : index
    %c0_1 = arith.constant 0 : index
    %3 = vector.load %arg7[%c0, %c0_1] : memref<8x128xf32, #tpu.memory_space<vmem>>, vector<8x128xf32>
    %c0_2 = arith.constant 0 : index
    %c0_3 = arith.constant 0 : index
    %4 = vector.load %arg3[%c0_2, %c0_3] : memref<8x128xbf16, #tpu.memory_space<vmem>>, vector<8x128xbf16>
    %c0_4 = arith.constant 0 : index
    %c0_5 = arith.constant 0 : index
    %5 = vector.load %arg4[%c0_4, %c0_5] : memref<128x128xbf16, #tpu.memory_space<vmem>>, vector<128x128xbf16>
    %cst = arith.constant dense<0.000000e+00> : vector<8x128xf32>
    %6 = tpu.matmul %4, %5, %cst {dimension_numbers = #tpu.dot_dimension_numbers<[1], [0], [0], [1], [0, 0, 1, 1], [], []>} : vector<8x128xbf16>, vector<128x128xbf16>, vector<8x128xf32> -> vector<8x128xf32>
    %7 = arith.addf %3, %6 : vector<8x128xf32>
    %c0_6 = arith.constant 0 : index
    %c0_7 = arith.constant 0 : index
    %8 = vector.load %arg7[%c0_6, %c0_7] : memref<8x128xf32, #tpu.memory_space<vmem>>, vector<8x128xf32>
    tpu.vector_store %arg7[%c0_6, %c0_7], %7 {strides = array<i32>} : memref<8x128xf32, #tpu.memory_space<vmem>>, vector<8x128xf32>,
    %c6_i32 = arith.constant 6 : i32
    %9 = arith.cmpi eq, %arg2, %c6_i32 : i32
    %10 = arith.extui %9 : i1 to i32
    %c0_i32_8 = arith.constant 0 : i32
    %11 = arith.cmpi ne, %10, %c0_i32_8 : i32
    scf.if %11 {
      %c0_9 = arith.constant 0 : index
      %c0_10 = arith.constant 0 : index
      %12 = vector.load %arg7[%c0_9, %c0_10] : memref<8x128xf32, #tpu.memory_space<vmem>>, vector<8x128xf32>
      %c0_11 = arith.constant 0 : index
      %c0_12 = arith.constant 0 : index
      %13 = vector.load %arg5[%c0_11, %c0_12] : memref<1x128xf32, #tpu.memory_space<vmem>>, vector<1x128xf32>
      %14 = vector.broadcast %13 : vector<1x128xf32> to vector<8x128xf32>
      %15 = arith.addf %12, %14 : vector<8x128xf32>
      %cst_13 = arith.constant 0.000000e+00 : f32
      %16 = vector.broadcast %cst_13 : f32 to vector<8x128xf32>
      %17 = arith.maximumf %15, %16 : vector<8x128xf32>
      %18 = arith.truncf %17 : vector<8x128xf32> to vector<8x128xbf16>
      %c0_14 = arith.constant 0 : index
      %c0_15 = arith.constant 0 : index
      %19 = vector.load %arg6[%c0_14, %c0_15] : memref<8x128xbf16, #tpu.memory_space<vmem>>, vector<8x128xbf16>
      tpu.vector_store %arg6[%c0_14, %c0_15], %18 {strides = array<i32>} : memref<8x128xbf16, #tpu.memory_space<vmem>>, vector<8x128xbf16>,
    } else {
    }
    return
  }
  func.func @transform_0(%arg0: i32, %arg1: i32, %arg2: i32) -> (i32, i32) {
    %c0_i32 = arith.constant 0 : i32
    return %arg0, %arg2 : i32, i32
  }
  func.func @transform_1(%arg0: i32, %arg1: i32, %arg2: i32) -> (i32, i32) {
    %c0_i32 = arith.constant 0 : i32
    return %arg2, %arg1 : i32, i32
  }
  func.func @transform_2(%arg0: i32, %arg1: i32, %arg2: i32) -> (i32, i32) {
    %c0_i32 = arith.constant 0 : i32
    %c0_i32_0 = arith.constant 0 : i32
    return %c0_i32, %arg1 : i32, i32
  }
  func.func @transform_3(%arg0: i32, %arg1: i32, %arg2: i32) -> (i32, i32) {
    %c0_i32 = arith.constant 0 : i32
    return %arg0, %arg1 : i32, i32
  }
}

module attributes {stable_mosaic.version = 11 : i64} {
  func.func @_fused_matmul_kernel(%arg0: i32, %arg1: i32, %arg2: i32, %arg3: memref<8x128xbf16, #tpu.memory_space<vmem>>, %arg4: memref<128x128xbf16, #tpu.memory_space<vmem>>, %arg5: memref<1x128xf32, #tpu.memory_space<vmem>>, %arg6: memref<8x128xbf16, #tpu.memory_space<vmem>>, %arg7: memref<8x128xf32, #tpu.memory_space<vmem>>) attributes {dimension_semantics = [#tpu.dimension_semantics<parallel>, #tpu.dimension_semantics<parallel>, #tpu.dimension_semantics<arbitrary>], iteration_bounds = array<i64: 1, 1, 5>, scalar_prefetch = 0 : i64, scratch_operands = 1 : i64, tpu.core_type = #tpu.core_type<tc>, window_params = [{transform_indices = @transform_0, window_bounds = array<i64: 8, 128>}, {transform_indices = @transform_1, window_bounds = array<i64: 128, 128>}, {transform_indices = @transform_2, window_bounds = array<i64: 1, 128>}, {transform_indices = @transform_3, window_bounds = array<i64: 8, 128>}]} {
    %c0_i32 = arith.constant 0 : i32
    %0 = arith.cmpi eq, %arg2, %c0_i32 : i32
    %1 = arith.extui %0 : i1 to i32
    %c0_i32_0 = arith.constant 0 : i32
    %2 = arith.cmpi ne, %1, %c0_i32_0 : i32
    scf.if %2 {
      %cst_9 = arith.constant 0.000000e+00 : f32
      %12 = vector.broadcast %cst_9 : f32 to vector<8x128xf32>
      %c0_10 = arith.constant 0 : index
      %c0_11 = arith.constant 0 : index
      %13 = vector.load %arg7[%c0_10, %c0_11] : memref<8x128xf32, #tpu.memory_space<vmem>>, vector<8x128xf32>
      tpu.vector_store %arg7[%c0_10, %c0_11], %12 {strides = array<i32>} : memref<8x128xf32, #tpu.memory_space<vmem>>, vector<8x128xf32>,
    } else {
    }
    %c0 = arith.constant 0 : index
    %c0_1 = arith.constant 0 : index
    %3 = vector.load %arg7[%c0, %c0_1] : memref<8x128xf32, #tpu.memory_space<vmem>>, vector<8x128xf32>
    %c0_2 = arith.constant 0 : index
    %c0_3 = arith.constant 0 : index
    %4 = vector.load %arg3[%c0_2, %c0_3] : memref<8x128xbf16, #tpu.memory_space<vmem>>, vector<8x128xbf16>
    %c0_4 = arith.constant 0 : index
    %c0_5 = arith.constant 0 : index
    %5 = vector.load %arg4[%c0_4, %c0_5] : memref<128x128xbf16, #tpu.memory_space<vmem>>, vector<128x128xbf16>
    %cst = arith.constant dense<0.000000e+00> : vector<8x128xf32>
    %6 = tpu.matmul %4, %5, %cst {dimension_numbers = #tpu.dot_dimension_numbers<[1], [0], [0], [1], [0, 0, 1, 1], [], []>} : vector<8x128xbf16>, vector<128x128xbf16>, vector<8x128xf32> -> vector<8x128xf32>
    %7 = arith.addf %3, %6 : vector<8x128xf32>
    %c0_6 = arith.constant 0 : index
    %c0_7 = arith.constant 0 : index
    %8 = vector.load %arg7[%c0_6, %c0_7] : memref<8x128xf32, #tpu.memory_space<vmem>>, vector<8x128xf32>
    tpu.vector_store %arg7[%c0_6, %c0_7], %7 {strides = array<i32>} : memref<8x128xf32, #tpu.memory_space<vmem>>, vector<8x128xf32>,
    %c4_i32 = arith.constant 4 : i32
    %9 = arith.cmpi eq, %arg2, %c4_i32 : i32
    %10 = arith.extui %9 : i1 to i32
    %c0_i32_8 = arith.constant 0 : i32
    %11 = arith.cmpi ne, %10, %c0_i32_8 : i32
    scf.if %11 {
      %c0_9 = arith.constant 0 : index
      %c0_10 = arith.constant 0 : index
      %12 = vector.load %arg7[%c0_9, %c0_10] : memref<8x128xf32, #tpu.memory_space<vmem>>, vector<8x128xf32>
      %c0_11 = arith.constant 0 : index
      %c0_12 = arith.constant 0 : index
      %13 = vector.load %arg5[%c0_11, %c0_12] : memref<1x128xf32, #tpu.memory_space<vmem>>, vector<1x128xf32>
      %14 = vector.broadcast %13 : vector<1x128xf32> to vector<8x128xf32>
      %15 = arith.addf %12, %14 : vector<8x128xf32>
      %cst_13 = arith.constant 0.000000e+00 : f32
      %16 = vector.broadcast %cst_13 : f32 to vector<8x128xf32>
      %17 = arith.maximumf %15, %16 : vector<8x128xf32>
      %18 = arith.truncf %17 : vector<8x128xf32> to vector<8x128xbf16>
      %c0_14 = arith.constant 0 : index
      %c0_15 = arith.constant 0 : index
      %19 = vector.load %arg6[%c0_14, %c0_15] : memref<8x128xbf16, #tpu.memory_space<vmem>>, vector<8x128xbf16>
      tpu.vector_store %arg6[%c0_14, %c0_15], %18 {strides = array<i32>} : memref<8x128xbf16, #tpu.memory_space<vmem>>, vector<8x128xbf16>,
    } else {
    }
    return
  }
  func.func @transform_0(%arg0: i32, %arg1: i32, %arg2: i32) -> (i32, i32) {
    %c0_i32 = arith.constant 0 : i32
    return %arg0, %arg2 : i32, i32
  }
  func.func @transform_1(%arg0: i32, %arg1: i32, %arg2: i32) -> (i32, i32) {
    %c0_i32 = arith.constant 0 : i32
    return %arg2, %arg1 : i32, i32
  }
  func.func @transform_2(%arg0: i32, %arg1: i32, %arg2: i32) -> (i32, i32) {
    %c0_i32 = arith.constant 0 : i32
    %c0_i32_0 = arith.constant 0 : i32
    return %c0_i32, %arg1 : i32, i32
  }
  func.func @transform_3(%arg0: i32, %arg1: i32, %arg2: i32) -> (i32, i32) {
    %c0_i32 = arith.constant 0 : i32
    return %arg0, %arg1 : i32, i32
  }
}

module attributes {stable_mosaic.version = 11 : i64} {
  func.func @_fused_matmul_kernel(%arg0: i32, %arg1: i32, %arg2: i32, %arg3: memref<8x128xbf16, #tpu.memory_space<vmem>>, %arg4: memref<128x128xbf16, #tpu.memory_space<vmem>>, %arg5: memref<1x128xf32, #tpu.memory_space<vmem>>, %arg6: memref<8x128xf32, #tpu.memory_space<vmem>>, %arg7: memref<8x128xf32, #tpu.memory_space<vmem>>) attributes {dimension_semantics = [#tpu.dimension_semantics<parallel>, #tpu.dimension_semantics<parallel>, #tpu.dimension_semantics<arbitrary>], iteration_bounds = array<i64: 1, 1, 1>, scalar_prefetch = 0 : i64, scratch_operands = 1 : i64, tpu.core_type = #tpu.core_type<tc>, window_params = [{transform_indices = @transform_0, window_bounds = array<i64: 8, 128>}, {transform_indices = @transform_1, window_bounds = array<i64: 128, 128>}, {transform_indices = @transform_2, window_bounds = array<i64: 1, 128>}, {transform_indices = @transform_3, window_bounds = array<i64: 8, 128>}]} {
    %c0_i32 = arith.constant 0 : i32
    %0 = arith.cmpi eq, %arg2, %c0_i32 : i32
    %1 = arith.extui %0 : i1 to i32
    %c0_i32_0 = arith.constant 0 : i32
    %2 = arith.cmpi ne, %1, %c0_i32_0 : i32
    scf.if %2 {
      %cst_10 = arith.constant 0.000000e+00 : f32
      %12 = vector.broadcast %cst_10 : f32 to vector<8x128xf32>
      %c0_11 = arith.constant 0 : index
      %c0_12 = arith.constant 0 : index
      %13 = vector.load %arg7[%c0_11, %c0_12] : memref<8x128xf32, #tpu.memory_space<vmem>>, vector<8x128xf32>
      tpu.vector_store %arg7[%c0_11, %c0_12], %12 {strides = array<i32>} : memref<8x128xf32, #tpu.memory_space<vmem>>, vector<8x128xf32>,
    } else {
    }
    %c0 = arith.constant 0 : index
    %c0_1 = arith.constant 0 : index
    %3 = vector.load %arg7[%c0, %c0_1] : memref<8x128xf32, #tpu.memory_space<vmem>>, vector<8x128xf32>
    %c0_2 = arith.constant 0 : index
    %c0_3 = arith.constant 0 : index
    %4 = vector.load %arg3[%c0_2, %c0_3] : memref<8x128xbf16, #tpu.memory_space<vmem>>, vector<8x128xbf16>
    %c0_4 = arith.constant 0 : index
    %c0_5 = arith.constant 0 : index
    %5 = vector.load %arg4[%c0_4, %c0_5] : memref<128x128xbf16, #tpu.memory_space<vmem>>, vector<128x128xbf16>
    %cst = arith.constant dense<0.000000e+00> : vector<8x128xf32>
    %6 = tpu.matmul %4, %5, %cst {dimension_numbers = #tpu.dot_dimension_numbers<[1], [0], [0], [1], [0, 0, 1, 1], [], []>} : vector<8x128xbf16>, vector<128x128xbf16>, vector<8x128xf32> -> vector<8x128xf32>
    %7 = arith.addf %3, %6 : vector<8x128xf32>
    %c0_6 = arith.constant 0 : index
    %c0_7 = arith.constant 0 : index
    %8 = vector.load %arg7[%c0_6, %c0_7] : memref<8x128xf32, #tpu.memory_space<vmem>>, vector<8x128xf32>
    tpu.vector_store %arg7[%c0_6, %c0_7], %7 {strides = array<i32>} : memref<8x128xf32, #tpu.memory_space<vmem>>, vector<8x128xf32>,
    %c0_i32_8 = arith.constant 0 : i32
    %9 = arith.cmpi eq, %arg2, %c0_i32_8 : i32
    %10 = arith.extui %9 : i1 to i32
    %c0_i32_9 = arith.constant 0 : i32
    %11 = arith.cmpi ne, %10, %c0_i32_9 : i32
    scf.if %11 {
      %c0_10 = arith.constant 0 : index
      %c0_11 = arith.constant 0 : index
      %12 = vector.load %arg7[%c0_10, %c0_11] : memref<8x128xf32, #tpu.memory_space<vmem>>, vector<8x128xf32>
      %c0_12 = arith.constant 0 : index
      %c0_13 = arith.constant 0 : index
      %13 = vector.load %arg5[%c0_12, %c0_13] : memref<1x128xf32, #tpu.memory_space<vmem>>, vector<1x128xf32>
      %14 = vector.broadcast %13 : vector<1x128xf32> to vector<8x128xf32>
      %15 = arith.addf %12, %14 : vector<8x128xf32>
      %c0_14 = arith.constant 0 : index
      %c0_15 = arith.constant 0 : index
      %16 = vector.load %arg6[%c0_14, %c0_15] : memref<8x128xf32, #tpu.memory_space<vmem>>, vector<8x128xf32>
      tpu.vector_store %arg6[%c0_14, %c0_15], %15 {strides = array<i32>} : memref<8x128xf32, #tpu.memory_space<vmem>>, vector<8x128xf32>,
    } else {
    }
    return
  }
  func.func @transform_0(%arg0: i32, %arg1: i32, %arg2: i32) -> (i32, i32) {
    %c0_i32 = arith.constant 0 : i32
    return %arg0, %arg2 : i32, i32
  }
  func.func @transform_1(%arg0: i32, %arg1: i32, %arg2: i32) -> (i32, i32) {
    %c0_i32 = arith.constant 0 : i32
    return %arg2, %arg1 : i32, i32
  }
  func.func @transform_2(%arg0: i32, %arg1: i32, %arg2: i32) -> (i32, i32) {
    %c0_i32 = arith.constant 0 : i32
    %c0_i32_0 = arith.constant 0 : i32
    return %c0_i32, %arg1 : i32, i32
  }
  func.func @transform_3(%arg0: i32, %arg1: i32, %arg2: i32) -> (i32, i32) {
    %c0_i32 = arith.constant 0 : i32
    return %arg0, %arg1 : i32, i32
  }
}

module attributes {stable_mosaic.version = 11 : i64} {
  func.func @_fused_matmul_kernel(%arg0: i32, %arg1: i32, %arg2: i32, %arg3: memref<32x128xbf16, #tpu.memory_space<vmem>>, %arg4: memref<128x128xbf16, #tpu.memory_space<vmem>>, %arg5: memref<1x128xf32, #tpu.memory_space<vmem>>, %arg6: memref<32x128xf32, #tpu.memory_space<vmem>>, %arg7: memref<32x128xf32, #tpu.memory_space<vmem>>) attributes {dimension_semantics = [#tpu.dimension_semantics<parallel>, #tpu.dimension_semantics<parallel>, #tpu.dimension_semantics<arbitrary>], iteration_bounds = array<i64: 1, 1, 1>, scalar_prefetch = 0 : i64, scratch_operands = 1 : i64, tpu.core_type = #tpu.core_type<tc>, window_params = [{transform_indices = @transform_0, window_bounds = array<i64: 32, 128>}, {transform_indices = @transform_1, window_bounds = array<i64: 128, 128>}, {transform_indices = @transform_2, window_bounds = array<i64: 1, 128>}, {transform_indices = @transform_3, window_bounds = array<i64: 32, 128>}]} {
    %c0_i32 = arith.constant 0 : i32
    %0 = arith.cmpi eq, %arg2, %c0_i32 : i32
    %1 = arith.extui %0 : i1 to i32
    %c0_i32_0 = arith.constant 0 : i32
    %2 = arith.cmpi ne, %1, %c0_i32_0 : i32
    scf.if %2 {
      %cst_10 = arith.constant 0.000000e+00 : f32
      %12 = vector.broadcast %cst_10 : f32 to vector<32x128xf32>
      %c0_11 = arith.constant 0 : index
      %c0_12 = arith.constant 0 : index
      %13 = vector.load %arg7[%c0_11, %c0_12] : memref<32x128xf32, #tpu.memory_space<vmem>>, vector<32x128xf32>
      tpu.vector_store %arg7[%c0_11, %c0_12], %12 {strides = array<i32>} : memref<32x128xf32, #tpu.memory_space<vmem>>, vector<32x128xf32>,
    } else {
    }
    %c0 = arith.constant 0 : index
    %c0_1 = arith.constant 0 : index
    %3 = vector.load %arg7[%c0, %c0_1] : memref<32x128xf32, #tpu.memory_space<vmem>>, vector<32x128xf32>
    %c0_2 = arith.constant 0 : index
    %c0_3 = arith.constant 0 : index
    %4 = vector.load %arg3[%c0_2, %c0_3] : memref<32x128xbf16, #tpu.memory_space<vmem>>, vector<32x128xbf16>
    %c0_4 = arith.constant 0 : index
    %c0_5 = arith.constant 0 : index
    %5 = vector.load %arg4[%c0_4, %c0_5] : memref<128x128xbf16, #tpu.memory_space<vmem>>, vector<128x128xbf16>
    %cst = arith.constant dense<0.000000e+00> : vector<32x128xf32>
    %6 = tpu.matmul %4, %5, %cst {dimension_numbers = #tpu.dot_dimension_numbers<[1], [0], [0], [1], [0, 0, 1, 1], [], []>} : vector<32x128xbf16>, vector<128x128xbf16>, vector<32x128xf32> -> vector<32x128xf32>
    %7 = arith.addf %3, %6 : vector<32x128xf32>
    %c0_6 = arith.constant 0 : index
    %c0_7 = arith.constant 0 : index
    %8 = vector.load %arg7[%c0_6, %c0_7] : memref<32x128xf32, #tpu.memory_space<vmem>>, vector<32x128xf32>
    tpu.vector_store %arg7[%c0_6, %c0_7], %7 {strides = array<i32>} : memref<32x128xf32, #tpu.memory_space<vmem>>, vector<32x128xf32>,
    %c0_i32_8 = arith.constant 0 : i32
    %9 = arith.cmpi eq, %arg2, %c0_i32_8 : i32
    %10 = arith.extui %9 : i1 to i32
    %c0_i32_9 = arith.constant 0 : i32
    %11 = arith.cmpi ne, %10, %c0_i32_9 : i32
    scf.if %11 {
      %c0_10 = arith.constant 0 : index
      %c0_11 = arith.constant 0 : index
      %12 = vector.load %arg7[%c0_10, %c0_11] : memref<32x128xf32, #tpu.memory_space<vmem>>, vector<32x128xf32>
      %c0_12 = arith.constant 0 : index
      %c0_13 = arith.constant 0 : index
      %13 = vector.load %arg5[%c0_12, %c0_13] : memref<1x128xf32, #tpu.memory_space<vmem>>, vector<1x128xf32>
      %14 = vector.broadcast %13 : vector<1x128xf32> to vector<32x128xf32>
      %15 = arith.addf %12, %14 : vector<32x128xf32>
      %c0_14 = arith.constant 0 : index
      %c0_15 = arith.constant 0 : index
      %16 = vector.load %arg6[%c0_14, %c0_15] : memref<32x128xf32, #tpu.memory_space<vmem>>, vector<32x128xf32>
      tpu.vector_store %arg6[%c0_14, %c0_15], %15 {strides = array<i32>} : memref<32x128xf32, #tpu.memory_space<vmem>>, vector<32x128xf32>,
    } else {
    }
    return
  }
  func.func @transform_0(%arg0: i32, %arg1: i32, %arg2: i32) -> (i32, i32) {
    %c0_i32 = arith.constant 0 : i32
    return %arg0, %arg2 : i32, i32
  }
  func.func @transform_1(%arg0: i32, %arg1: i32, %arg2: i32) -> (i32, i32) {
    %c0_i32 = arith.constant 0 : i32
    return %arg2, %arg1 : i32, i32
  }
  func.func @transform_2(%arg0: i32, %arg1: i32, %arg2: i32) -> (i32, i32) {
    %c0_i32 = arith.constant 0 : i32
    %c0_i32_0 = arith.constant 0 : i32
    return %c0_i32, %arg1 : i32, i32
  }
  func.func @transform_3(%arg0: i32, %arg1: i32, %arg2: i32) -> (i32, i32) {
    %c0_i32 = arith.constant 0 : i32
    return %arg0, %arg1 : i32, i32
  }
}

module attributes {stable_mosaic.version = 11 : i64} {
  func.func @_fused_matmul_kernel(%arg0: i32, %arg1: i32, %arg2: i32, %arg3: memref<32x128xbf16, #tpu.memory_space<vmem>>, %arg4: memref<128x128xbf16, #tpu.memory_space<vmem>>, %arg5: memref<1x128xf32, #tpu.memory_space<vmem>>, %arg6: memref<32x128xf32, #tpu.memory_space<vmem>>, %arg7: memref<32x128xf32, #tpu.memory_space<vmem>>, %arg8: memref<32x128xf32, #tpu.memory_space<vmem>>) attributes {dimension_semantics = [#tpu.dimension_semantics<parallel>, #tpu.dimension_semantics<parallel>, #tpu.dimension_semantics<arbitrary>], iteration_bounds = array<i64: 1, 1, 1>, scalar_prefetch = 0 : i64, scratch_operands = 1 : i64, tpu.core_type = #tpu.core_type<tc>, window_params = [{transform_indices = @transform_0, window_bounds = array<i64: 32, 128>}, {transform_indices = @transform_1, window_bounds = array<i64: 128, 128>}, {transform_indices = @transform_2, window_bounds = array<i64: 1, 128>}, {transform_indices = @transform_3, window_bounds = array<i64: 32, 128>}, {transform_indices = @transform_4, window_bounds = array<i64: 32, 128>}]} {
    %c0_i32 = arith.constant 0 : i32
    %0 = arith.cmpi eq, %arg2, %c0_i32 : i32
    %1 = arith.extui %0 : i1 to i32
    %c0_i32_0 = arith.constant 0 : i32
    %2 = arith.cmpi ne, %1, %c0_i32_0 : i32
    scf.if %2 {
      %cst_10 = arith.constant 0.000000e+00 : f32
      %12 = vector.broadcast %cst_10 : f32 to vector<32x128xf32>
      %c0_11 = arith.constant 0 : index
      %c0_12 = arith.constant 0 : index
      %13 = vector.load %arg8[%c0_11, %c0_12] : memref<32x128xf32, #tpu.memory_space<vmem>>, vector<32x128xf32>
      tpu.vector_store %arg8[%c0_11, %c0_12], %12 {strides = array<i32>} : memref<32x128xf32, #tpu.memory_space<vmem>>, vector<32x128xf32>,
    } else {
    }
    %c0 = arith.constant 0 : index
    %c0_1 = arith.constant 0 : index
    %3 = vector.load %arg8[%c0, %c0_1] : memref<32x128xf32, #tpu.memory_space<vmem>>, vector<32x128xf32>
    %c0_2 = arith.constant 0 : index
    %c0_3 = arith.constant 0 : index
    %4 = vector.load %arg3[%c0_2, %c0_3] : memref<32x128xbf16, #tpu.memory_space<vmem>>, vector<32x128xbf16>
    %c0_4 = arith.constant 0 : index
    %c0_5 = arith.constant 0 : index
    %5 = vector.load %arg4[%c0_4, %c0_5] : memref<128x128xbf16, #tpu.memory_space<vmem>>, vector<128x128xbf16>
    %cst = arith.constant dense<0.000000e+00> : vector<32x128xf32>
    %6 = tpu.matmul %4, %5, %cst {dimension_numbers = #tpu.dot_dimension_numbers<[1], [0], [0], [1], [0, 0, 1, 1], [], []>} : vector<32x128xbf16>, vector<128x128xbf16>, vector<32x128xf32> -> vector<32x128xf32>
    %7 = arith.addf %3, %6 : vector<32x128xf32>
    %c0_6 = arith.constant 0 : index
    %c0_7 = arith.constant 0 : index
    %8 = vector.load %arg8[%c0_6, %c0_7] : memref<32x128xf32, #tpu.memory_space<vmem>>, vector<32x128xf32>
    tpu.vector_store %arg8[%c0_6, %c0_7], %7 {strides = array<i32>} : memref<32x128xf32, #tpu.memory_space<vmem>>, vector<32x128xf32>,
    %c0_i32_8 = arith.constant 0 : i32
    %9 = arith.cmpi eq, %arg2, %c0_i32_8 : i32
    %10 = arith.extui %9 : i1 to i32
    %c0_i32_9 = arith.constant 0 : i32
    %11 = arith.cmpi ne, %10, %c0_i32_9 : i32
    scf.if %11 {
      %c0_10 = arith.constant 0 : index
      %c0_11 = arith.constant 0 : index
      %12 = vector.load %arg8[%c0_10, %c0_11] : memref<32x128xf32, #tpu.memory_space<vmem>>, vector<32x128xf32>
      %c0_12 = arith.constant 0 : index
      %c0_13 = arith.constant 0 : index
      %13 = vector.load %arg5[%c0_12, %c0_13] : memref<1x128xf32, #tpu.memory_space<vmem>>, vector<1x128xf32>
      %14 = vector.broadcast %13 : vector<1x128xf32> to vector<32x128xf32>
      %15 = arith.addf %12, %14 : vector<32x128xf32>
      %c0_14 = arith.constant 0 : index
      %c0_15 = arith.constant 0 : index
      %16 = vector.load %arg6[%c0_14, %c0_15] : memref<32x128xf32, #tpu.memory_space<vmem>>, vector<32x128xf32>
      %17 = arith.addf %15, %16 : vector<32x128xf32>
      %c0_16 = arith.constant 0 : index
      %c0_17 = arith.constant 0 : index
      %18 = vector.load %arg7[%c0_16, %c0_17] : memref<32x128xf32, #tpu.memory_space<vmem>>, vector<32x128xf32>
      tpu.vector_store %arg7[%c0_16, %c0_17], %17 {strides = array<i32>} : memref<32x128xf32, #tpu.memory_space<vmem>>, vector<32x128xf32>,
    } else {
    }
    return
  }
  func.func @transform_0(%arg0: i32, %arg1: i32, %arg2: i32) -> (i32, i32) {
    %c0_i32 = arith.constant 0 : i32
    return %arg0, %arg2 : i32, i32
  }
  func.func @transform_1(%arg0: i32, %arg1: i32, %arg2: i32) -> (i32, i32) {
    %c0_i32 = arith.constant 0 : i32
    return %arg2, %arg1 : i32, i32
  }
  func.func @transform_2(%arg0: i32, %arg1: i32, %arg2: i32) -> (i32, i32) {
    %c0_i32 = arith.constant 0 : i32
    %c0_i32_0 = arith.constant 0 : i32
    return %c0_i32, %arg1 : i32, i32
  }
  func.func @transform_3(%arg0: i32, %arg1: i32, %arg2: i32) -> (i32, i32) {
    %c0_i32 = arith.constant 0 : i32
    return %arg0, %arg1 : i32, i32
  }
  func.func @transform_4(%arg0: i32, %arg1: i32, %arg2: i32) -> (i32, i32) {
    %c0_i32 = arith.constant 0 : i32
    return %arg0, %arg1 : i32, i32
  }
}

module attributes {stable_mosaic.version = 11 : i64} {
  func.func @_fused_matmul_kernel(%arg0: i32, %arg1: i32, %arg2: i32, %arg3: memref<128x128xbf16, #tpu.memory_space<vmem>>, %arg4: memref<128x128xbf16, #tpu.memory_space<vmem>>, %arg5: memref<1x128xf32, #tpu.memory_space<vmem>>, %arg6: memref<128x128xf32, #tpu.memory_space<vmem>>, %arg7: memref<128x128xf32, #tpu.memory_space<vmem>>, %arg8: memref<128x128xf32, #tpu.memory_space<vmem>>) attributes {dimension_semantics = [#tpu.dimension_semantics<parallel>, #tpu.dimension_semantics<parallel>, #tpu.dimension_semantics<arbitrary>], iteration_bounds = array<i64: 1, 1, 1>, scalar_prefetch = 0 : i64, scratch_operands = 1 : i64, tpu.core_type = #tpu.core_type<tc>, window_params = [{transform_indices = @transform_0, window_bounds = array<i64: 128, 128>}, {transform_indices = @transform_1, window_bounds = array<i64: 128, 128>}, {transform_indices = @transform_2, window_bounds = array<i64: 1, 128>}, {transform_indices = @transform_3, window_bounds = array<i64: 128, 128>}, {transform_indices = @transform_4, window_bounds = array<i64: 128, 128>}]} {
    %c0_i32 = arith.constant 0 : i32
    %0 = arith.cmpi eq, %arg2, %c0_i32 : i32
    %1 = arith.extui %0 : i1 to i32
    %c0_i32_0 = arith.constant 0 : i32
    %2 = arith.cmpi ne, %1, %c0_i32_0 : i32
    scf.if %2 {
      %cst_10 = arith.constant 0.000000e+00 : f32
      %12 = vector.broadcast %cst_10 : f32 to vector<128x128xf32>
      %c0_11 = arith.constant 0 : index
      %c0_12 = arith.constant 0 : index
      %13 = vector.load %arg8[%c0_11, %c0_12] : memref<128x128xf32, #tpu.memory_space<vmem>>, vector<128x128xf32>
      tpu.vector_store %arg8[%c0_11, %c0_12], %12 {strides = array<i32>} : memref<128x128xf32, #tpu.memory_space<vmem>>, vector<128x128xf32>,
    } else {
    }
    %c0 = arith.constant 0 : index
    %c0_1 = arith.constant 0 : index
    %3 = vector.load %arg8[%c0, %c0_1] : memref<128x128xf32, #tpu.memory_space<vmem>>, vector<128x128xf32>
    %c0_2 = arith.constant 0 : index
    %c0_3 = arith.constant 0 : index
    %4 = vector.load %arg3[%c0_2, %c0_3] : memref<128x128xbf16, #tpu.memory_space<vmem>>, vector<128x128xbf16>
    %c0_4 = arith.constant 0 : index
    %c0_5 = arith.constant 0 : index
    %5 = vector.load %arg4[%c0_4, %c0_5] : memref<128x128xbf16, #tpu.memory_space<vmem>>, vector<128x128xbf16>
    %cst = arith.constant dense<0.000000e+00> : vector<128x128xf32>
    %6 = tpu.matmul %4, %5, %cst {dimension_numbers = #tpu.dot_dimension_numbers<[1], [0], [0], [1], [0, 0, 1, 1], [], []>} : vector<128x128xbf16>, vector<128x128xbf16>, vector<128x128xf32> -> vector<128x128xf32>
    %7 = arith.addf %3, %6 : vector<128x128xf32>
    %c0_6 = arith.constant 0 : index
    %c0_7 = arith.constant 0 : index
    %8 = vector.load %arg8[%c0_6, %c0_7] : memref<128x128xf32, #tpu.memory_space<vmem>>, vector<128x128xf32>
    tpu.vector_store %arg8[%c0_6, %c0_7], %7 {strides = array<i32>} : memref<128x128xf32, #tpu.memory_space<vmem>>, vector<128x128xf32>,
    %c0_i32_8 = arith.constant 0 : i32
    %9 = arith.cmpi eq, %arg2, %c0_i32_8 : i32
    %10 = arith.extui %9 : i1 to i32
    %c0_i32_9 = arith.constant 0 : i32
    %11 = arith.cmpi ne, %10, %c0_i32_9 : i32
    scf.if %11 {
      %c0_10 = arith.constant 0 : index
      %c0_11 = arith.constant 0 : index
      %12 = vector.load %arg8[%c0_10, %c0_11] : memref<128x128xf32, #tpu.memory_space<vmem>>, vector<128x128xf32>
      %c0_12 = arith.constant 0 : index
      %c0_13 = arith.constant 0 : index
      %13 = vector.load %arg5[%c0_12, %c0_13] : memref<1x128xf32, #tpu.memory_space<vmem>>, vector<1x128xf32>
      %14 = vector.broadcast %13 : vector<1x128xf32> to vector<128x128xf32>
      %15 = arith.addf %12, %14 : vector<128x128xf32>
      %c0_14 = arith.constant 0 : index
      %c0_15 = arith.constant 0 : index
      %16 = vector.load %arg6[%c0_14, %c0_15] : memref<128x128xf32, #tpu.memory_space<vmem>>, vector<128x128xf32>
      %17 = arith.addf %15, %16 : vector<128x128xf32>
      %c0_16 = arith.constant 0 : index
      %c0_17 = arith.constant 0 : index
      %18 = vector.load %arg7[%c0_16, %c0_17] : memref<128x128xf32, #tpu.memory_space<vmem>>, vector<128x128xf32>
      tpu.vector_store %arg7[%c0_16, %c0_17], %17 {strides = array<i32>} : memref<128x128xf32, #tpu.memory_space<vmem>>, vector<128x128xf32>,
    } else {
    }
    return
  }
  func.func @transform_0(%arg0: i32, %arg1: i32, %arg2: i32) -> (i32, i32) {
    %c0_i32 = arith.constant 0 : i32
    return %arg0, %arg2 : i32, i32
  }
  func.func @transform_1(%arg0: i32, %arg1: i32, %arg2: i32) -> (i32, i32) {
    %c0_i32 = arith.constant 0 : i32
    return %arg2, %arg1 : i32, i32
  }
  func.func @transform_2(%arg0: i32, %arg1: i32, %arg2: i32) -> (i32, i32) {
    %c0_i32 = arith.constant 0 : i32
    %c0_i32_0 = arith.constant 0 : i32
    return %c0_i32, %arg1 : i32, i32
  }
  func.func @transform_3(%arg0: i32, %arg1: i32, %arg2: i32) -> (i32, i32) {
    %c0_i32 = arith.constant 0 : i32
    return %arg0, %arg1 : i32, i32
  }
  func.func @transform_4(%arg0: i32, %arg1: i32, %arg2: i32) -> (i32, i32) {
    %c0_i32 = arith.constant 0 : i32
    return %arg0, %arg1 : i32, i32
  }
}

</mosaic_0001>

<bundles_post_ra>
// kernel: fpn_forward.15
= control target key start
LH: loop header
LB: loop body
LE: loop exit
PB: predicated region body
PF: predicated region fallthrough
CT: control target
= control target key end

     0   :  { %s1499_s12 = smov 0   ;;  %s1501_s13 = smov 0   ;;  %s1636_s0 = inlined_call_operand.vmem [shape: bf16[512,128], index: 0, kind: input, shape index: {}]   ;;  %s1637_s1 = inlined_call_operand.vmem [shape: bf16[128,128], index: 1, kind: input, shape index: {}]   ;;  %s1638_s2 = inlined_call_operand.vmem [shape: f32[1,128], index: 2, kind: input, shape index: {}]   ;;  %s1639_s3 = inlined_call_operand.vmem [shape: bf16[512,128], index: 3, kind: output, shape index: {}]  }
   0x1   :  { %s1503_s14 = smov 0  }
   0x2 LB: > { %s32_s15 = sadd.s32 1, %s1473_s13  ;;  %p1128_p0 = scmp.ge.s32.totalorder %s1477_s14, 1  ;;  %s1477_s14 = sphi %s1503_s14, %s13_s14   ;;  %s1473_s13 = sphi %s1501_s13, %s1641_s13   ;;  %s1469_s12 = sphi %s1499_s12, %s1640_s12  }
   0x3   : > { %p34_p1 = scmp.ge.s32.totalorder %s32_s15, 2  ;;  %p188_p2 = scmp.lt.s32.totalorder %s1477_s14, 3 }
   0x5   : > { %s1643_s15 = smov (%p34_p1, %s32_s15), 0  ;;  %p189_p3 = pnand %p1128_p0, %p188_p2 }
   0x6   : > { %s1129_s18 = sshll.u32 (!%p189_p3), %s1469_s12, 5 }
   0x7   : > { %192 = sbr.rel (%p189_p3) target bundleno = 275 (0x113), region = 32  ;;  %p230_p4 = scmp.lt.s32.totalorder (!%p189_p3), %s1129_s18, 63 }
   0xc   : > { %v1431_v0 = vld [vmem:[%s1637_s1 + $0x38] sm:$0xff]   ;;  %v1432_v1 = vld [vmem:[%s1637_s1 + $0x30] sm:$0xff]   ;;  %s1645_s18 = smov (!%p230_p4, %s1129_s18), 63  ;;  %v1433_v2 = vld [vmem:[%s1637_s1 + $0x28] sm:$0xff]  }
   0xd   : > { %1343 = vmatprep.subr.bf16.mxu0 %v1431_v0  ;;  %1391 = vmatprep.subr.bf16.mxu1 %v1431_v0  ;;  %s1130_s23 = sshll.u32 %s1645_s18, 2  ;;  %v1434_v3 = vld [vmem:[%s1637_s1 + $0x20] sm:$0xff]   ;;  %v1435_v6 = vld [vmem:[%s1637_s1 + $0x18] sm:$0xff]   ;;  %v1436_v7 = vld [vmem:[%s1637_s1 + $0x10] sm:$0xff]  }
   0xe   : > { %1344 = vmatpush3.bf16.msra.mxu0 %v1431_v0  ;;  %1399 = vmatpush3.bf16.msra.mxu1 %v1431_v0  ;;  %s1534_s26 = scalar_lea.vmem %s1636_s0, %s1130_s23  ;;  %v1437_v8 = vld [vmem:[%s1637_s1 + $0x8] sm:$0xff]   ;;  %v1438_v9 = vld [vmem:[%s1637_s1] sm:$0xff]   ;;  %s1585_s17 = scalar_lea.vmem %s1639_s3, %s1130_s23 }
   0xf   : > { %1345 = vmatprep.subr.bf16.mxu0 %v1432_v1  ;;  %1392 = vmatprep.subr.bf16.mxu1 %v1432_v1  ;;  %v1439_v4 = vld [vmem:[%s1534_s26] sm:$0xff]   ;;  %v1441_v10 = vld [vmem:[%s1534_s26 + $0x8] sm:$0xff]   ;;  %v1443_v12 = vld [vmem:[%s1534_s26 + $0x10] sm:$0xff]  }
  0x10   : > { %v1440_v5 = vld [vmem:[%s1534_s26 + $0x40] sm:$0xff]   ;;  %1359 = vmatprep.mubr.bf16.mxu0 %v1439_v4  ;;  %v1442_v11 = vld [vmem:[%s1534_s26 + $0x48] sm:$0xff]   ;;  %v1444_v13 = vld [vmem:[%s1534_s26 + $0x50] sm:$0xff]  }
  0x11   : > { %1375 = vmatprep.mubr.bf16.mxu1 %v1440_v5  ;;  %v1445_v14 = vld [vmem:[%s1534_s26 + $0x18] sm:$0xff]   ;;  %v1447_v16 = vld [vmem:[%s1534_s26 + $0x20] sm:$0xff]   ;;  %v1449_v18 = vld [vmem:[%s1534_s26 + $0x28] sm:$0xff]  }
  0x12   : > { %1346 = vmatpush3.bf16.msra.mxu0 %v1432_v1  ;;  %1400 = vmatpush3.bf16.msra.mxu1 %v1432_v1  ;;  %v1446_v15 = vld [vmem:[%s1534_s26 + $0x58] sm:$0xff]   ;;  %v1448_v17 = vld [vmem:[%s1534_s26 + $0x60] sm:$0xff]   ;;  %v1450_v19 = vld [vmem:[%s1534_s26 + $0x68] sm:$0xff]  }
  0x13   : > { %1347 = vmatprep.subr.bf16.mxu0 %v1433_v2  ;;  %1393 = vmatprep.subr.bf16.mxu1 %v1433_v2  ;;  %v1451_v20 = vld [vmem:[%s1534_s26 + $0x30] sm:$0xff]   ;;  %v1453_v22 = vld [vmem:[%s1534_s26 + $0x38] sm:$0xff]   ;;  %v1570_v24 = vld [vmem:[%s1638_s2] ss:$0 sm:$0xff] }
  0x14   : > { %v1452_v21 = vld [vmem:[%s1534_s26 + $0x70] sm:$0xff]   ;;  %v1454_v23 = vld [vmem:[%s1534_s26 + $0x78] sm:$0xff]  }
  0x16   : > { %1348 = vmatpush3.bf16.msra.mxu0 %v1433_v2  ;;  %1401 = vmatpush3.bf16.msra.mxu1 %v1433_v2 }
  0x17   : > { %1349 = vmatprep.subr.bf16.mxu0 %v1434_v3  ;;  %1394 = vmatprep.subr.bf16.mxu1 %v1434_v3 }
  0x1a   : > { %1350 = vmatpush3.bf16.msra.mxu0 %v1434_v3  ;;  %1402 = vmatpush3.bf16.msra.mxu1 %v1434_v3 }
  0x1b   : > { %1351 = vmatprep.subr.bf16.mxu0 %v1435_v6  ;;  %1395 = vmatprep.subr.bf16.mxu1 %v1435_v6 }
  0x1e   : > { %1352 = vmatpush3.bf16.msra.mxu0 %v1435_v6  ;;  %1403 = vmatpush3.bf16.msra.mxu1 %v1435_v6 }
  0x1f   : > { %1353 = vmatprep.subr.bf16.mxu0 %v1436_v7  ;;  %1396 = vmatprep.subr.bf16.mxu1 %v1436_v7 }
  0x22   : > { %1354 = vmatpush3.bf16.msra.mxu0 %v1436_v7  ;;  %1404 = vmatpush3.bf16.msra.mxu1 %v1436_v7 }
  0x23   : > { %1355 = vmatprep.subr.bf16.mxu0 %v1437_v8  ;;  %1397 = vmatprep.subr.bf16.mxu1 %v1437_v8 }
  0x26   : > { %1356 = vmatpush3.bf16.msra.mxu0 %v1437_v8  ;;  %1405 = vmatpush3.bf16.msra.mxu1 %v1437_v8 }
  0x27   : > { %1357 = vmatprep.subr.bf16.mxu0 %v1438_v9  ;;  %1398 = vmatprep.subr.bf16.mxu1 %v1438_v9 }
  0x2a   : > { %1358 = vmatpush3.bf16.msra.mxu0 %v1438_v9  ;;  %1406 = vmatpush3.bf16.msra.mxu1 %v1438_v9 }
  0x2d   : > { %1360 = vmatmul.mubr.bf16.vlgmr.msra.gmra.mxu0 %v1441_v10  ;;  %1376 = vmatmul.mubr.bf16.vlgmr.msra.gmra.mxu1 %v1442_v11 }
  0x2e   : > { %1363 = vmatprep.mubr.bf16.mxu0 %v1443_v12  ;;  %1379 = vmatprep.mubr.bf16.mxu1 %v1444_v13 }
  0x35   : > { %1364 = vmatmul.mubr.bf16.gmra.mxu0 %v1445_v14  ;;  %1380 = vmatmul.mubr.bf16.gmra.mxu1 %v1446_v15 }
  0x36   : > { %1367 = vmatprep.mubr.bf16.mxu0 %v1447_v16  ;;  %1383 = vmatprep.mubr.bf16.mxu1 %v1448_v17 }
  0x3d   : > { %1368 = vmatmul.mubr.bf16.gmra.mxu0 %v1449_v18  ;;  %1384 = vmatmul.mubr.bf16.gmra.mxu1 %v1450_v19 }
  0x3e   : > { %1371 = vmatprep.mubr.bf16.mxu0 %v1451_v20  ;;  %1387 = vmatprep.mubr.bf16.mxu1 %v1452_v21 }
  0x45   : > { %1372 = vmatmul.mubr.bf16.gmra.mxu0 %v1453_v22  ;;  %1388 = vmatmul.mubr.bf16.gmra.mxu1 %v1454_v23 }
  0xed   : > { %v1361_v25 = vpop.f32.mrf.mxu0  ;;  %v1377_v26 = vpop.f32.mrf.mxu1 }
  0xee   : > { %v789_v27 = vadd.f32 %v1361_v25, %v1570_v24  ;;  %v805_v28 = vadd.f32 %v1377_v26, %v1570_v24 }
  0xef   : > { %v554_v29 = vpop.f32.mrf.mxu0  ;;  %v618_v30 = vpop.f32.mrf.mxu1 }
  0xf0   : > { %v787_v31 = vadd.f32 %v1570_v24, %v554_v29  ;;  %v803_v32 = vadd.f32 %v1570_v24, %v618_v30  ;;  %v821_v37 = vmax.f32 %v789_v27, 0.0  ;;  %v837_v38 = vmax.f32 %v805_v28, 0.0 }
  0xf1   : > { %v1362_v33 = vpop.f32.mrf.mxu0  ;;  %v1378_v34 = vpop.f32.mrf.mxu1 }
  0xf2   : > { %v790_v35 = vadd.f32 %v1362_v33, %v1570_v24  ;;  %v806_v36 = vadd.f32 %v1378_v34, %v1570_v24  ;;  %v819_v45 = vmax.f32 %v787_v31, 0.0  ;;  %v835_v46 = vmax.f32 %v803_v32, 0.0 }
  0xf3   : > { %v557_v39 = vpop.f32.mrf.mxu0  ;;  %v621_v40 = vpop.f32.mrf.mxu1 }
  0xf4   : > { %v822_v41 = vmax.f32 %v790_v35, 0.0  ;;  %v838_v42 = vmax.f32 %v806_v36, 0.0  ;;  %v788_v43 = vadd.f32 %v1570_v24, %v557_v39  ;;  %v804_v44 = vadd.f32 %v1570_v24, %v621_v40 }
  0xf5   : > { %v1365_v47 = vpop.f32.mrf.mxu0  ;;  %v1381_v48 = vpop.f32.mrf.mxu1 }
  0xf6   : > { %v1232_v49 = vpack.c.bf16 %v822_v41, %v821_v37  ;;  %v1272_v50 = vpack.c.bf16 %v838_v42, %v837_v38  ;;  %v820_v51 = vmax.f32 %v788_v43, 0.0  ;;  %v836_v52 = vmax.f32 %v804_v44, 0.0 }
  0xf7   : > { %v793_v53 = vadd.f32 %v1365_v47, %v1570_v24  ;;  %v809_v54 = vadd.f32 %v1381_v48, %v1570_v24  ;;  %v570_v55 = vpop.f32.mrf.mxu0  ;;  %v634_v56 = vpop.f32.mrf.mxu1 }
  0xf8   : > { %1304 = vst [vmem:[%s1585_s17 + $0x8] sm:$0xff] %v1232_v49   ;;  %1312 = vst [vmem:[%s1585_s17 + $0x48] sm:$0xff] %v1272_v50   ;;  %v1227_v57 = vpack.c.bf16 %v820_v51, %v819_v45  ;;  %v1267_v58 = vpack.c.bf16 %v836_v52, %v835_v46  ;;  %v791_v59 = vadd.f32 %v1570_v24, %v570_v55 }
  0xf9   : > { %v807_v60 = vadd.f32 %v1570_v24, %v634_v56  ;;  %v1366_v61 = vpop.f32.mrf.mxu0  ;;  %v1382_v62 = vpop.f32.mrf.mxu1  ;;  %v825_v1 = vmax.f32 %v793_v53, 0.0  ;;  %v841_v2 = vmax.f32 %v809_v54, 0.0 }
  0xfa   : > { %1228 = vst [vmem:[%s1585_s17] sm:$0xff] %v1227_v57   ;;  %1311 = vst [vmem:[%s1585_s17 + $0x40] sm:$0xff] %v1267_v58   ;;  %v794_v63 = vadd.f32 %v1366_v61, %v1570_v24  ;;  %v810_v0 = vadd.f32 %v1382_v62, %v1570_v24  ;;  %v823_v9 = vmax.f32 %v791_v59, 0.0 }
  0xfb   : > { %v573_v3 = vpop.f32.mrf.mxu0  ;;  %v637_v4 = vpop.f32.mrf.mxu1  ;;  %v839_v10 = vmax.f32 %v807_v60, 0.0 }
  0xfc   : > { %v826_v5 = vmax.f32 %v794_v63, 0.0  ;;  %v842_v6 = vmax.f32 %v810_v0, 0.0  ;;  %v792_v7 = vadd.f32 %v1570_v24, %v573_v3  ;;  %v808_v8 = vadd.f32 %v1570_v24, %v637_v4 }
  0xfd   : > { %v1369_v11 = vpop.f32.mrf.mxu0  ;;  %v1385_v12 = vpop.f32.mrf.mxu1 }
  0xfe   : > { %v1242_v13 = vpack.c.bf16 %v826_v5, %v825_v1  ;;  %v1282_v14 = vpack.c.bf16 %v842_v6, %v841_v2  ;;  %v824_v15 = vmax.f32 %v792_v7, 0.0  ;;  %v840_v16 = vmax.f32 %v808_v8, 0.0 }
  0xff   : > { %v797_v17 = vadd.f32 %v1369_v11, %v1570_v24  ;;  %v813_v18 = vadd.f32 %v1385_v12, %v1570_v24  ;;  %v586_v19 = vpop.f32.mrf.mxu0  ;;  %v650_v20 = vpop.f32.mrf.mxu1 }
 0x100   : > { %1306 = vst [vmem:[%s1585_s17 + $0x18] sm:$0xff] %v1242_v13   ;;  %1314 = vst [vmem:[%s1585_s17 + $0x58] sm:$0xff] %v1282_v14   ;;  %v1237_v21 = vpack.c.bf16 %v824_v15, %v823_v9  ;;  %v1277_v22 = vpack.c.bf16 %v840_v16, %v839_v10  ;;  %v795_v23 = vadd.f32 %v1570_v24, %v586_v19 }
 0x101   : > { %v811_v25 = vadd.f32 %v1570_v24, %v650_v20  ;;  %v1370_v26 = vpop.f32.mrf.mxu0  ;;  %v1386_v27 = vpop.f32.mrf.mxu1  ;;  %v829_v30 = vmax.f32 %v797_v17, 0.0  ;;  %v845_v31 = vmax.f32 %v813_v18, 0.0 }
 0x102   : > { %1305 = vst [vmem:[%s1585_s17 + $0x10] sm:$0xff] %v1237_v21   ;;  %1313 = vst [vmem:[%s1585_s17 + $0x50] sm:$0xff] %v1277_v22   ;;  %v798_v28 = vadd.f32 %v1370_v26, %v1570_v24  ;;  %v814_v29 = vadd.f32 %v1386_v27, %v1570_v24  ;;  %v827_v38 = vmax.f32 %v795_v23, 0.0 }
 0x103   : > { %v589_v32 = vpop.f32.mrf.mxu0  ;;  %v653_v33 = vpop.f32.mrf.mxu1  ;;  %v843_v39 = vmax.f32 %v811_v25, 0.0 }
 0x104   : > { %v830_v34 = vmax.f32 %v798_v28, 0.0  ;;  %v846_v35 = vmax.f32 %v814_v29, 0.0  ;;  %v796_v36 = vadd.f32 %v1570_v24, %v589_v32  ;;  %v812_v37 = vadd.f32 %v1570_v24, %v653_v33 }
 0x105   : > { %v1373_v40 = vpop.f32.mrf.mxu0  ;;  %v1389_v41 = vpop.f32.mrf.mxu1 }
 0x106   : > { %v1252_v42 = vpack.c.bf16 %v830_v34, %v829_v30  ;;  %v1292_v43 = vpack.c.bf16 %v846_v35, %v845_v31  ;;  %v828_v44 = vmax.f32 %v796_v36, 0.0  ;;  %v844_v45 = vmax.f32 %v812_v37, 0.0 }
 0x107   : > { %v801_v46 = vadd.f32 %v1373_v40, %v1570_v24  ;;  %v817_v47 = vadd.f32 %v1389_v41, %v1570_v24  ;;  %v602_v48 = vpop.f32.mrf.mxu0  ;;  %v666_v49 = vpop.f32.mrf.mxu1 }
 0x108   : > { %1308 = vst [vmem:[%s1585_s17 + $0x28] sm:$0xff] %v1252_v42   ;;  %1316 = vst [vmem:[%s1585_s17 + $0x68] sm:$0xff] %v1292_v43   ;;  %v1247_v50 = vpack.c.bf16 %v828_v44, %v827_v38  ;;  %v1287_v51 = vpack.c.bf16 %v844_v45, %v843_v39  ;;  %v799_v52 = vadd.f32 %v1570_v24, %v602_v48 }
 0x109   : > { %v815_v53 = vadd.f32 %v1570_v24, %v666_v49  ;;  %v1374_v54 = vpop.f32.mrf.mxu0  ;;  %v1390_v55 = vpop.f32.mrf.mxu1  ;;  %v833_v58 = vmax.f32 %v801_v46, 0.0  ;;  %v849_v59 = vmax.f32 %v817_v47, 0.0 }
 0x10a   : > { %1307 = vst [vmem:[%s1585_s17 + $0x20] sm:$0xff] %v1247_v50   ;;  %1315 = vst [vmem:[%s1585_s17 + $0x60] sm:$0xff] %v1287_v51   ;;  %v802_v56 = vadd.f32 %v1374_v54, %v1570_v24  ;;  %v818_v57 = vadd.f32 %v1390_v55, %v1570_v24  ;;  %v831_v2 = vmax.f32 %v799_v52, 0.0 }
 0x10b   : > { %v605_v60 = vpop.f32.mrf.mxu0  ;;  %v669_v61 = vpop.f32.mrf.mxu1  ;;  %v847_v3 = vmax.f32 %v815_v53, 0.0 }
 0x10c   : > { %v834_v62 = vmax.f32 %v802_v56, 0.0  ;;  %v850_v63 = vmax.f32 %v818_v57, 0.0  ;;  %v800_v0 = vadd.f32 %v1570_v24, %v605_v60  ;;  %v816_v1 = vadd.f32 %v1570_v24, %v669_v61 }
 0x10e   : > { %v1262_v4 = vpack.c.bf16 %v834_v62, %v833_v58  ;;  %v1302_v5 = vpack.c.bf16 %v850_v63, %v849_v59  ;;  %v832_v6 = vmax.f32 %v800_v0, 0.0  ;;  %v848_v7 = vmax.f32 %v816_v1, 0.0 }
 0x110   : > { %1310 = vst [vmem:[%s1585_s17 + $0x38] sm:$0xff] %v1262_v4   ;;  %1318 = vst [vmem:[%s1585_s17 + $0x78] sm:$0xff] %v1302_v5   ;;  %v1257_v8 = vpack.c.bf16 %v832_v6, %v831_v2  ;;  %v1297_v9 = vpack.c.bf16 %v848_v7, %v847_v3 }
 0x112   : > { %1309 = vst [vmem:[%s1585_s17 + $0x30] sm:$0xff] %v1257_v8   ;;  %1317 = vst [vmem:[%s1585_s17 + $0x70] sm:$0xff] %v1297_v9  }
 0x113 PF: > { %s13_s14 = sadd.s32 1, %s1477_s14   ;;  %s1640_s12 = smov %s1473_s13 }
 0x114   : > { %p10_p5 = scmp.ge.s32.totalorder %s13_s14, 4   ;;  %s1641_s13 = smov %s1643_s15 }
 0x116   :  { %12 = sbr.rel (!%p10_p5) target bundleno = 2 (0x2), region = 76 }

// kernel: fpn_forward.14
= control target key start
LH: loop header
LB: loop body
LE: loop exit
PB: predicated region body
PF: predicated region fallthrough
CT: control target
= control target key end

     0   :  { %s1744_s12 = smov 0   ;;  %s1746_s13 = smov 0   ;;  %s1918_s0 = inlined_call_operand.vmem [shape: bf16[512,256], index: 0, kind: input, shape index: {}]   ;;  %s1919_s1 = inlined_call_operand.vmem [shape: bf16[256,128], index: 1, kind: input, shape index: {}]   ;;  %s1920_s2 = inlined_call_operand.vmem [shape: f32[1,128], index: 2, kind: input, shape index: {}]   ;;  %s1921_s3 = inlined_call_operand.vmem [shape: bf16[512,128], index: 3, kind: output, shape index: {}]  }
   0x1   :  { %s1748_s14 = smov 0  }
   0x2 LB: > { %s32_s15 = sadd.s32 1, %s1718_s13  ;;  %p1267_p0 = scmp.ge.s32.totalorder %s1722_s14, 1  ;;  %s1722_s14 = sphi %s1748_s14, %s13_s14   ;;  %s1718_s13 = sphi %s1746_s13, %s1923_s13   ;;  %s1714_s12 = sphi %s1744_s12, %s1922_s12  }
   0x3   : > { %p34_p1 = scmp.ge.s32.totalorder %s32_s15, 2  ;;  %p191_p2 = scmp.lt.s32.totalorder %s1722_s14, 3 }
   0x5   : > { %s1925_s15 = smov (%p34_p1, %s32_s15), 0  ;;  %p192_p3 = pnand %p1267_p0, %p191_p2 }
   0x6   : > { %s1268_s18 = sshll.u32 (!%p192_p3), %s1714_s12, 5 }
   0x7   : > { %195 = sbr.rel (%p192_p3) target bundleno = 309 (0x135), region = 32  ;;  %p236_p4 = scmp.lt.s32.totalorder (!%p192_p3), %s1268_s18, 63 }
   0xc   : > { %v1636_v0 = vld [vmem:[%s1919_s1 + $0x78] sm:$0xff]   ;;  %v1638_v2 = vld [vmem:[%s1919_s1 + $0x70] sm:$0xff]   ;;  %v1640_v4 = vld [vmem:[%s1919_s1 + $0x68] sm:$0xff]   ;;  %s1927_s18 = smov (!%p236_p4, %s1268_s18), 63 }
   0xd   : > { %v1637_v1 = vld [vmem:[%s1919_s1 + $0x38] sm:$0xff]   ;;  %1484 = vmatprep.subr.bf16.mxu0 %v1636_v0  ;;  %1596 = vmatprep.subr.bf16.mxu1 %v1636_v0  ;;  %v1639_v3 = vld [vmem:[%s1919_s1 + $0x30] sm:$0xff]   ;;  %v1641_v5 = vld [vmem:[%s1919_s1 + $0x28] sm:$0xff]   ;;  %s1356_s6 = sshll.u32 %s1927_s18, 3  ;;  %s1272_s5 = sshll.u32 %s1927_s18, 2 }
   0xe   : > { %1485 = vmatpush3.bf16.msra.mxu0 %v1637_v1  ;;  %1604 = vmatpush3.bf16.msra.mxu1 %v1637_v1  ;;  %v1642_v6 = vld [vmem:[%s1919_s1 + $0x60] sm:$0xff]   ;;  %v1644_v8 = vld [vmem:[%s1919_s1 + $0x58] sm:$0xff]   ;;  %s1795_s11 = scalar_lea.vmem %s1918_s0, %s1356_s6  ;;  %v1646_v10 = vld [vmem:[%s1919_s1 + $0x50] sm:$0xff]   ;;  %s1863_s8 = scalar_lea.vmem %s1921_s3, %s1272_s5 }
   0xf   : > { %1486 = vmatprep.subr.bf16.mxu0 %v1638_v2  ;;  %1597 = vmatprep.subr.bf16.mxu1 %v1638_v2  ;;  %v1643_v7 = vld [vmem:[%s1919_s1 + $0x20] sm:$0xff]   ;;  %v1645_v9 = vld [vmem:[%s1919_s1 + $0x18] sm:$0xff]   ;;  %v1647_v13 = vld [vmem:[%s1919_s1 + $0x10] sm:$0xff]  }
  0x10   : > { %v1654_v11 = vld [vmem:[%s1795_s11 + $0x4] ss:$8 sps:$4 sm:$0xff]   ;;  %v1652_v18 = vld [vmem:[%s1795_s11] ss:$8 sps:$4 sm:$0xff]   ;;  %v1658_v20 = vld [vmem:[%s1795_s11 + $0x14] ss:$8 sps:$4 sm:$0xff]  }
  0x11   : > { %v1657_v12 = vld [vmem:[%s1795_s11 + $0x84] ss:$8 sps:$4 sm:$0xff]   ;;  %688 = vmatprep.mubr.bf16.mxu0 %v1654_v11  ;;  %v1655_v19 = vld [vmem:[%s1795_s11 + $0x80] ss:$8 sps:$4 sm:$0xff]   ;;  %v1660_v21 = vld [vmem:[%s1795_s11 + $0x94] ss:$8 sps:$4 sm:$0xff]  }
  0x12   : > { %1487 = vmatpush3.bf16.msra.mxu0 %v1639_v3  ;;  %1605 = vmatpush3.bf16.msra.mxu1 %v1639_v3  ;;  %v1648_v14 = vld [vmem:[%s1919_s1 + $0x48] sm:$0xff]   ;;  %v1650_v16 = vld [vmem:[%s1919_s1 + $0x40] sm:$0xff]   ;;  %v1662_v22 = vld [vmem:[%s1795_s11 + $0x10] ss:$8 sps:$4 sm:$0xff]  }
  0x13   : > { %1488 = vmatprep.subr.bf16.mxu0 %v1640_v4  ;;  %1598 = vmatprep.subr.bf16.mxu1 %v1640_v4  ;;  %v1649_v15 = vld [vmem:[%s1919_s1 + $0x8] sm:$0xff]   ;;  %v1651_v17 = vld [vmem:[%s1919_s1] sm:$0xff]   ;;  %v1663_v23 = vld [vmem:[%s1795_s11 + $0x90] ss:$8 sps:$4 sm:$0xff]  }
  0x14   : > { %752 = vmatprep.mubr.bf16.mxu1 %v1657_v12  ;;  %v1664_v24 = vld [vmem:[%s1795_s11 + $0x24] ss:$8 sps:$4 sm:$0xff]   ;;  %v1668_v26 = vld [vmem:[%s1795_s11 + $0x20] ss:$8 sps:$4 sm:$0xff]   ;;  %v1670_v28 = vld [vmem:[%s1795_s11 + $0x34] ss:$8 sps:$4 sm:$0xff]  }
  0x15   : > { %v1666_v25 = vld [vmem:[%s1795_s11 + $0xa4] ss:$8 sps:$4 sm:$0xff]   ;;  %v1669_v27 = vld [vmem:[%s1795_s11 + $0xa0] ss:$8 sps:$4 sm:$0xff]   ;;  %v1672_v29 = vld [vmem:[%s1795_s11 + $0xb4] ss:$8 sps:$4 sm:$0xff]  }
  0x16   : > { %1489 = vmatpush3.bf16.msra.mxu0 %v1641_v5  ;;  %1606 = vmatpush3.bf16.msra.mxu1 %v1641_v5  ;;  %v1674_v30 = vld [vmem:[%s1795_s11 + $0x30] ss:$8 sps:$4 sm:$0xff]   ;;  %v1676_v32 = vld [vmem:[%s1795_s11 + $0x44] ss:$8 sps:$4 sm:$0xff]   ;;  %v1680_v34 = vld [vmem:[%s1795_s11 + $0x40] ss:$8 sps:$4 sm:$0xff]  }
  0x17   : > { %1490 = vmatprep.subr.bf16.mxu0 %v1642_v6  ;;  %1599 = vmatprep.subr.bf16.mxu1 %v1642_v6  ;;  %v1675_v31 = vld [vmem:[%s1795_s11 + $0xb0] ss:$8 sps:$4 sm:$0xff]   ;;  %v1678_v33 = vld [vmem:[%s1795_s11 + $0xc4] ss:$8 sps:$4 sm:$0xff]   ;;  %v1681_v35 = vld [vmem:[%s1795_s11 + $0xc0] ss:$8 sps:$4 sm:$0xff]  }
  0x18   : > { %v1682_v36 = vld [vmem:[%s1795_s11 + $0x54] ss:$8 sps:$4 sm:$0xff]   ;;  %v1686_v38 = vld [vmem:[%s1795_s11 + $0x50] ss:$8 sps:$4 sm:$0xff]   ;;  %v1688_v40 = vld [vmem:[%s1795_s11 + $0x64] ss:$8 sps:$4 sm:$0xff]  }
  0x19   : > { %v1684_v37 = vld [vmem:[%s1795_s11 + $0xd4] ss:$8 sps:$4 sm:$0xff]   ;;  %v1687_v39 = vld [vmem:[%s1795_s11 + $0xd0] ss:$8 sps:$4 sm:$0xff]   ;;  %v1690_v41 = vld [vmem:[%s1795_s11 + $0xe4] ss:$8 sps:$4 sm:$0xff]  }
  0x1a   : > { %1491 = vmatpush3.bf16.msra.mxu0 %v1643_v7  ;;  %1607 = vmatpush3.bf16.msra.mxu1 %v1643_v7  ;;  %v1692_v42 = vld [vmem:[%s1795_s11 + $0x60] ss:$8 sps:$4 sm:$0xff]   ;;  %v1694_v44 = vld [vmem:[%s1795_s11 + $0x74] ss:$8 sps:$4 sm:$0xff]   ;;  %v1698_v46 = vld [vmem:[%s1795_s11 + $0x70] ss:$8 sps:$4 sm:$0xff]  }
  0x1b   : > { %1492 = vmatprep.subr.bf16.mxu0 %v1644_v8  ;;  %1600 = vmatprep.subr.bf16.mxu1 %v1644_v8  ;;  %v1693_v43 = vld [vmem:[%s1795_s11 + $0xe0] ss:$8 sps:$4 sm:$0xff]   ;;  %v1696_v45 = vld [vmem:[%s1795_s11 + $0xf4] ss:$8 sps:$4 sm:$0xff]   ;;  %v1699_v47 = vld [vmem:[%s1795_s11 + $0xf0] ss:$8 sps:$4 sm:$0xff]  }
  0x1c   : > { %v1853_v53 = vld [vmem:[%s1920_s2] ss:$0 sm:$0xff] }
  0x1e   : > { %1493 = vmatpush3.bf16.msra.mxu0 %v1645_v9  ;;  %1608 = vmatpush3.bf16.msra.mxu1 %v1645_v9 }
  0x1f   : > { %1494 = vmatprep.subr.bf16.mxu0 %v1646_v10  ;;  %1601 = vmatprep.subr.bf16.mxu1 %v1646_v10 }
  0x22   : > { %1495 = vmatpush3.bf16.msra.mxu0 %v1647_v13  ;;  %1609 = vmatpush3.bf16.msra.mxu1 %v1647_v13 }
  0x23   : > { %1496 = vmatprep.subr.bf16.mxu0 %v1648_v14  ;;  %1602 = vmatprep.subr.bf16.mxu1 %v1648_v14 }
  0x26   : > { %1497 = vmatpush3.bf16.msra.mxu0 %v1649_v15  ;;  %1610 = vmatpush3.bf16.msra.mxu1 %v1649_v15 }
  0x27   : > { %1498 = vmatprep.subr.bf16.mxu0 %v1650_v16  ;;  %1603 = vmatprep.subr.bf16.mxu1 %v1650_v16 }
  0x2a   : > { %1499 = vmatpush3.bf16.msra.mxu0 %v1651_v17  ;;  %1611 = vmatpush3.bf16.msra.mxu1 %v1651_v17 }
  0x2d   : > { %689 = vmatmul.mubr.bf16.vlgmr.msra.gmra.mxu0 %v1652_v18  ;;  %753 = vmatmul.mubr.bf16.vlgmr.msra.gmra.mxu1 %v1655_v19 }
  0x2e   : > { %696 = vmatprep.mubr.bf16.mxu0 %v1658_v20  ;;  %760 = vmatprep.mubr.bf16.mxu1 %v1660_v21 }
  0x35   : > { %697 = vmatmul.mubr.bf16.gmra.mxu0 %v1662_v22  ;;  %761 = vmatmul.mubr.bf16.gmra.mxu1 %v1663_v23 }
  0x36   : > { %704 = vmatprep.mubr.bf16.mxu0 %v1664_v24  ;;  %768 = vmatprep.mubr.bf16.mxu1 %v1666_v25 }
  0x3d   : > { %705 = vmatmul.mubr.bf16.gmra.mxu0 %v1668_v26  ;;  %769 = vmatmul.mubr.bf16.gmra.mxu1 %v1669_v27 }
  0x3e   : > { %712 = vmatprep.mubr.bf16.mxu0 %v1670_v28  ;;  %776 = vmatprep.mubr.bf16.mxu1 %v1672_v29 }
  0x45   : > { %713 = vmatmul.mubr.bf16.gmra.mxu0 %v1674_v30  ;;  %777 = vmatmul.mubr.bf16.gmra.mxu1 %v1675_v31 }
  0x46   : > { %720 = vmatprep.mubr.bf16.mxu0 %v1676_v32  ;;  %784 = vmatprep.mubr.bf16.mxu1 %v1678_v33 }
  0x4d   : > { %721 = vmatmul.mubr.bf16.gmra.mxu0 %v1680_v34  ;;  %785 = vmatmul.mubr.bf16.gmra.mxu1 %v1681_v35 }
  0x4e   : > { %728 = vmatprep.mubr.bf16.mxu0 %v1682_v36  ;;  %792 = vmatprep.mubr.bf16.mxu1 %v1684_v37 }
  0x55   : > { %729 = vmatmul.mubr.bf16.gmra.mxu0 %v1686_v38  ;;  %793 = vmatmul.mubr.bf16.gmra.mxu1 %v1687_v39 }
  0x56   : > { %736 = vmatprep.mubr.bf16.mxu0 %v1688_v40  ;;  %800 = vmatprep.mubr.bf16.mxu1 %v1690_v41 }
  0x5d   : > { %737 = vmatmul.mubr.bf16.gmra.mxu0 %v1692_v42  ;;  %801 = vmatmul.mubr.bf16.gmra.mxu1 %v1693_v43 }
  0x5e   : > { %744 = vmatprep.mubr.bf16.mxu0 %v1694_v44  ;;  %808 = vmatprep.mubr.bf16.mxu1 %v1696_v45 }
  0x65   : > { %745 = vmatmul.mubr.bf16.gmra.mxu0 %v1698_v46  ;;  %809 = vmatmul.mubr.bf16.gmra.mxu1 %v1699_v47 }
  0xed   : > { %v1500_v48 = vpop.f32.mrf.mxu0  ;;  %v1548_v49 = vpop.f32.mrf.mxu1 }
  0xef   : > { %v1501_v50 = vpop.f32.mrf.mxu0  ;;  %v1549_v51 = vpop.f32.mrf.mxu1 }
  0xf0   : > { %v1502_v52 = vadd.f32 %v1501_v50, %v1500_v48  ;;  %v1550_v54 = vadd.f32 %v1549_v51, %v1548_v49 }
  0xf1   : > { %v1503_v55 = vpop.f32.mrf.mxu0  ;;  %v1551_v56 = vpop.f32.mrf.mxu1 }
  0xf2   : > { %v923_v57 = vadd.f32 %v1502_v52, %v1853_v53  ;;  %v939_v58 = vadd.f32 %v1550_v54, %v1853_v53 }
  0xf3   : > { %v1504_v59 = vpop.f32.mrf.mxu0  ;;  %v1552_v60 = vpop.f32.mrf.mxu1 }
  0xf4   : > { %v1505_v61 = vadd.f32 %v1504_v59, %v1503_v55  ;;  %v1553_v62 = vadd.f32 %v1552_v60, %v1551_v56  ;;  %v955_v3 = vmax.f32 %v923_v57, 0.0  ;;  %v971_v4 = vmax.f32 %v939_v58, 0.0 }
  0xf5   : > { %v1506_v63 = vpop.f32.mrf.mxu0  ;;  %v1554_v0 = vpop.f32.mrf.mxu1 }
  0xf6   : > { %v924_v1 = vadd.f32 %v1505_v61, %v1853_v53  ;;  %v940_v2 = vadd.f32 %v1553_v62, %v1853_v53 }
  0xf7   : > { %v1507_v5 = vpop.f32.mrf.mxu0  ;;  %v1555_v6 = vpop.f32.mrf.mxu1 }
  0xf8   : > { %v956_v7 = vmax.f32 %v924_v1, 0.0  ;;  %v972_v8 = vmax.f32 %v940_v2, 0.0  ;;  %v1508_v9 = vadd.f32 %v1507_v5, %v1506_v63  ;;  %v1556_v10 = vadd.f32 %v1555_v6, %v1554_v0 }
  0xf9   : > { %v1509_v11 = vpop.f32.mrf.mxu0  ;;  %v1557_v12 = vpop.f32.mrf.mxu1 }
  0xfa   : > { %v1392_v13 = vpack.c.bf16 %v956_v7, %v955_v3  ;;  %v1432_v14 = vpack.c.bf16 %v972_v8, %v971_v4  ;;  %v925_v15 = vadd.f32 %v1508_v9, %v1853_v53  ;;  %v941_v16 = vadd.f32 %v1556_v10, %v1853_v53 }
  0xfb   : > { %v1510_v17 = vpop.f32.mrf.mxu0  ;;  %v1558_v18 = vpop.f32.mrf.mxu1 }
  0xfc   : > { %1393 = vst [vmem:[%s1863_s8] sm:$0xff] %v1392_v13   ;;  %1476 = vst [vmem:[%s1863_s8 + $0x40] sm:$0xff] %v1432_v14   ;;  %v1511_v19 = vadd.f32 %v1510_v17, %v1509_v11  ;;  %v1559_v20 = vadd.f32 %v1558_v18, %v1557_v12  ;;  %v957_v25 = vmax.f32 %v925_v15, 0.0  ;;  %v973_v26 = vmax.f32 %v941_v16, 0.0 }
  0xfd   : > { %v1512_v21 = vpop.f32.mrf.mxu0  ;;  %v1560_v22 = vpop.f32.mrf.mxu1 }
  0xfe   : > { %v926_v23 = vadd.f32 %v1511_v19, %v1853_v53  ;;  %v942_v24 = vadd.f32 %v1559_v20, %v1853_v53 }
  0xff   : > { %v1513_v27 = vpop.f32.mrf.mxu0  ;;  %v1561_v28 = vpop.f32.mrf.mxu1 }
 0x100   : > { %v958_v29 = vmax.f32 %v926_v23, 0.0  ;;  %v974_v30 = vmax.f32 %v942_v24, 0.0  ;;  %v1514_v31 = vadd.f32 %v1513_v27, %v1512_v21  ;;  %v1562_v32 = vadd.f32 %v1561_v28, %v1560_v22 }
 0x101   : > { %v1515_v33 = vpop.f32.mrf.mxu0  ;;  %v1563_v34 = vpop.f32.mrf.mxu1 }
 0x102   : > { %v1397_v35 = vpack.c.bf16 %v958_v29, %v957_v25  ;;  %v1437_v36 = vpack.c.bf16 %v974_v30, %v973_v26  ;;  %v927_v37 = vadd.f32 %v1514_v31, %v1853_v53  ;;  %v943_v38 = vadd.f32 %v1562_v32, %v1853_v53 }
 0x103   : > { %v1516_v39 = vpop.f32.mrf.mxu0  ;;  %v1564_v40 = vpop.f32.mrf.mxu1 }
 0x104   : > { %1469 = vst [vmem:[%s1863_s8 + $0x8] sm:$0xff] %v1397_v35   ;;  %1477 = vst [vmem:[%s1863_s8 + $0x48] sm:$0xff] %v1437_v36   ;;  %v1517_v41 = vadd.f32 %v1516_v39, %v1515_v33  ;;  %v1565_v42 = vadd.f32 %v1564_v40, %v1563_v34  ;;  %v959_v47 = vmax.f32 %v927_v37, 0.0  ;;  %v975_v48 = vmax.f32 %v943_v38, 0.0 }
 0x105   : > { %v1518_v43 = vpop.f32.mrf.mxu0  ;;  %v1566_v44 = vpop.f32.mrf.mxu1 }
 0x106   : > { %v928_v45 = vadd.f32 %v1517_v41, %v1853_v53  ;;  %v944_v46 = vadd.f32 %v1565_v42, %v1853_v53 }
 0x107   : > { %v1519_v49 = vpop.f32.mrf.mxu0  ;;  %v1567_v50 = vpop.f32.mrf.mxu1 }
 0x108   : > { %v960_v51 = vmax.f32 %v928_v45, 0.0  ;;  %v976_v52 = vmax.f32 %v944_v46, 0.0  ;;  %v1520_v54 = vadd.f32 %v1519_v49, %v1518_v43  ;;  %v1568_v55 = vadd.f32 %v1567_v50, %v1566_v44 }
 0x109   : > { %v1521_v56 = vpop.f32.mrf.mxu0  ;;  %v1569_v57 = vpop.f32.mrf.mxu1 }
 0x10a   : > { %v1402_v58 = vpack.c.bf16 %v960_v51, %v959_v47  ;;  %v1442_v59 = vpack.c.bf16 %v976_v52, %v975_v48  ;;  %v929_v60 = vadd.f32 %v1520_v54, %v1853_v53  ;;  %v945_v61 = vadd.f32 %v1568_v55, %v1853_v53 }
 0x10b   : > { %v1522_v62 = vpop.f32.mrf.mxu0  ;;  %v1570_v63 = vpop.f32.mrf.mxu1 }
 0x10c   : > { %1470 = vst [vmem:[%s1863_s8 + $0x10] sm:$0xff] %v1402_v58   ;;  %1478 = vst [vmem:[%s1863_s8 + $0x50] sm:$0xff] %v1442_v59   ;;  %v1523_v0 = vadd.f32 %v1522_v62, %v1521_v56  ;;  %v1571_v1 = vadd.f32 %v1570_v63, %v1569_v57  ;;  %v961_v6 = vmax.f32 %v929_v60, 0.0  ;;  %v977_v7 = vmax.f32 %v945_v61, 0.0 }
 0x10d   : > { %v1524_v2 = vpop.f32.mrf.mxu0  ;;  %v1572_v3 = vpop.f32.mrf.mxu1 }
 0x10e   : > { %v930_v4 = vadd.f32 %v1523_v0, %v1853_v53  ;;  %v946_v5 = vadd.f32 %v1571_v1, %v1853_v53 }
 0x10f   : > { %v1525_v8 = vpop.f32.mrf.mxu0  ;;  %v1573_v9 = vpop.f32.mrf.mxu1 }
 0x110   : > { %v962_v10 = vmax.f32 %v930_v4, 0.0  ;;  %v978_v11 = vmax.f32 %v946_v5, 0.0  ;;  %v1526_v12 = vadd.f32 %v1525_v8, %v1524_v2  ;;  %v1574_v13 = vadd.f32 %v1573_v9, %v1572_v3 }
 0x111   : > { %v1527_v14 = vpop.f32.mrf.mxu0  ;;  %v1575_v15 = vpop.f32.mrf.mxu1 }
 0x112   : > { %v1407_v16 = vpack.c.bf16 %v962_v10, %v961_v6  ;;  %v1447_v17 = vpack.c.bf16 %v978_v11, %v977_v7  ;;  %v931_v18 = vadd.f32 %v1526_v12, %v1853_v53  ;;  %v947_v19 = vadd.f32 %v1574_v13, %v1853_v53 }
 0x113   : > { %v1528_v20 = vpop.f32.mrf.mxu0  ;;  %v1576_v21 = vpop.f32.mrf.mxu1 }
 0x114   : > { %1471 = vst [vmem:[%s1863_s8 + $0x18] sm:$0xff] %v1407_v16   ;;  %1479 = vst [vmem:[%s1863_s8 + $0x58] sm:$0xff] %v1447_v17   ;;  %v1529_v22 = vadd.f32 %v1528_v20, %v1527_v14  ;;  %v1577_v23 = vadd.f32 %v1576_v21, %v1575_v15  ;;  %v963_v28 = vmax.f32 %v931_v18, 0.0  ;;  %v979_v29 = vmax.f32 %v947_v19, 0.0 }
 0x115   : > { %v1530_v24 = vpop.f32.mrf.mxu0  ;;  %v1578_v25 = vpop.f32.mrf.mxu1 }
 0x116   : > { %v932_v26 = vadd.f32 %v1529_v22, %v1853_v53  ;;  %v948_v27 = vadd.f32 %v1577_v23, %v1853_v53 }
 0x117   : > { %v1531_v30 = vpop.f32.mrf.mxu0  ;;  %v1579_v31 = vpop.f32.mrf.mxu1 }
 0x118   : > { %v964_v32 = vmax.f32 %v932_v26, 0.0  ;;  %v980_v33 = vmax.f32 %v948_v27, 0.0  ;;  %v1532_v34 = vadd.f32 %v1531_v30, %v1530_v24  ;;  %v1580_v35 = vadd.f32 %v1579_v31, %v1578_v25 }
 0x119   : > { %v1533_v36 = vpop.f32.mrf.mxu0  ;;  %v1581_v37 = vpop.f32.mrf.mxu1 }
 0x11a   : > { %v1412_v38 = vpack.c.bf16 %v964_v32, %v963_v28  ;;  %v1452_v39 = vpack.c.bf16 %v980_v33, %v979_v29  ;;  %v933_v40 = vadd.f32 %v1532_v34, %v1853_v53  ;;  %v949_v41 = vadd.f32 %v1580_v35, %v1853_v53 }
 0x11b   : > { %v1534_v42 = vpop.f32.mrf.mxu0  ;;  %v1582_v43 = vpop.f32.mrf.mxu1 }
 0x11c   : > { %1472 = vst [vmem:[%s1863_s8 + $0x20] sm:$0xff] %v1412_v38   ;;  %1480 = vst [vmem:[%s1863_s8 + $0x60] sm:$0xff] %v1452_v39   ;;  %v1535_v44 = vadd.f32 %v1534_v42, %v1533_v36  ;;  %v1583_v45 = vadd.f32 %v1582_v43, %v1581_v37  ;;  %v965_v50 = vmax.f32 %v933_v40, 0.0  ;;  %v981_v51 = vmax.f32 %v949_v41, 0.0 }
 0x11d   : > { %v1536_v46 = vpop.f32.mrf.mxu0  ;;  %v1584_v47 = vpop.f32.mrf.mxu1 }
 0x11e   : > { %v934_v48 = vadd.f32 %v1535_v44, %v1853_v53  ;;  %v950_v49 = vadd.f32 %v1583_v45, %v1853_v53 }
 0x11f   : > { %v1537_v52 = vpop.f32.mrf.mxu0  ;;  %v1585_v54 = vpop.f32.mrf.mxu1 }
 0x120   : > { %v966_v55 = vmax.f32 %v934_v48, 0.0  ;;  %v982_v56 = vmax.f32 %v950_v49, 0.0  ;;  %v1538_v57 = vadd.f32 %v1537_v52, %v1536_v46  ;;  %v1586_v58 = vadd.f32 %v1585_v54, %v1584_v47 }
 0x121   : > { %v1539_v59 = vpop.f32.mrf.mxu0  ;;  %v1587_v60 = vpop.f32.mrf.mxu1 }
 0x122   : > { %v1417_v61 = vpack.c.bf16 %v966_v55, %v965_v50  ;;  %v1457_v62 = vpack.c.bf16 %v982_v56, %v981_v51  ;;  %v935_v63 = vadd.f32 %v1538_v57, %v1853_v53  ;;  %v951_v0 = vadd.f32 %v1586_v58, %v1853_v53 }
 0x123   : > { %v1540_v1 = vpop.f32.mrf.mxu0  ;;  %v1588_v2 = vpop.f32.mrf.mxu1 }
 0x124   : > { %1473 = vst [vmem:[%s1863_s8 + $0x28] sm:$0xff] %v1417_v61   ;;  %1481 = vst [vmem:[%s1863_s8 + $0x68] sm:$0xff] %v1457_v62   ;;  %v1541_v3 = vadd.f32 %v1540_v1, %v1539_v59  ;;  %v1589_v4 = vadd.f32 %v1588_v2, %v1587_v60  ;;  %v967_v9 = vmax.f32 %v935_v63, 0.0  ;;  %v983_v10 = vmax.f32 %v951_v0, 0.0 }
 0x125   : > { %v1542_v5 = vpop.f32.mrf.mxu0  ;;  %v1590_v6 = vpop.f32.mrf.mxu1 }
 0x126   : > { %v936_v7 = vadd.f32 %v1541_v3, %v1853_v53  ;;  %v952_v8 = vadd.f32 %v1589_v4, %v1853_v53 }
 0x127   : > { %v1543_v11 = vpop.f32.mrf.mxu0  ;;  %v1591_v12 = vpop.f32.mrf.mxu1 }
 0x128   : > { %v968_v13 = vmax.f32 %v936_v7, 0.0  ;;  %v984_v14 = vmax.f32 %v952_v8, 0.0  ;;  %v1544_v15 = vadd.f32 %v1543_v11, %v1542_v5  ;;  %v1592_v16 = vadd.f32 %v1591_v12, %v1590_v6 }
 0x129   : > { %v1545_v17 = vpop.f32.mrf.mxu0  ;;  %v1593_v18 = vpop.f32.mrf.mxu1 }
 0x12a   : > { %v1422_v19 = vpack.c.bf16 %v968_v13, %v967_v9  ;;  %v1462_v20 = vpack.c.bf16 %v984_v14, %v983_v10  ;;  %v937_v23 = vadd.f32 %v1544_v15, %v1853_v53  ;;  %v953_v24 = vadd.f32 %v1592_v16, %v1853_v53 }
 0x12b   : > { %v1546_v21 = vpop.f32.mrf.mxu0  ;;  %v1594_v22 = vpop.f32.mrf.mxu1 }
 0x12c   : > { %1474 = vst [vmem:[%s1863_s8 + $0x30] sm:$0xff] %v1422_v19   ;;  %1482 = vst [vmem:[%s1863_s8 + $0x70] sm:$0xff] %v1462_v20   ;;  %v1547_v25 = vadd.f32 %v1546_v21, %v1545_v17  ;;  %v1595_v26 = vadd.f32 %v1594_v22, %v1593_v18  ;;  %v969_v29 = vmax.f32 %v937_v23, 0.0  ;;  %v985_v30 = vmax.f32 %v953_v24, 0.0 }
 0x12e   : > { %v938_v27 = vadd.f32 %v1547_v25, %v1853_v53  ;;  %v954_v28 = vadd.f32 %v1595_v26, %v1853_v53 }
 0x130   : > { %v970_v31 = vmax.f32 %v938_v27, 0.0  ;;  %v986_v32 = vmax.f32 %v954_v28, 0.0 }
 0x132   : > { %v1427_v33 = vpack.c.bf16 %v970_v31, %v969_v29  ;;  %v1467_v34 = vpack.c.bf16 %v986_v32, %v985_v30 }
 0x134   : > { %1475 = vst [vmem:[%s1863_s8 + $0x38] sm:$0xff] %v1427_v33   ;;  %1483 = vst [vmem:[%s1863_s8 + $0x78] sm:$0xff] %v1467_v34  }
 0x135 PF: > { %s13_s14 = sadd.s32 1, %s1722_s14   ;;  %s1922_s12 = smov %s1718_s13 }
 0x136   : > { %p10_p5 = scmp.ge.s32.totalorder %s13_s14, 4   ;;  %s1923_s13 = smov %s1925_s15 }
 0x138   :  { %12 = sbr.rel (!%p10_p5) target bundleno = 2 (0x2), region = 76 }

// kernel: fpn_forward.16
= control target key start
LH: loop header
LB: loop body
LE: loop exit
PB: predicated region body
PF: predicated region fallthrough
CT: control target
= control target key end

     0   :  { %s939_s1 = inlined_call_operand.vmem [shape: bf16[256,128], index: 1, kind: input, shape index: {}]   ;;  %s940_s0 = inlined_call_operand.vmem [shape: bf16[128,256], index: 0, kind: input, shape index: {}]   ;;  %s941_s2 = inlined_call_operand.vmem [shape: f32[1,128], index: 2, kind: input, shape index: {}]   ;;  %s942_s3 = inlined_call_operand.vmem [shape: bf16[128,128], index: 3, kind: output, shape index: {}]  }
   0x1   :  { %v738_v0 = vld [vmem:[%s939_s1 + $0x78] sm:$0xff]   ;;  %v740_v2 = vld [vmem:[%s939_s1 + $0x70] sm:$0xff]   ;;  %v742_v4 = vld [vmem:[%s939_s1 + $0x68] sm:$0xff]  }
   0x2   :  { %v739_v1 = vld [vmem:[%s939_s1 + $0x38] sm:$0xff]   ;;  %658 = vmatprep.subr.bf16.mxu0 %v738_v0  ;;  %722 = vmatprep.subr.bf16.mxu1 %v738_v0  ;;  %v741_v3 = vld [vmem:[%s939_s1 + $0x30] sm:$0xff]   ;;  %v743_v5 = vld [vmem:[%s939_s1 + $0x28] sm:$0xff]  }
   0x3   :  { %659 = vmatpush3.bf16.msra.mxu0 %v739_v1  ;;  %730 = vmatpush3.bf16.msra.mxu1 %v739_v1  ;;  %v744_v6 = vld [vmem:[%s939_s1 + $0x60] sm:$0xff]   ;;  %v746_v8 = vld [vmem:[%s939_s1 + $0x58] sm:$0xff]   ;;  %v748_v10 = vld [vmem:[%s939_s1 + $0x50] sm:$0xff]  }
   0x4   :  { %660 = vmatprep.subr.bf16.mxu0 %v740_v2  ;;  %723 = vmatprep.subr.bf16.mxu1 %v740_v2  ;;  %v745_v7 = vld [vmem:[%s939_s1 + $0x20] sm:$0xff]   ;;  %v747_v9 = vld [vmem:[%s939_s1 + $0x18] sm:$0xff]   ;;  %v749_v13 = vld [vmem:[%s939_s1 + $0x10] sm:$0xff]  }
   0x5   :  { %v756_v11 = vld [vmem:[%s940_s0 + $0x4] ss:$8 sps:$4 sm:$0xff]   ;;  %v754_v18 = vld [vmem:[%s940_s0] ss:$8 sps:$4 sm:$0xff]   ;;  %v760_v20 = vld [vmem:[%s940_s0 + $0x14] ss:$8 sps:$4 sm:$0xff]  }
   0x6   :  { %v759_v12 = vld [vmem:[%s940_s0 + $0x44] ss:$8 sps:$4 sm:$0xff]   ;;  %307 = vmatprep.mubr.bf16.mxu0 %v756_v11  ;;  %v757_v19 = vld [vmem:[%s940_s0 + $0x40] ss:$8 sps:$4 sm:$0xff]   ;;  %v762_v21 = vld [vmem:[%s940_s0 + $0x54] ss:$8 sps:$4 sm:$0xff]  }
   0x7   :  { %661 = vmatpush3.bf16.msra.mxu0 %v741_v3  ;;  %731 = vmatpush3.bf16.msra.mxu1 %v741_v3  ;;  %v750_v14 = vld [vmem:[%s939_s1 + $0x48] sm:$0xff]   ;;  %v752_v16 = vld [vmem:[%s939_s1 + $0x40] sm:$0xff]   ;;  %v764_v22 = vld [vmem:[%s940_s0 + $0x10] ss:$8 sps:$4 sm:$0xff]  }
   0x8   :  { %662 = vmatprep.subr.bf16.mxu0 %v742_v4  ;;  %724 = vmatprep.subr.bf16.mxu1 %v742_v4  ;;  %v751_v15 = vld [vmem:[%s939_s1 + $0x8] sm:$0xff]   ;;  %v753_v17 = vld [vmem:[%s939_s1] sm:$0xff]   ;;  %v765_v23 = vld [vmem:[%s940_s0 + $0x50] ss:$8 sps:$4 sm:$0xff]  }
   0x9   :  { %339 = vmatprep.mubr.bf16.mxu1 %v759_v12  ;;  %v766_v24 = vld [vmem:[%s940_s0 + $0x24] ss:$8 sps:$4 sm:$0xff]   ;;  %v770_v26 = vld [vmem:[%s940_s0 + $0x20] ss:$8 sps:$4 sm:$0xff]   ;;  %v772_v28 = vld [vmem:[%s940_s0 + $0x34] ss:$8 sps:$4 sm:$0xff]  }
   0xa   :  { %v768_v25 = vld [vmem:[%s940_s0 + $0x64] ss:$8 sps:$4 sm:$0xff]   ;;  %v771_v27 = vld [vmem:[%s940_s0 + $0x60] ss:$8 sps:$4 sm:$0xff]   ;;  %v774_v29 = vld [vmem:[%s940_s0 + $0x74] ss:$8 sps:$4 sm:$0xff]  }
   0xb   :  { %663 = vmatpush3.bf16.msra.mxu0 %v743_v5  ;;  %732 = vmatpush3.bf16.msra.mxu1 %v743_v5  ;;  %v776_v30 = vld [vmem:[%s940_s0 + $0x30] ss:$8 sps:$4 sm:$0xff]   ;;  %v897_v37 = vld [vmem:[%s941_s2] ss:$0 sm:$0xff] }
   0xc   :  { %664 = vmatprep.subr.bf16.mxu0 %v744_v6  ;;  %725 = vmatprep.subr.bf16.mxu1 %v744_v6  ;;  %v777_v31 = vld [vmem:[%s940_s0 + $0x70] ss:$8 sps:$4 sm:$0xff]  }
   0xf   :  { %665 = vmatpush3.bf16.msra.mxu0 %v745_v7  ;;  %733 = vmatpush3.bf16.msra.mxu1 %v745_v7 }
  0x10   :  { %666 = vmatprep.subr.bf16.mxu0 %v746_v8  ;;  %726 = vmatprep.subr.bf16.mxu1 %v746_v8 }
  0x13   :  { %667 = vmatpush3.bf16.msra.mxu0 %v747_v9  ;;  %734 = vmatpush3.bf16.msra.mxu1 %v747_v9 }
  0x14   :  { %668 = vmatprep.subr.bf16.mxu0 %v748_v10  ;;  %727 = vmatprep.subr.bf16.mxu1 %v748_v10 }
  0x17   :  { %669 = vmatpush3.bf16.msra.mxu0 %v749_v13  ;;  %735 = vmatpush3.bf16.msra.mxu1 %v749_v13 }
  0x18   :  { %670 = vmatprep.subr.bf16.mxu0 %v750_v14  ;;  %728 = vmatprep.subr.bf16.mxu1 %v750_v14 }
  0x1b   :  { %671 = vmatpush3.bf16.msra.mxu0 %v751_v15  ;;  %736 = vmatpush3.bf16.msra.mxu1 %v751_v15 }
  0x1c   :  { %672 = vmatprep.subr.bf16.mxu0 %v752_v16  ;;  %729 = vmatprep.subr.bf16.mxu1 %v752_v16 }
  0x1f   :  { %673 = vmatpush3.bf16.msra.mxu0 %v753_v17  ;;  %737 = vmatpush3.bf16.msra.mxu1 %v753_v17 }
  0x22   :  { %308 = vmatmul.mubr.bf16.vlgmr.msra.gmra.mxu0 %v754_v18  ;;  %340 = vmatmul.mubr.bf16.vlgmr.msra.gmra.mxu1 %v757_v19 }
  0x23   :  { %315 = vmatprep.mubr.bf16.mxu0 %v760_v20  ;;  %347 = vmatprep.mubr.bf16.mxu1 %v762_v21 }
  0x2a   :  { %316 = vmatmul.mubr.bf16.gmra.mxu0 %v764_v22  ;;  %348 = vmatmul.mubr.bf16.gmra.mxu1 %v765_v23 }
  0x2b   :  { %323 = vmatprep.mubr.bf16.mxu0 %v766_v24  ;;  %355 = vmatprep.mubr.bf16.mxu1 %v768_v25 }
  0x32   :  { %324 = vmatmul.mubr.bf16.gmra.mxu0 %v770_v26  ;;  %356 = vmatmul.mubr.bf16.gmra.mxu1 %v771_v27 }
  0x33   :  { %331 = vmatprep.mubr.bf16.mxu0 %v772_v28  ;;  %363 = vmatprep.mubr.bf16.mxu1 %v774_v29 }
  0x3a   :  { %332 = vmatmul.mubr.bf16.gmra.mxu0 %v776_v30  ;;  %364 = vmatmul.mubr.bf16.gmra.mxu1 %v777_v31 }
  0xe2   :  { %v674_v32 = vpop.f32.mrf.mxu0  ;;  %v698_v33 = vpop.f32.mrf.mxu1 }
  0xe4   :  { %v675_v34 = vpop.f32.mrf.mxu0  ;;  %v699_v35 = vpop.f32.mrf.mxu1 }
  0xe5   :  { %v676_v36 = vadd.f32 %v675_v34, %v674_v32  ;;  %v700_v38 = vadd.f32 %v699_v35, %v698_v33 }
  0xe6   :  { %v677_v39 = vpop.f32.mrf.mxu0  ;;  %v701_v40 = vpop.f32.mrf.mxu1 }
  0xe7   :  { %v430_v41 = vadd.f32 %v676_v36, %v897_v37  ;;  %v438_v42 = vadd.f32 %v700_v38, %v897_v37 }
  0xe8   :  { %v678_v43 = vpop.f32.mrf.mxu0  ;;  %v702_v44 = vpop.f32.mrf.mxu1 }
  0xe9   :  { %v679_v45 = vadd.f32 %v678_v43, %v677_v39  ;;  %v703_v46 = vadd.f32 %v702_v44, %v701_v40  ;;  %v446_v51 = vmax.f32 %v430_v41, 0.0  ;;  %v454_v52 = vmax.f32 %v438_v42, 0.0 }
  0xea   :  { %v680_v47 = vpop.f32.mrf.mxu0  ;;  %v704_v48 = vpop.f32.mrf.mxu1 }
  0xeb   :  { %v431_v49 = vadd.f32 %v679_v45, %v897_v37  ;;  %v439_v50 = vadd.f32 %v703_v46, %v897_v37 }
  0xec   :  { %v681_v53 = vpop.f32.mrf.mxu0  ;;  %v705_v54 = vpop.f32.mrf.mxu1 }
  0xed   :  { %v447_v55 = vmax.f32 %v431_v49, 0.0  ;;  %v455_v56 = vmax.f32 %v439_v50, 0.0  ;;  %v682_v57 = vadd.f32 %v681_v53, %v680_v47  ;;  %v706_v58 = vadd.f32 %v705_v54, %v704_v48 }
  0xee   :  { %v683_v59 = vpop.f32.mrf.mxu0  ;;  %v707_v60 = vpop.f32.mrf.mxu1 }
  0xef   :  { %v614_v61 = vpack.c.bf16 %v447_v55, %v446_v51  ;;  %v634_v62 = vpack.c.bf16 %v455_v56, %v454_v52  ;;  %v432_v63 = vadd.f32 %v682_v57, %v897_v37  ;;  %v440_v0 = vadd.f32 %v706_v58, %v897_v37 }
  0xf0   :  { %v684_v1 = vpop.f32.mrf.mxu0  ;;  %v708_v2 = vpop.f32.mrf.mxu1 }
  0xf1   :  { %615 = vst [vmem:[%s942_s3] sm:$0xff] %v614_v61   ;;  %654 = vst [vmem:[%s942_s3 + $0x20] sm:$0xff] %v634_v62   ;;  %v685_v3 = vadd.f32 %v684_v1, %v683_v59  ;;  %v709_v4 = vadd.f32 %v708_v2, %v707_v60  ;;  %v448_v9 = vmax.f32 %v432_v63, 0.0  ;;  %v456_v10 = vmax.f32 %v440_v0, 0.0 }
  0xf2   :  { %v686_v5 = vpop.f32.mrf.mxu0  ;;  %v710_v6 = vpop.f32.mrf.mxu1 }
  0xf3   :  { %v433_v7 = vadd.f32 %v685_v3, %v897_v37  ;;  %v441_v8 = vadd.f32 %v709_v4, %v897_v37 }
  0xf4   :  { %v687_v11 = vpop.f32.mrf.mxu0  ;;  %v711_v12 = vpop.f32.mrf.mxu1 }
  0xf5   :  { %v449_v13 = vmax.f32 %v433_v7, 0.0  ;;  %v457_v14 = vmax.f32 %v441_v8, 0.0  ;;  %v688_v15 = vadd.f32 %v687_v11, %v686_v5  ;;  %v712_v16 = vadd.f32 %v711_v12, %v710_v6 }
  0xf6   :  { %v689_v17 = vpop.f32.mrf.mxu0  ;;  %v713_v18 = vpop.f32.mrf.mxu1 }
  0xf7   :  { %v619_v19 = vpack.c.bf16 %v449_v13, %v448_v9  ;;  %v639_v20 = vpack.c.bf16 %v457_v14, %v456_v10  ;;  %v434_v21 = vadd.f32 %v688_v15, %v897_v37  ;;  %v442_v22 = vadd.f32 %v712_v16, %v897_v37 }
  0xf8   :  { %v690_v23 = vpop.f32.mrf.mxu0  ;;  %v714_v24 = vpop.f32.mrf.mxu1 }
  0xf9   :  { %651 = vst [vmem:[%s942_s3 + $0x8] sm:$0xff] %v619_v19   ;;  %655 = vst [vmem:[%s942_s3 + $0x28] sm:$0xff] %v639_v20   ;;  %v691_v25 = vadd.f32 %v690_v23, %v689_v17  ;;  %v715_v26 = vadd.f32 %v714_v24, %v713_v18  ;;  %v450_v31 = vmax.f32 %v434_v21, 0.0  ;;  %v458_v32 = vmax.f32 %v442_v22, 0.0 }
  0xfa   :  { %v692_v27 = vpop.f32.mrf.mxu0  ;;  %v716_v28 = vpop.f32.mrf.mxu1 }
  0xfb   :  { %v435_v29 = vadd.f32 %v691_v25, %v897_v37  ;;  %v443_v30 = vadd.f32 %v715_v26, %v897_v37 }
  0xfc   :  { %v693_v33 = vpop.f32.mrf.mxu0  ;;  %v717_v34 = vpop.f32.mrf.mxu1 }
  0xfd   :  { %v451_v35 = vmax.f32 %v435_v29, 0.0  ;;  %v459_v36 = vmax.f32 %v443_v30, 0.0  ;;  %v694_v38 = vadd.f32 %v693_v33, %v692_v27  ;;  %v718_v39 = vadd.f32 %v717_v34, %v716_v28 }
  0xfe   :  { %v695_v40 = vpop.f32.mrf.mxu0  ;;  %v719_v41 = vpop.f32.mrf.mxu1 }
  0xff   :  { %v624_v42 = vpack.c.bf16 %v451_v35, %v450_v31  ;;  %v644_v43 = vpack.c.bf16 %v459_v36, %v458_v32  ;;  %v436_v46 = vadd.f32 %v694_v38, %v897_v37  ;;  %v444_v47 = vadd.f32 %v718_v39, %v897_v37 }
 0x100   :  { %v696_v44 = vpop.f32.mrf.mxu0  ;;  %v720_v45 = vpop.f32.mrf.mxu1 }
 0x101   :  { %652 = vst [vmem:[%s942_s3 + $0x10] sm:$0xff] %v624_v42   ;;  %656 = vst [vmem:[%s942_s3 + $0x30] sm:$0xff] %v644_v43   ;;  %v697_v48 = vadd.f32 %v696_v44, %v695_v40  ;;  %v721_v49 = vadd.f32 %v720_v45, %v719_v41  ;;  %v452_v52 = vmax.f32 %v436_v46, 0.0  ;;  %v460_v53 = vmax.f32 %v444_v47, 0.0 }
 0x103   :  { %v437_v50 = vadd.f32 %v697_v48, %v897_v37  ;;  %v445_v51 = vadd.f32 %v721_v49, %v897_v37 }
 0x105   :  { %v453_v54 = vmax.f32 %v437_v50, 0.0  ;;  %v461_v55 = vmax.f32 %v445_v51, 0.0 }
 0x107   :  { %v629_v56 = vpack.c.bf16 %v453_v54, %v452_v52  ;;  %v649_v57 = vpack.c.bf16 %v461_v55, %v460_v53 }
 0x109   :  { %653 = vst [vmem:[%s942_s3 + $0x18] sm:$0xff] %v629_v56   ;;  %657 = vst [vmem:[%s942_s3 + $0x38] sm:$0xff] %v649_v57  }

// kernel: fpn_forward.19
= control target key start
LH: loop header
LB: loop body
LE: loop exit
PB: predicated region body
PF: predicated region fallthrough
CT: control target
= control target key end

     0   :  { %s792_s1 = inlined_call_operand.vmem [shape: bf16[512,128], index: 1, kind: input, shape index: {}]   ;;  %s793_s0 = inlined_call_operand.vmem [shape: bf16[32,512], index: 0, kind: input, shape index: {}]   ;;  %s794_s2 = inlined_call_operand.vmem [shape: f32[1,128], index: 2, kind: input, shape index: {}]   ;;  %s795_s3 = inlined_call_operand.vmem [shape: bf16[32,128], index: 3, kind: output, shape index: {}]  }
   0x1   :  { %v599_v0 = vld [vmem:[%s792_s1 + $0x78] sm:$0xff]   ;;  %v603_v4 = vld [vmem:[%s792_s1 + $0x70] sm:$0xff]   ;;  %v607_v8 = vld [vmem:[%s792_s1 + $0x68] sm:$0xff]  }
   0x2   :  { %v600_v1 = vld [vmem:[%s792_s1 + $0xf8] sm:$0xff]   ;;  %543 = vmatprep.subr.bf16.mxu0 %v599_v0  ;;  %v604_v5 = vld [vmem:[%s792_s1 + $0xf0] sm:$0xff]   ;;  %v608_v9 = vld [vmem:[%s792_s1 + $0xe8] sm:$0xff]  }
   0x3   :  { %v601_v2 = vld [vmem:[%s792_s1 + $0x38] sm:$0xff]   ;;  %571 = vmatprep.subr.bf16.mxu1 %v600_v1  ;;  %v605_v6 = vld [vmem:[%s792_s1 + $0x30] sm:$0xff]   ;;  %v609_v10 = vld [vmem:[%s792_s1 + $0x28] sm:$0xff]  }
   0x4   :  { %v602_v3 = vld [vmem:[%s792_s1 + $0xb8] sm:$0xff]   ;;  %544 = vmatpush3.bf16.msra.mxu0 %v601_v2  ;;  %v606_v7 = vld [vmem:[%s792_s1 + $0xb0] sm:$0xff]   ;;  %v610_v11 = vld [vmem:[%s792_s1 + $0xa8] sm:$0xff]  }
   0x5   :  { %572 = vmatpush3.bf16.msra.mxu1 %v602_v3  ;;  %545 = vmatprep.subr.bf16.mxu0 %v603_v4  ;;  %v611_v12 = vld [vmem:[%s792_s1 + $0x60] sm:$0xff]   ;;  %v615_v16 = vld [vmem:[%s792_s1 + $0x58] sm:$0xff]   ;;  %v619_v20 = vld [vmem:[%s792_s1 + $0x50] sm:$0xff]  }
   0x6   :  { %573 = vmatprep.subr.bf16.mxu1 %v604_v5  ;;  %v612_v13 = vld [vmem:[%s792_s1 + $0xe0] sm:$0xff]   ;;  %v616_v17 = vld [vmem:[%s792_s1 + $0xd8] sm:$0xff]   ;;  %v620_v21 = vld [vmem:[%s792_s1 + $0xd0] sm:$0xff]  }
   0x7   :  { %v613_v14 = vld [vmem:[%s792_s1 + $0x20] sm:$0xff]   ;;  %v617_v18 = vld [vmem:[%s792_s1 + $0x18] sm:$0xff]   ;;  %v621_v22 = vld [vmem:[%s792_s1 + $0x10] sm:$0xff]  }
   0x8   :  { %546 = vmatpush3.bf16.msra.mxu0 %v605_v6  ;;  %v614_v15 = vld [vmem:[%s792_s1 + $0xa0] sm:$0xff]   ;;  %v618_v19 = vld [vmem:[%s792_s1 + $0x98] sm:$0xff]   ;;  %v622_v23 = vld [vmem:[%s792_s1 + $0x90] sm:$0xff]  }
   0x9   :  { %574 = vmatpush3.bf16.msra.mxu1 %v606_v7  ;;  %547 = vmatprep.subr.bf16.mxu0 %v607_v8  ;;  %v623_v24 = vld [vmem:[%s792_s1 + $0x48] sm:$0xff]   ;;  %v627_v28 = vld [vmem:[%s792_s1 + $0x40] sm:$0xff]  }
   0xa   :  { %575 = vmatprep.subr.bf16.mxu1 %v608_v9  ;;  %v624_v25 = vld [vmem:[%s792_s1 + $0xc8] sm:$0xff]   ;;  %v628_v29 = vld [vmem:[%s792_s1 + $0xc0] sm:$0xff]  }
   0xb   :  { %v625_v26 = vld [vmem:[%s792_s1 + $0x8] sm:$0xff]   ;;  %v629_v30 = vld [vmem:[%s792_s1] sm:$0xff]  }
   0xc   :  { %548 = vmatpush3.bf16.msra.mxu0 %v609_v10  ;;  %v626_v27 = vld [vmem:[%s792_s1 + $0x88] sm:$0xff]   ;;  %v630_v31 = vld [vmem:[%s792_s1 + $0x80] sm:$0xff]  }
   0xd   :  { %576 = vmatpush3.bf16.msra.mxu1 %v610_v11  ;;  %549 = vmatprep.subr.bf16.mxu0 %v611_v12  ;;  %v631_v32 = vld [vmem:[%s793_s0] ss:$16 sps:$4 sm:$0xff]   ;;  %v633_v33 = vld [vmem:[%s793_s0 + $0x4] ss:$16 sps:$4 sm:$0xff]   ;;  %v634_v34 = vld [vmem:[%s793_s0 + $0x8] ss:$16 sps:$4 sm:$0xff]  }
   0xe   :  { %577 = vmatprep.subr.bf16.mxu1 %v612_v13  ;;  %v636_v35 = vld [vmem:[%s793_s0 + $0xc] ss:$16 sps:$4 sm:$0xff]   ;;  %363 = vmatprep.mubr.bf16.mxu0 %v633_v33  ;;  %v637_v36 = vld [vmem:[%s793_s0 + $0x24] ss:$16 sps:$4 sm:$0xff]   ;;  %v641_v38 = vld [vmem:[%s793_s0 + $0x20] ss:$16 sps:$4 sm:$0xff]  }
   0xf   :  { %412 = vmatprep.mubr.bf16.mxu1 %v636_v35  ;;  %v639_v37 = vld [vmem:[%s793_s0 + $0x2c] ss:$16 sps:$4 sm:$0xff]   ;;  %v642_v39 = vld [vmem:[%s793_s0 + $0x28] ss:$16 sps:$4 sm:$0xff]   ;;  %v523_v50 = vld [vmem:[%s794_s2] ss:$0 sm:$0xff] }
  0x10   :  { %550 = vmatpush3.bf16.msra.mxu0 %v613_v14 }
  0x11   :  { %578 = vmatpush3.bf16.msra.mxu1 %v614_v15  ;;  %551 = vmatprep.subr.bf16.mxu0 %v615_v16 }
  0x12   :  { %579 = vmatprep.subr.bf16.mxu1 %v616_v17 }
  0x14   :  { %552 = vmatpush3.bf16.msra.mxu0 %v617_v18 }
  0x15   :  { %580 = vmatpush3.bf16.msra.mxu1 %v618_v19  ;;  %553 = vmatprep.subr.bf16.mxu0 %v619_v20 }
  0x16   :  { %581 = vmatprep.subr.bf16.mxu1 %v620_v21 }
  0x18   :  { %554 = vmatpush3.bf16.msra.mxu0 %v621_v22 }
  0x19   :  { %582 = vmatpush3.bf16.msra.mxu1 %v622_v23  ;;  %555 = vmatprep.subr.bf16.mxu0 %v623_v24 }
  0x1a   :  { %583 = vmatprep.subr.bf16.mxu1 %v624_v25 }
  0x1c   :  { %556 = vmatpush3.bf16.msra.mxu0 %v625_v26 }
  0x1d   :  { %584 = vmatpush3.bf16.msra.mxu1 %v626_v27  ;;  %557 = vmatprep.subr.bf16.mxu0 %v627_v28 }
  0x1e   :  { %585 = vmatprep.subr.bf16.mxu1 %v628_v29 }
  0x20   :  { %558 = vmatpush3.bf16.msra.mxu0 %v629_v30 }
  0x21   :  { %586 = vmatpush3.bf16.msra.mxu1 %v630_v31 }
  0x23   :  { %364 = vmatmul.mubr.bf16.vlgmr.msra.gmra.mxu0 %v631_v32 }
  0x24   :  { %413 = vmatmul.mubr.bf16.vlgmr.msra.gmra.mxu1 %v634_v34  ;;  %371 = vmatprep.mubr.bf16.mxu0 %v637_v36 }
  0x25   :  { %420 = vmatprep.mubr.bf16.mxu1 %v639_v37 }
  0x2b   :  { %372 = vmatmul.mubr.bf16.gmra.mxu0 %v641_v38 }
  0x2c   :  { %421 = vmatmul.mubr.bf16.gmra.mxu1 %v642_v39 }
  0xe3   :  { %v559_v40 = vpop.f32.mrf.mxu0 }
  0xe4   :  { %v587_v41 = vpop.f32.mrf.mxu1 }
  0xe5   :  { %v560_v42 = vpop.f32.mrf.mxu0 }
  0xe6   :  { %v561_v43 = vadd.f32 %v560_v42, %v559_v40  ;;  %v588_v44 = vpop.f32.mrf.mxu1 }
  0xe7   :  { %v589_v45 = vadd.f32 %v588_v44, %v587_v41  ;;  %v562_v46 = vpop.f32.mrf.mxu0 }
  0xe8   :  { %v590_v47 = vpop.f32.mrf.mxu1 }
  0xe9   :  { %v415_v48 = vadd.f32 %v589_v45, %v561_v43  ;;  %v563_v49 = vpop.f32.mrf.mxu0 }
  0xea   :  { %v564_v51 = vadd.f32 %v563_v49, %v562_v46  ;;  %v591_v52 = vpop.f32.mrf.mxu1 }
  0xeb   :  { %v592_v53 = vadd.f32 %v591_v52, %v590_v47  ;;  %v565_v54 = vpop.f32.mrf.mxu0  ;;  %v451_v56 = vadd.f32 %v523_v50, %v415_v48 }
  0xec   :  { %v593_v55 = vpop.f32.mrf.mxu1 }
  0xed   :  { %v418_v57 = vadd.f32 %v592_v53, %v564_v51  ;;  %v566_v58 = vpop.f32.mrf.mxu0  ;;  %v455_v1 = vmax.f32 %v451_v56, 0.0 }
  0xee   :  { %v567_v59 = vadd.f32 %v566_v58, %v565_v54  ;;  %v594_v60 = vpop.f32.mrf.mxu1 }
  0xef   :  { %v452_v61 = vadd.f32 %v523_v50, %v418_v57  ;;  %v595_v62 = vadd.f32 %v594_v60, %v593_v55  ;;  %v568_v63 = vpop.f32.mrf.mxu0 }
  0xf0   :  { %v596_v0 = vpop.f32.mrf.mxu1 }
  0xf1   :  { %v456_v2 = vmax.f32 %v452_v61, 0.0  ;;  %v423_v3 = vadd.f32 %v595_v62, %v567_v59  ;;  %v569_v4 = vpop.f32.mrf.mxu0 }
  0xf2   :  { %v570_v5 = vadd.f32 %v569_v4, %v568_v63  ;;  %v597_v6 = vpop.f32.mrf.mxu1 }
  0xf3   :  { %v535_v7 = vpack.c.bf16 %v456_v2, %v455_v1  ;;  %v598_v8 = vadd.f32 %v597_v6, %v596_v0  ;;  %v453_v9 = vadd.f32 %v523_v50, %v423_v3 }
  0xf5   :  { %536 = vst [vmem:[%s795_s3] sm:$0xff] %v535_v7   ;;  %v426_v10 = vadd.f32 %v598_v8, %v570_v5  ;;  %v457_v12 = vmax.f32 %v453_v9, 0.0 }
  0xf7   :  { %v454_v11 = vadd.f32 %v523_v50, %v426_v10 }
  0xf9   :  { %v458_v13 = vmax.f32 %v454_v11, 0.0 }
  0xfb   :  { %v540_v14 = vpack.c.bf16 %v458_v13, %v457_v12 }
  0xfd   :  { %542 = vst [vmem:[%s795_s3 + $0x8] sm:$0xff] %v540_v14  }

// kernel: fpn_forward.20
= control target key start
LH: loop header
LB: loop body
LE: loop exit
PB: predicated region body
PF: predicated region fallthrough
CT: control target
= control target key end

     0   :  { %s670_s1 = inlined_call_operand.vmem [shape: bf16[384,128], index: 1, kind: input, shape index: {}]   ;;  %s671_s0 = inlined_call_operand.vmem [shape: bf16[32,384], index: 0, kind: input, shape index: {}]   ;;  %s672_s2 = inlined_call_operand.vmem [shape: f32[1,128], index: 2, kind: input, shape index: {}]   ;;  %s673_s3 = inlined_call_operand.vmem [shape: bf16[32,128], index: 3, kind: output, shape index: {}]  }
   0x1   :  { %v519_v0 = vld [vmem:[%s670_s1 + $0x78] sm:$0xff]   ;;  %v522_v3 = vld [vmem:[%s670_s1 + $0x70] sm:$0xff]   ;;  %v525_v6 = vld [vmem:[%s670_s1 + $0x68] sm:$0xff]  }
   0x2   :  { %v520_v1 = vld [vmem:[%s670_s1 + $0x38] sm:$0xff]   ;;  %461 = vmatprep.subr.bf16.mxu0 %v519_v0  ;;  %v523_v4 = vld [vmem:[%s670_s1 + $0x30] sm:$0xff]   ;;  %v526_v7 = vld [vmem:[%s670_s1 + $0x28] sm:$0xff]  }
   0x3   :  { %v521_v2 = vld [vmem:[%s670_s1 + $0xb8] sm:$0xff]   ;;  %462 = vmatpush3.bf16.msra.mxu0 %v520_v1  ;;  %v524_v5 = vld [vmem:[%s670_s1 + $0xb0] sm:$0xff]   ;;  %v527_v8 = vld [vmem:[%s670_s1 + $0xa8] sm:$0xff]  }
   0x4   :  { %499 = vmatprep.subr.bf16.mxu1 %v521_v2  ;;  %463 = vmatprep.subr.bf16.mxu0 %v522_v3  ;;  %v528_v9 = vld [vmem:[%s670_s1 + $0x60] sm:$0xff]   ;;  %v531_v12 = vld [vmem:[%s670_s1 + $0x58] sm:$0xff]   ;;  %v534_v15 = vld [vmem:[%s670_s1 + $0x50] sm:$0xff]  }
   0x5   :  { %500 = vmatpush3.bf16.msra.mxu1 %v521_v2  ;;  %v529_v10 = vld [vmem:[%s670_s1 + $0x20] sm:$0xff]   ;;  %v533_v13 = vld [vmem:[%s670_s1 + $0x98] sm:$0xff]   ;;  %v536_v16 = vld [vmem:[%s670_s1 + $0x90] sm:$0xff]  }
   0x6   :  { %501 = vmatprep.subr.bf16.mxu1 %v524_v5  ;;  %v530_v11 = vld [vmem:[%s670_s1 + $0xa0] sm:$0xff]   ;;  %v532_v14 = vld [vmem:[%s670_s1 + $0x18] sm:$0xff]   ;;  %v535_v17 = vld [vmem:[%s670_s1 + $0x10] sm:$0xff]  }
   0x7   :  { %464 = vmatpush3.bf16.msra.mxu0 %v523_v4  ;;  %v537_v18 = vld [vmem:[%s670_s1 + $0x48] sm:$0xff]   ;;  %v540_v21 = vld [vmem:[%s670_s1 + $0x40] sm:$0xff]  }
   0x8   :  { %465 = vmatprep.subr.bf16.mxu0 %v525_v6  ;;  %v538_v19 = vld [vmem:[%s670_s1 + $0x8] sm:$0xff]   ;;  %v542_v22 = vld [vmem:[%s670_s1 + $0x80] sm:$0xff]  }
   0x9   :  { %502 = vmatpush3.bf16.msra.mxu1 %v524_v5  ;;  %v539_v20 = vld [vmem:[%s670_s1 + $0x88] sm:$0xff]   ;;  %v545_v23 = vld [vmem:[%s671_s0 + $0x4] ss:$12 sps:$4 sm:$0xff]   ;;  %v441_v37 = vld [vmem:[%s672_s2] ss:$0 sm:$0xff] }
   0xa   :  { %503 = vmatprep.subr.bf16.mxu1 %v527_v8  ;;  %v546_v24 = vld [vmem:[%s671_s0 + $0x8] ss:$12 sps:$4 sm:$0xff]   ;;  %v541_v25 = vld [vmem:[%s670_s1] sm:$0xff]   ;;  %291 = vmatprep.mubr.bf16.mxu0 %v545_v23 }
   0xb   :  { %466 = vmatpush3.bf16.msra.mxu0 %v526_v7  ;;  %515 = vmatprep.mubr.bf16.mxu1 %v546_v24  ;;  %v543_v26 = vld [vmem:[%s671_s0] ss:$12 sps:$4 sm:$0xff]   ;;  %v548_v27 = vld [vmem:[%s671_s0 + $0x1c] ss:$12 sps:$4 sm:$0xff]   ;;  %v550_v29 = vld [vmem:[%s671_s0 + $0x18] ss:$12 sps:$4 sm:$0xff]  }
   0xc   :  { %467 = vmatprep.subr.bf16.mxu0 %v528_v9  ;;  %v547_v28 = vld [vmem:[%s671_s0 + $0x20] ss:$12 sps:$4 sm:$0xff]  }
   0xd   :  { %504 = vmatpush3.bf16.msra.mxu1 %v527_v8 }
   0xe   :  { %505 = vmatprep.subr.bf16.mxu1 %v530_v11 }
   0xf   :  { %468 = vmatpush3.bf16.msra.mxu0 %v529_v10 }
  0x10   :  { %469 = vmatprep.subr.bf16.mxu0 %v531_v12 }
  0x11   :  { %506 = vmatpush3.bf16.msra.mxu1 %v530_v11 }
  0x12   :  { %507 = vmatprep.subr.bf16.mxu1 %v533_v13 }
  0x13   :  { %470 = vmatpush3.bf16.msra.mxu0 %v532_v14 }
  0x14   :  { %471 = vmatprep.subr.bf16.mxu0 %v534_v15 }
  0x15   :  { %508 = vmatpush3.bf16.msra.mxu1 %v533_v13 }
  0x16   :  { %509 = vmatprep.subr.bf16.mxu1 %v536_v16 }
  0x17   :  { %472 = vmatpush3.bf16.msra.mxu0 %v535_v17 }
  0x18   :  { %473 = vmatprep.subr.bf16.mxu0 %v537_v18 }
  0x19   :  { %510 = vmatpush3.bf16.msra.mxu1 %v536_v16 }
  0x1a   :  { %511 = vmatprep.subr.bf16.mxu1 %v539_v20 }
  0x1b   :  { %474 = vmatpush3.bf16.msra.mxu0 %v538_v19 }
  0x1c   :  { %475 = vmatprep.subr.bf16.mxu0 %v540_v21 }
  0x1d   :  { %512 = vmatpush3.bf16.msra.mxu1 %v539_v20 }
  0x1e   :  { %513 = vmatprep.subr.bf16.mxu1 %v542_v22 }
  0x1f   :  { %476 = vmatpush3.bf16.msra.mxu0 %v541_v25 }
  0x21   :  { %514 = vmatpush3.bf16.msra.mxu1 %v542_v22 }
  0x22   :  { %292 = vmatmul.mubr.bf16.vlgmr.msra.gmra.mxu0 %v543_v26 }
  0x23   :  { %299 = vmatprep.mubr.bf16.mxu0 %v548_v27 }
  0x24   :  { %516 = vmatmul.mubr.bf16.vlgmr.msra.gmra.mxu1 %v547_v28 }
  0x2a   :  { %300 = vmatmul.mubr.bf16.gmra.mxu0 %v550_v29 }
  0xe2   :  { %v477_v30 = vpop.f32.mrf.mxu0 }
  0xe4   :  { %v478_v31 = vpop.f32.mrf.mxu0  ;;  %v517_v32 = vpop.f32.mrf.mxu1 }
  0xe5   :  { %v479_v33 = vadd.f32 %v478_v31, %v477_v30 }
  0xe6   :  { %v480_v34 = vpop.f32.mrf.mxu0  ;;  %v342_v35 = vpop.f32.mrf.mxu1 }
  0xe7   :  { %v343_v36 = vadd.f32 %v479_v33, %v342_v35 }
  0xe8   :  { %v481_v38 = vpop.f32.mrf.mxu0  ;;  %v518_v39 = vpop.f32.mrf.mxu1 }
  0xe9   :  { %v482_v40 = vadd.f32 %v481_v38, %v480_v34  ;;  %v379_v43 = vadd.f32 %v441_v37, %v343_v36 }
  0xea   :  { %v483_v41 = vpop.f32.mrf.mxu0  ;;  %v345_v42 = vpop.f32.mrf.mxu1 }
  0xeb   :  { %v346_v44 = vadd.f32 %v482_v40, %v345_v42  ;;  %v383_v49 = vmax.f32 %v379_v43, 0.0 }
  0xec   :  { %v484_v45 = vpop.f32.mrf.mxu0 }
  0xed   :  { %v380_v46 = vadd.f32 %v441_v37, %v346_v44  ;;  %v485_v47 = vadd.f32 %v484_v45, %v483_v41 }
  0xee   :  { %v486_v48 = vpop.f32.mrf.mxu0 }
  0xef   :  { %v384_v50 = vmax.f32 %v380_v46, 0.0  ;;  %v351_v51 = vadd.f32 %v517_v32, %v485_v47 }
  0xf0   :  { %v487_v52 = vpop.f32.mrf.mxu0 }
  0xf1   :  { %v453_v53 = vpack.c.bf16 %v384_v50, %v383_v49  ;;  %v488_v54 = vadd.f32 %v487_v52, %v486_v48  ;;  %v381_v55 = vadd.f32 %v441_v37, %v351_v51 }
  0xf3   :  { %454 = vst [vmem:[%s673_s3] sm:$0xff] %v453_v53   ;;  %v354_v56 = vadd.f32 %v518_v39, %v488_v54  ;;  %v385_v58 = vmax.f32 %v381_v55, 0.0 }
  0xf5   :  { %v382_v57 = vadd.f32 %v441_v37, %v354_v56 }
  0xf7   :  { %v386_v59 = vmax.f32 %v382_v57, 0.0 }
  0xf9   :  { %v458_v60 = vpack.c.bf16 %v386_v59, %v385_v58 }
  0xfb   :  { %460 = vst [vmem:[%s673_s3 + $0x8] sm:$0xff] %v458_v60  }

// kernel: fpn_forward.21
= control target key start
LH: loop header
LB: loop body
LE: loop exit
PB: predicated region body
PF: predicated region fallthrough
CT: control target
= control target key end

     0   :  { %s622_s12 = smov 0   ;;  %s624_s13 = smov 0   ;;  %s671_s0 = inlined_call_operand.vmem [shape: bf16[8,896], index: 0, kind: input, shape index: {}]   ;;  %s672_s1 = inlined_call_operand.vmem [shape: bf16[896,128], index: 1, kind: input, shape index: {}]   ;;  %s673_s2 = inlined_call_operand.vmem [shape: f32[1,128], index: 2, kind: input, shape index: {}]   ;;  %s674_s3 = inlined_call_operand.vmem [shape: bf16[8,128], index: 3, kind: output, shape index: {}]  }
   0x1   :  { %s626_s14 = smov 0  }
   0x2 LB: > { %s25_s15 = sadd.s32 1, %s593_s13  ;;  %p493_p0 = scmp.ge.s32.totalorder %s597_s14, 1  ;;  %s597_s14 = sphi %s626_s14, %s13_s14   ;;  %s593_s13 = sphi %s624_s13, %s676_s13   ;;  %s589_s12 = sphi %s622_s12, %s675_s12  }
   0x3   : > { %p26_p1 = scmp.ge.s32.totalorder %s25_s15, 7  ;;  %p187_p2 = scmp.lt.s32.totalorder %s597_s14, 8 }
   0x5   : > { %s678_s15 = smov (%p26_p1, %s25_s15), 0  ;;  %p188_p3 = pnand %p493_p0, %p187_p2 }
   0x6   : > { %p229_p4 = scmp.lt.s32.totalorder (!%p188_p3), %s589_s12, 6  ;;  %s495_s16 = sshll.u32 (!%p188_p3), %s589_s12, 4 }
   0x7   : > { %191 = sbr.rel (%p188_p3) target bundleno = 263 (0x107), region = 32  ;;  %p236_p5 = scmp.lt.s32.totalorder (!%p188_p3), %s495_s16, 111 }
   0x8   : > { %p497_p6 = scmp.ne.s32.totalorder (!%p188_p3), %s589_s12, 0 }
   0xc   : > { %s230_s17 = scalar_select %p229_p4, %s589_s12, 6 }
   0xd   : > { %s680_s16 = smov (!%p236_p5, %s495_s16), 111  ;;  %258 = sbr.rel (%p497_p6) target bundleno = 20 (0x14), region = 36 }
   0xe   : > { %s494_s18 = sshll.u32 %s230_s17, 2  ;;  %s496_s22 = sshll.u32 %s680_s16, 2 }
   0xf   : > { %s648_s21 = scalar_lea.vmem %s671_s0, %s494_s18  ;;  %s242_s25 = scalar_lea.vmem %s672_s1, %s496_s22 }
  0x12   : > { %v599_v0 = vmov 0.0  }
  0x13   : > { %259 = vst [vmem:[#allocation2] sm:$0xff] %v599_v0 }
  0x14 PF: > { %v567_v1 = vld [vmem:[%s242_s25 + $0x38] sm:$0xff]   ;;  %v600_v2 = vmov 0.0   ;;  %v568_v3 = vld [vmem:[%s242_s25 + $0x30] sm:$0xff]   ;;  %vm601_vm0 = vmmov 0   ;;  %v569_v4 = vld [vmem:[%s242_s25 + $0x28] sm:$0xff]   ;;  %p506_p7 = scmp.ne.s32.totalorder %s589_s12, 6 }
  0x15   : > { %520 = vmatprep.subr.bf16.mxu0 %v600_v2  ;;  %536 = vmatprep.mubr.msk.bf16.mxu0 %vm601_vm0, %v600_v2  ;;  %v570_v5 = vld [vmem:[%s242_s25 + $0x20] sm:$0xff]   ;;  %v571_v6 = vld [vmem:[%s242_s25 + $0x18] sm:$0xff]   ;;  %v572_v7 = vld [vmem:[%s242_s25 + $0x10] sm:$0xff]  }
  0x16   : > { %521 = vmatpush3.bf16.msra.mxu0 %v567_v1  ;;  %v573_v8 = vld [vmem:[%s242_s25 + $0x8] sm:$0xff]   ;;  %v574_v9 = vld [vmem:[%s242_s25] sm:$0xff]  }
  0x17   : > { %522 = vmatprep.subr.bf16.mxu0 %v600_v2  ;;  %v261_v10 = vld [vmem:[%s648_s21] sm:$0xf] }
  0x1a   : > { %523 = vmatpush3.bf16.msra.mxu0 %v568_v3  ;;  %v260_v11 = vld [vmem:[#allocation2] sm:$0xff] }
  0x1b   : > { %524 = vmatprep.subr.bf16.mxu0 %v600_v2 }
  0x1e   : > { %525 = vmatpush3.bf16.msra.mxu0 %v569_v4 }
  0x1f   : > { %526 = vmatprep.subr.bf16.mxu0 %v600_v2 }
  0x22   : > { %527 = vmatpush3.bf16.msra.mxu0 %v570_v5 }
  0x23   : > { %528 = vmatprep.subr.bf16.mxu0 %v600_v2 }
  0x26   : > { %529 = vmatpush3.bf16.msra.mxu0 %v571_v6 }
  0x27   : > { %530 = vmatprep.subr.bf16.mxu0 %v600_v2 }
  0x2a   : > { %531 = vmatpush3.bf16.msra.mxu0 %v572_v7 }
  0x2b   : > { %532 = vmatprep.subr.bf16.mxu0 %v600_v2 }
  0x2e   : > { %533 = vmatpush3.bf16.msra.mxu0 %v573_v8 }
  0x2f   : > { %534 = vmatprep.subr.bf16.mxu0 %v600_v2 }
  0x32   : > { %535 = vmatpush3.bf16.msra.mxu0 %v574_v9 }
  0x35   : > { %537 = vmatmul.mubr.bf16.vlgmr.msra.gmra.mxu0 %v261_v10 }
  0xf5   : > { %v360_v12 = vpop.f32.mrf.mxu0 }
  0xf6   : > { %v366_v13 = vadd.f32 %v360_v12, %v260_v11 }
  0xf7   : > { %v538_v14 = vpop.f32.mrf.mxu0  ;;  %371 = sbr.rel (%p506_p7) target bundleno = 263 (0x107), region = 40 }
  0xf8   : > { %367 = vst [vmem:[#allocation2] sm:$0xff] %v366_v13 }
  0xf9   : > { %v363_v15 = vpop.f32.mrf.mxu0 }
  0xfb   : > { %v539_v16 = vpop.f32.mrf.mxu0 }
  0xfc   : > { %v507_v18 = vld [vmem:[%s673_s2] ss:$0 sm:$0xff] }
  0xff   : > { %v372_v17 = vld [vmem:[#allocation2] sm:$0xff] }
 0x100   : > { %v380_v19 = vadd.f32 %v507_v18, %v372_v17 }
 0x102   : > { %v381_v20 = vmax.f32 %v380_v19, 0.0 }
 0x104   : > { %v382_v21 = vpack.c.bf16 %v381_v20, %v381_v20 }
 0x106   : > { %383 = vst [vmem:[%s674_s3] sm:$0xf] %v382_v21 }
 0x107 PF: > { %s13_s14 = sadd.s32 1, %s597_s14   ;;  %s675_s12 = smov %s593_s13 }
 0x108   : > { %p10_p8 = scmp.ge.s32.totalorder %s13_s14, 9   ;;  %s676_s13 = smov %s678_s15 }
 0x10a   :  { %12 = sbr.rel (!%p10_p8) target bundleno = 2 (0x2), region = 76 }

// kernel: fpn_forward.22
= control target key start
LH: loop header
LB: loop body
LE: loop exit
PB: predicated region body
PF: predicated region fallthrough
CT: control target
= control target key end

     0   :  { %s622_s12 = smov 0   ;;  %s624_s13 = smov 0   ;;  %s671_s0 = inlined_call_operand.vmem [shape: bf16[8,640], index: 0, kind: input, shape index: {}]   ;;  %s672_s1 = inlined_call_operand.vmem [shape: bf16[640,128], index: 1, kind: input, shape index: {}]   ;;  %s673_s2 = inlined_call_operand.vmem [shape: f32[1,128], index: 2, kind: input, shape index: {}]   ;;  %s674_s3 = inlined_call_operand.vmem [shape: bf16[8,128], index: 3, kind: output, shape index: {}]  }
   0x1   :  { %s626_s14 = smov 0  }
   0x2 LB: > { %s25_s15 = sadd.s32 1, %s593_s13  ;;  %p493_p0 = scmp.ge.s32.totalorder %s597_s14, 1  ;;  %s597_s14 = sphi %s626_s14, %s13_s14   ;;  %s593_s13 = sphi %s624_s13, %s676_s13   ;;  %s589_s12 = sphi %s622_s12, %s675_s12  }
   0x3   : > { %p26_p1 = scmp.ge.s32.totalorder %s25_s15, 5  ;;  %p187_p2 = scmp.lt.s32.totalorder %s597_s14, 6 }
   0x5   : > { %s678_s15 = smov (%p26_p1, %s25_s15), 0  ;;  %p188_p3 = pnand %p493_p0, %p187_p2 }
   0x6   : > { %p229_p4 = scmp.lt.s32.totalorder (!%p188_p3), %s589_s12, 4  ;;  %s495_s16 = sshll.u32 (!%p188_p3), %s589_s12, 4 }
   0x7   : > { %191 = sbr.rel (%p188_p3) target bundleno = 263 (0x107), region = 32  ;;  %p236_p5 = scmp.lt.s32.totalorder (!%p188_p3), %s495_s16, 79 }
   0x8   : > { %p497_p6 = scmp.ne.s32.totalorder (!%p188_p3), %s589_s12, 0 }
   0xc   : > { %s230_s17 = scalar_select %p229_p4, %s589_s12, 4 }
   0xd   : > { %s680_s16 = smov (!%p236_p5, %s495_s16), 79  ;;  %258 = sbr.rel (%p497_p6) target bundleno = 20 (0x14), region = 36 }
   0xe   : > { %s494_s18 = sshll.u32 %s230_s17, 2  ;;  %s496_s22 = sshll.u32 %s680_s16, 2 }
   0xf   : > { %s648_s21 = scalar_lea.vmem %s671_s0, %s494_s18  ;;  %s242_s25 = scalar_lea.vmem %s672_s1, %s496_s22 }
  0x12   : > { %v599_v0 = vmov 0.0  }
  0x13   : > { %259 = vst [vmem:[#allocation2] sm:$0xff] %v599_v0 }
  0x14 PF: > { %v567_v1 = vld [vmem:[%s242_s25 + $0x38] sm:$0xff]   ;;  %v600_v2 = vmov 0.0   ;;  %v568_v3 = vld [vmem:[%s242_s25 + $0x30] sm:$0xff]   ;;  %vm601_vm0 = vmmov 0   ;;  %v569_v4 = vld [vmem:[%s242_s25 + $0x28] sm:$0xff]   ;;  %p506_p7 = scmp.ne.s32.totalorder %s589_s12, 4 }
  0x15   : > { %520 = vmatprep.subr.bf16.mxu0 %v600_v2  ;;  %536 = vmatprep.mubr.msk.bf16.mxu0 %vm601_vm0, %v600_v2  ;;  %v570_v5 = vld [vmem:[%s242_s25 + $0x20] sm:$0xff]   ;;  %v571_v6 = vld [vmem:[%s242_s25 + $0x18] sm:$0xff]   ;;  %v572_v7 = vld [vmem:[%s242_s25 + $0x10] sm:$0xff]  }
  0x16   : > { %521 = vmatpush3.bf16.msra.mxu0 %v567_v1  ;;  %v573_v8 = vld [vmem:[%s242_s25 + $0x8] sm:$0xff]   ;;  %v574_v9 = vld [vmem:[%s242_s25] sm:$0xff]  }
  0x17   : > { %522 = vmatprep.subr.bf16.mxu0 %v600_v2  ;;  %v261_v10 = vld [vmem:[%s648_s21] sm:$0xf] }
  0x1a   : > { %523 = vmatpush3.bf16.msra.mxu0 %v568_v3  ;;  %v260_v11 = vld [vmem:[#allocation2] sm:$0xff] }
  0x1b   : > { %524 = vmatprep.subr.bf16.mxu0 %v600_v2 }
  0x1e   : > { %525 = vmatpush3.bf16.msra.mxu0 %v569_v4 }
  0x1f   : > { %526 = vmatprep.subr.bf16.mxu0 %v600_v2 }
  0x22   : > { %527 = vmatpush3.bf16.msra.mxu0 %v570_v5 }
  0x23   : > { %528 = vmatprep.subr.bf16.mxu0 %v600_v2 }
  0x26   : > { %529 = vmatpush3.bf16.msra.mxu0 %v571_v6 }
  0x27   : > { %530 = vmatprep.subr.bf16.mxu0 %v600_v2 }
  0x2a   : > { %531 = vmatpush3.bf16.msra.mxu0 %v572_v7 }
  0x2b   : > { %532 = vmatprep.subr.bf16.mxu0 %v600_v2 }
  0x2e   : > { %533 = vmatpush3.bf16.msra.mxu0 %v573_v8 }
  0x2f   : > { %534 = vmatprep.subr.bf16.mxu0 %v600_v2 }
  0x32   : > { %535 = vmatpush3.bf16.msra.mxu0 %v574_v9 }
  0x35   : > { %537 = vmatmul.mubr.bf16.vlgmr.msra.gmra.mxu0 %v261_v10 }
  0xf5   : > { %v360_v12 = vpop.f32.mrf.mxu0 }
  0xf6   : > { %v366_v13 = vadd.f32 %v360_v12, %v260_v11 }
  0xf7   : > { %v538_v14 = vpop.f32.mrf.mxu0  ;;  %371 = sbr.rel (%p506_p7) target bundleno = 263 (0x107), region = 40 }
  0xf8   : > { %367 = vst [vmem:[#allocation2] sm:$0xff] %v366_v13 }
  0xf9   : > { %v363_v15 = vpop.f32.mrf.mxu0 }
  0xfb   : > { %v539_v16 = vpop.f32.mrf.mxu0 }
  0xfc   : > { %v507_v18 = vld [vmem:[%s673_s2] ss:$0 sm:$0xff] }
  0xff   : > { %v372_v17 = vld [vmem:[#allocation2] sm:$0xff] }
 0x100   : > { %v380_v19 = vadd.f32 %v507_v18, %v372_v17 }
 0x102   : > { %v381_v20 = vmax.f32 %v380_v19, 0.0 }
 0x104   : > { %v382_v21 = vpack.c.bf16 %v381_v20, %v381_v20 }
 0x106   : > { %383 = vst [vmem:[%s674_s3] sm:$0xf] %v382_v21 }
 0x107 PF: > { %s13_s14 = sadd.s32 1, %s597_s14   ;;  %s675_s12 = smov %s593_s13 }
 0x108   : > { %p10_p8 = scmp.ge.s32.totalorder %s13_s14, 7   ;;  %s676_s13 = smov %s678_s15 }
 0x10a   :  { %12 = sbr.rel (!%p10_p8) target bundleno = 2 (0x2), region = 76 }

// kernel: fpn_forward.23
= control target key start
LH: loop header
LB: loop body
LE: loop exit
PB: predicated region body
PF: predicated region fallthrough
CT: control target
= control target key end

     0   :  { %v193_v0 = vmov 0.0   ;;  %vm194_vm0 = vmmov 0   ;;  %s248_s1 = inlined_call_operand.vmem [shape: bf16[128,128], index: 1, kind: input, shape index: {}]   ;;  %s249_s0 = inlined_call_operand.vmem [shape: bf16[8,128], index: 0, kind: input, shape index: {}]   ;;  %s250_s2 = inlined_call_operand.vmem [shape: f32[1,128], index: 2, kind: input, shape index: {}]   ;;  %s251_s3 = inlined_call_operand.vmem [shape: f32[8,128], index: 3, kind: output, shape index: {}]  }
   0x1   :  { %163 = vmatprep.subr.bf16.mxu0 %v193_v0  ;;  %v185_v1 = vld [vmem:[%s248_s1 + $0x38] sm:$0xff]   ;;  %179 = vmatprep.mubr.msk.bf16.mxu0 %vm194_vm0, %v193_v0  ;;  %v186_v2 = vld [vmem:[%s248_s1 + $0x30] sm:$0xff]   ;;  %v187_v3 = vld [vmem:[%s248_s1 + $0x28] sm:$0xff]  }
   0x2   :  { %164 = vmatpush3.bf16.msra.mxu0 %v185_v1  ;;  %v188_v4 = vld [vmem:[%s248_s1 + $0x20] sm:$0xff]   ;;  %v189_v5 = vld [vmem:[%s248_s1 + $0x18] sm:$0xff]   ;;  %v190_v6 = vld [vmem:[%s248_s1 + $0x10] sm:$0xff]  }
   0x3   :  { %165 = vmatprep.subr.bf16.mxu0 %v193_v0  ;;  %v191_v7 = vld [vmem:[%s248_s1 + $0x8] sm:$0xff]   ;;  %v192_v8 = vld [vmem:[%s248_s1] sm:$0xff]  }
   0x4   :  { %v21_v9 = vld [vmem:[%s249_s0] sm:$0xf] }
   0x5   :  { %v153_v10 = vld [vmem:[%s250_s2] ss:$0 sm:$0xff] }
   0x6   :  { %166 = vmatpush3.bf16.msra.mxu0 %v186_v2 }
   0x7   :  { %167 = vmatprep.subr.bf16.mxu0 %v193_v0 }
   0xa   :  { %168 = vmatpush3.bf16.msra.mxu0 %v187_v3 }
   0xb   :  { %169 = vmatprep.subr.bf16.mxu0 %v193_v0 }
   0xe   :  { %170 = vmatpush3.bf16.msra.mxu0 %v188_v4 }
   0xf   :  { %171 = vmatprep.subr.bf16.mxu0 %v193_v0 }
  0x12   :  { %172 = vmatpush3.bf16.msra.mxu0 %v189_v5 }
  0x13   :  { %173 = vmatprep.subr.bf16.mxu0 %v193_v0 }
  0x16   :  { %174 = vmatpush3.bf16.msra.mxu0 %v190_v6 }
  0x17   :  { %175 = vmatprep.subr.bf16.mxu0 %v193_v0 }
  0x1a   :  { %176 = vmatpush3.bf16.msra.mxu0 %v191_v7 }
  0x1b   :  { %177 = vmatprep.subr.bf16.mxu0 %v193_v0 }
  0x1e   :  { %178 = vmatpush3.bf16.msra.mxu0 %v192_v8 }
  0x21   :  { %180 = vmatmul.mubr.bf16.vlgmr.msra.gmra.mxu0 %v21_v9 }
  0xe1   :  { %v120_v11 = vpop.f32.mrf.mxu0 }
  0xe2   :  { %v139_v12 = vadd.f32 %v153_v10, %v120_v11 }
  0xe3   :  { %v181_v13 = vpop.f32.mrf.mxu0 }
  0xe4   :  { %140 = vst [vmem:[%s251_s3] sm:$0xff] %v139_v12 }
  0xe5   :  { %v123_v14 = vpop.f32.mrf.mxu0 }
  0xe7   :  { %v182_v15 = vpop.f32.mrf.mxu0 }

// kernel: fpn_forward.26
= control target key start
LH: loop header
LB: loop body
LE: loop exit
PB: predicated region body
PF: predicated region fallthrough
CT: control target
= control target key end

     0   :  { %s306_s1 = inlined_call_operand.vmem [shape: bf16[128,128], index: 1, kind: input, shape index: {}]   ;;  %s307_s0 = inlined_call_operand.vmem [shape: bf16[32,128], index: 0, kind: input, shape index: {}]   ;;  %s308_s2 = inlined_call_operand.vmem [shape: f32[1,128], index: 2, kind: input, shape index: {}]   ;;  %s309_s3 = inlined_call_operand.vmem [shape: f32[32,128], index: 3, kind: output, shape index: {}]  }
   0x1   :  { %v231_v0 = vld [vmem:[%s306_s1 + $0x38] sm:$0xff]   ;;  %v232_v1 = vld [vmem:[%s306_s1 + $0x30] sm:$0xff]   ;;  %v233_v2 = vld [vmem:[%s306_s1 + $0x28] sm:$0xff]  }
   0x2   :  { %211 = vmatprep.subr.bf16.mxu0 %v231_v0  ;;  %v234_v3 = vld [vmem:[%s306_s1 + $0x20] sm:$0xff]   ;;  %v235_v5 = vld [vmem:[%s306_s1 + $0x18] sm:$0xff]   ;;  %v236_v6 = vld [vmem:[%s306_s1 + $0x10] sm:$0xff]  }
   0x3   :  { %212 = vmatpush3.bf16.msra.mxu0 %v231_v0  ;;  %v239_v4 = vld [vmem:[%s307_s0] sm:$0xff]   ;;  %v237_v7 = vld [vmem:[%s306_s1 + $0x8] sm:$0xff]  }
   0x4   :  { %213 = vmatprep.subr.bf16.mxu0 %v232_v1  ;;  %227 = vmatprep.mubr.bf16.mxu0 %v239_v4  ;;  %v238_v8 = vld [vmem:[%s306_s1] sm:$0xff]   ;;  %v240_v9 = vld [vmem:[%s307_s0 + $0x8] sm:$0xff]  }
   0x5   :  { %v200_v10 = vld [vmem:[%s308_s2] ss:$0 sm:$0xff] }
   0x7   :  { %214 = vmatpush3.bf16.msra.mxu0 %v232_v1 }
   0x8   :  { %215 = vmatprep.subr.bf16.mxu0 %v233_v2 }
   0xb   :  { %216 = vmatpush3.bf16.msra.mxu0 %v233_v2 }
   0xc   :  { %217 = vmatprep.subr.bf16.mxu0 %v234_v3 }
   0xf   :  { %218 = vmatpush3.bf16.msra.mxu0 %v234_v3 }
  0x10   :  { %219 = vmatprep.subr.bf16.mxu0 %v235_v5 }
  0x13   :  { %220 = vmatpush3.bf16.msra.mxu0 %v235_v5 }
  0x14   :  { %221 = vmatprep.subr.bf16.mxu0 %v236_v6 }
  0x17   :  { %222 = vmatpush3.bf16.msra.mxu0 %v236_v6 }
  0x18   :  { %223 = vmatprep.subr.bf16.mxu0 %v237_v7 }
  0x1b   :  { %224 = vmatpush3.bf16.msra.mxu0 %v237_v7 }
  0x1c   :  { %225 = vmatprep.subr.bf16.mxu0 %v238_v8 }
  0x1f   :  { %226 = vmatpush3.bf16.msra.mxu0 %v238_v8 }
  0x22   :  { %228 = vmatmul.mubr.bf16.vlgmr.msra.gmra.mxu0 %v240_v9 }
  0xe2   :  { %v229_v11 = vpop.f32.mrf.mxu0 }
  0xe3   :  { %v180_v12 = vadd.f32 %v229_v11, %v200_v10 }
  0xe4   :  { %v141_v13 = vpop.f32.mrf.mxu0 }
  0xe5   :  { %184 = vst [vmem:[%s309_s3 + $0x10] sm:$0xff] %v180_v12  ;;  %v178_v14 = vadd.f32 %v200_v10, %v141_v13 }
  0xe6   :  { %v230_v15 = vpop.f32.mrf.mxu0 }
  0xe7   :  { %182 = vst [vmem:[%s309_s3] sm:$0xff] %v178_v14  ;;  %v181_v16 = vadd.f32 %v230_v15, %v200_v10 }
  0xe8   :  { %v144_v17 = vpop.f32.mrf.mxu0 }
  0xe9   :  { %185 = vst [vmem:[%s309_s3 + $0x18] sm:$0xff] %v181_v16  ;;  %v179_v18 = vadd.f32 %v200_v10, %v144_v17 }
  0xeb   :  { %183 = vst [vmem:[%s309_s3 + $0x8] sm:$0xff] %v179_v18 }

// kernel: fpn_forward.25
= control target key start
LH: loop header
LB: loop body
LE: loop exit
PB: predicated region body
PF: predicated region fallthrough
CT: control target
= control target key end

     0   :  { %s334_s1 = inlined_call_operand.vmem [shape: bf16[128,128], index: 1, kind: input, shape index: {}]   ;;  %s335_s0 = inlined_call_operand.vmem [shape: bf16[32,128], index: 0, kind: input, shape index: {}]   ;;  %s336_s2 = inlined_call_operand.vmem [shape: f32[1,128], index: 2, kind: input, shape index: {}]   ;;  %s337_s3 = inlined_call_operand.vmem [shape: f32[32,128], index: 3, kind: input, shape index: {}]   ;;  %s338_s4 = inlined_call_operand.vmem [shape: f32[32,128], index: 4, kind: output, shape index: {}]  }
   0x1   :  { %v242_v0 = vld [vmem:[%s334_s1 + $0x38] sm:$0xff]   ;;  %v243_v1 = vld [vmem:[%s334_s1 + $0x30] sm:$0xff]   ;;  %v244_v2 = vld [vmem:[%s334_s1 + $0x28] sm:$0xff]  }
   0x2   :  { %222 = vmatprep.subr.bf16.mxu0 %v242_v0  ;;  %v245_v3 = vld [vmem:[%s334_s1 + $0x20] sm:$0xff]   ;;  %v246_v5 = vld [vmem:[%s334_s1 + $0x18] sm:$0xff]   ;;  %v247_v6 = vld [vmem:[%s334_s1 + $0x10] sm:$0xff]  }
   0x3   :  { %223 = vmatpush3.bf16.msra.mxu0 %v242_v0  ;;  %v250_v4 = vld [vmem:[%s335_s0] sm:$0xff]   ;;  %v248_v7 = vld [vmem:[%s334_s1 + $0x8] sm:$0xff]   ;;  %v187_v12 = vld [vmem:[%s337_s3 + $0x10] sm:$0xff] }
   0x4   :  { %224 = vmatprep.subr.bf16.mxu0 %v243_v1  ;;  %238 = vmatprep.mubr.bf16.mxu0 %v250_v4  ;;  %v249_v8 = vld [vmem:[%s334_s1] sm:$0xff]   ;;  %v251_v9 = vld [vmem:[%s335_s0 + $0x8] sm:$0xff]   ;;  %v188_v19 = vld [vmem:[%s337_s3 + $0x18] sm:$0xff] }
   0x5   :  { %v211_v10 = vld [vmem:[%s336_s2] ss:$0 sm:$0xff]  ;;  %v186_v23 = vld [vmem:[%s337_s3 + $0x8] sm:$0xff] }
   0x6   :  { %v185_v15 = vld [vmem:[%s337_s3] sm:$0xff] }
   0x7   :  { %225 = vmatpush3.bf16.msra.mxu0 %v243_v1 }
   0x8   :  { %226 = vmatprep.subr.bf16.mxu0 %v244_v2 }
   0xb   :  { %227 = vmatpush3.bf16.msra.mxu0 %v244_v2 }
   0xc   :  { %228 = vmatprep.subr.bf16.mxu0 %v245_v3 }
   0xf   :  { %229 = vmatpush3.bf16.msra.mxu0 %v245_v3 }
  0x10   :  { %230 = vmatprep.subr.bf16.mxu0 %v246_v5 }
  0x13   :  { %231 = vmatpush3.bf16.msra.mxu0 %v246_v5 }
  0x14   :  { %232 = vmatprep.subr.bf16.mxu0 %v247_v6 }
  0x17   :  { %233 = vmatpush3.bf16.msra.mxu0 %v247_v6 }
  0x18   :  { %234 = vmatprep.subr.bf16.mxu0 %v248_v7 }
  0x1b   :  { %235 = vmatpush3.bf16.msra.mxu0 %v248_v7 }
  0x1c   :  { %236 = vmatprep.subr.bf16.mxu0 %v249_v8 }
  0x1f   :  { %237 = vmatpush3.bf16.msra.mxu0 %v249_v8 }
  0x22   :  { %239 = vmatmul.mubr.bf16.vlgmr.msra.gmra.mxu0 %v251_v9 }
  0xe2   :  { %v240_v11 = vpop.f32.mrf.mxu0 }
  0xe3   :  { %v183_v13 = vadd.f32 %v240_v11, %v211_v10 }
  0xe4   :  { %v144_v14 = vpop.f32.mrf.mxu0 }
  0xe5   :  { %v191_v16 = vadd.f32 %v187_v12, %v183_v13  ;;  %v181_v17 = vadd.f32 %v211_v10, %v144_v14 }
  0xe6   :  { %v241_v18 = vpop.f32.mrf.mxu0 }
  0xe7   :  { %195 = vst [vmem:[%s338_s4 + $0x10] sm:$0xff] %v191_v16  ;;  %v189_v20 = vadd.f32 %v185_v15, %v181_v17  ;;  %v184_v21 = vadd.f32 %v241_v18, %v211_v10 }
  0xe8   :  { %v147_v22 = vpop.f32.mrf.mxu0 }
  0xe9   :  { %193 = vst [vmem:[%s338_s4] sm:$0xff] %v189_v20  ;;  %v192_v24 = vadd.f32 %v188_v19, %v184_v21  ;;  %v182_v25 = vadd.f32 %v211_v10, %v147_v22 }
  0xeb   :  { %196 = vst [vmem:[%s338_s4 + $0x18] sm:$0xff] %v192_v24  ;;  %v190_v26 = vadd.f32 %v186_v23, %v182_v25 }
  0xed   :  { %194 = vst [vmem:[%s338_s4 + $0x8] sm:$0xff] %v190_v26 }

// kernel: fpn_forward.27
= control target key start
LH: loop header
LB: loop body
LE: loop exit
PB: predicated region body
PF: predicated region fallthrough
CT: control target
= control target key end

     0   :  { %s688_s0 = inlined_call_operand.vmem [shape: bf16[128,128], index: 0, kind: input, shape index: {}]   ;;  %s689_s1 = inlined_call_operand.vmem [shape: bf16[128,128], index: 1, kind: input, shape index: {}]   ;;  %s690_s2 = inlined_call_operand.vmem [shape: f32[1,128], index: 2, kind: input, shape index: {}]   ;;  %s691_s3 = inlined_call_operand.vmem [shape: f32[128,128], index: 3, kind: input, shape index: {}]   ;;  %s692_s4 = inlined_call_operand.hbm [shape: f32[128,128], index: 4, kind: output, shape index: {}]  }
   0x1   :  { %v502_v0 = vld [vmem:[%s689_s1 + $0x38] sm:$0xff]   ;;  %v503_v1 = vld [vmem:[%s689_s1 + $0x30] sm:$0xff]   ;;  %v504_v2 = vld [vmem:[%s689_s1 + $0x28] sm:$0xff]  }
   0x2   :  { %451 = vmatprep.subr.bf16.mxu0 %v502_v0  ;;  %483 = vmatprep.subr.bf16.mxu1 %v502_v0  ;;  %v505_v3 = vld [vmem:[%s689_s1 + $0x20] sm:$0xff]   ;;  %v506_v6 = vld [vmem:[%s689_s1 + $0x18] sm:$0xff]   ;;  %v507_v7 = vld [vmem:[%s689_s1 + $0x10] sm:$0xff]  }
   0x3   :  { %452 = vmatpush3.bf16.msra.mxu0 %v502_v0  ;;  %491 = vmatpush3.bf16.msra.mxu1 %v502_v0  ;;  %v510_v4 = vld [vmem:[%s688_s0] sm:$0xff]  }
   0x4   :  { %453 = vmatprep.subr.bf16.mxu0 %v503_v1  ;;  %484 = vmatprep.subr.bf16.mxu1 %v503_v1  ;;  %v511_v5 = vld [vmem:[%s688_s0 + $0x20] sm:$0xff]  }
   0x5   :  { %467 = vmatprep.mubr.bf16.mxu0 %v510_v4  ;;  %475 = vmatprep.mubr.bf16.mxu1 %v511_v5 }
   0x7   :  { %454 = vmatpush3.bf16.msra.mxu0 %v503_v1  ;;  %492 = vmatpush3.bf16.msra.mxu1 %v503_v1 }
   0x8   :  { %455 = vmatprep.subr.bf16.mxu0 %v504_v2  ;;  %485 = vmatprep.subr.bf16.mxu1 %v504_v2 }
   0xb   :  { %456 = vmatpush3.bf16.msra.mxu0 %v504_v2  ;;  %493 = vmatpush3.bf16.msra.mxu1 %v504_v2 }
   0xc   :  { %457 = vmatprep.subr.bf16.mxu0 %v505_v3  ;;  %486 = vmatprep.subr.bf16.mxu1 %v505_v3 }
   0xf   :  { %458 = vmatpush3.bf16.msra.mxu0 %v505_v3  ;;  %494 = vmatpush3.bf16.msra.mxu1 %v505_v3 }
  0x10   :  { %459 = vmatprep.subr.bf16.mxu0 %v506_v6  ;;  %487 = vmatprep.subr.bf16.mxu1 %v506_v6 }
  0x11   :  { %9 = vsyncpa [#allocation4], 0  ;;  %v508_v8 = vld [vmem:[%s689_s1 + $0x8] sm:$0xff]   ;;  %v509_v9 = vld [vmem:[%s689_s1] sm:$0xff]   ;;  %s540_s21 = smov [#allocation3]  }
  0x12   :  { %v512_v10 = vld [vmem:[%s688_s0 + $0x8] sm:$0xff]   ;;  %v514_v12 = vld [vmem:[%s688_s0 + $0x10] sm:$0xff]   ;;  %v516_v14 = vld [vmem:[%s688_s0 + $0x18] sm:$0xff]   ;;  %s407_s22 = sshll.u32 %s540_s21, 4  ;;  %s408_s22 = int_to_ptr.vmem [resolvable:$true] %s407_s22 }
  0x13   :  { %460 = vmatpush3.bf16.msra.mxu0 %v506_v6  ;;  %495 = vmatpush3.bf16.msra.mxu1 %v506_v6  ;;  %v513_v11 = vld [vmem:[%s688_s0 + $0x28] sm:$0xff]   ;;  %v515_v13 = vld [vmem:[%s688_s0 + $0x30] sm:$0xff]   ;;  %v517_v15 = vld [vmem:[%s688_s0 + $0x38] sm:$0xff]   ;;  %s518_s26 = scalar_lea.vmem %s408_s22, 2048  ;;  %p523_p1 = scmp.lt.s32.totalorder %s408_s22, %s408_s22 }
  0x14   :  { %461 = vmatprep.subr.bf16.mxu0 %v507_v7  ;;  %488 = vmatprep.subr.bf16.mxu1 %v507_v7  ;;  %v619_v16 = vld [vmem:[%s690_s2] ss:$0 sm:$0xff]  ;;  %v356_v18 = vld [vmem:[%s691_s3 + $0x10] sm:$0xff]  ;;  %v357_v32 = vld [vmem:[%s691_s3 + $0x18] sm:$0xff]  ;;  %p519_p0 = scmp.ne.s32.totalorder %s408_s22, %s518_s26  ;;  %p524_p2 = scmp.lt.s32.totalorder %s518_s26, %s518_s26 }
  0x15   :  { %v364_v20 = vld [vmem:[%s691_s3 + $0x50] sm:$0xff]  ;;  %v354_v24 = vld [vmem:[%s691_s3] sm:$0xff]  ;;  %v365_v34 = vld [vmem:[%s691_s3 + $0x58] sm:$0xff] }
  0x16   :  { %v362_v26 = vld [vmem:[%s691_s3 + $0x40] sm:$0xff]  ;;  %v355_v40 = vld [vmem:[%s691_s3 + $0x8] sm:$0xff]  ;;  %v360_v48 = vld [vmem:[%s691_s3 + $0x30] sm:$0xff]  ;;  %p525_p3 = por %p524_p2, %p523_p1 }
  0x17   :  { %462 = vmatpush3.bf16.msra.mxu0 %v507_v7  ;;  %496 = vmatpush3.bf16.msra.mxu1 %v507_v7  ;;  %v363_v42 = vld [vmem:[%s691_s3 + $0x48] sm:$0xff]  ;;  %v368_v50 = vld [vmem:[%s691_s3 + $0x70] sm:$0xff]  ;;  %v358_v56 = vld [vmem:[%s691_s3 + $0x20] sm:$0xff] }
  0x18   :  { %463 = vmatprep.subr.bf16.mxu0 %v508_v8  ;;  %489 = vmatprep.subr.bf16.mxu1 %v508_v8  ;;  %v366_v58 = vld [vmem:[%s691_s3 + $0x60] sm:$0xff]  ;;  %v361_v0 = vld [vmem:[%s691_s3 + $0x38] sm:$0xff]  ;;  %p526_p4 = pnand %p525_p3, %p519_p0 }
  0x19   :  { %v369_v2 = vld [vmem:[%s691_s3 + $0x78] sm:$0xff] }
  0x1b   :  { %464 = vmatpush3.bf16.msra.mxu0 %v508_v8  ;;  %497 = vmatpush3.bf16.msra.mxu1 %v508_v8  ;;  %v359_v8 = vld [vmem:[%s691_s3 + $0x28] sm:$0xff] }
  0x1c   :  { %465 = vmatprep.subr.bf16.mxu0 %v509_v9  ;;  %490 = vmatprep.subr.bf16.mxu1 %v509_v9 }
  0x1f   :  { %466 = vmatpush3.bf16.msra.mxu0 %v509_v9  ;;  %498 = vmatpush3.bf16.msra.mxu1 %v509_v9 }
  0x22   :  { %468 = vmatmul.mubr.bf16.vlgmr.msra.gmra.mxu0 %v512_v10  ;;  %476 = vmatmul.mubr.bf16.vlgmr.msra.gmra.mxu1 %v513_v11  ;;  %v367_v10 = vld [vmem:[%s691_s3 + $0x68] sm:$0xff] }
  0x23   :  { %471 = vmatprep.mubr.bf16.mxu0 %v514_v12  ;;  %479 = vmatprep.mubr.bf16.mxu1 %v515_v13 }
  0x2a   :  { %472 = vmatmul.mubr.bf16.gmra.mxu0 %v516_v14  ;;  %480 = vmatmul.mubr.bf16.gmra.mxu1 %v517_v15 }
  0xe2   :  { %v469_v17 = vpop.f32.mrf.mxu0  ;;  %v477_v19 = vpop.f32.mrf.mxu1 }
  0xe3   :  { %v340_v21 = vadd.f32 %v469_v17, %v619_v16  ;;  %v348_v22 = vadd.f32 %v477_v19, %v619_v16 }
  0xe4   :  { %v217_v23 = vpop.f32.mrf.mxu0  ;;  %v249_v25 = vpop.f32.mrf.mxu1 }
  0xe5   :  { %v372_v27 = vadd.f32 %v356_v18, %v340_v21  ;;  %v380_v28 = vadd.f32 %v364_v20, %v348_v22  ;;  %v338_v29 = vadd.f32 %v619_v16, %v217_v23  ;;  %v346_v30 = vadd.f32 %v619_v16, %v249_v25 }
  0xe6   :  { %v470_v31 = vpop.f32.mrf.mxu0  ;;  %v478_v33 = vpop.f32.mrf.mxu1 }
  0xe7   :  { %388 = vst [vmem:[#allocation3 + $0x10] sm:$0xff] %v372_v27  ;;  %396 = vst [vmem:[#allocation3 + $0x50] sm:$0xff] %v380_v28  ;;  %v370_v35 = vadd.f32 %v354_v24, %v338_v29  ;;  %v378_v36 = vadd.f32 %v362_v26, %v346_v30  ;;  %v341_v37 = vadd.f32 %v470_v31, %v619_v16 }
  0xe8   :  { %v349_v38 = vadd.f32 %v478_v33, %v619_v16  ;;  %v220_v39 = vpop.f32.mrf.mxu0  ;;  %v252_v41 = vpop.f32.mrf.mxu1 }
  0xe9   :  { %386 = vst [vmem:[#allocation3] sm:$0xff] %v370_v35  ;;  %394 = vst [vmem:[#allocation3 + $0x40] sm:$0xff] %v378_v36  ;;  %v373_v43 = vadd.f32 %v357_v32, %v341_v37  ;;  %v339_v45 = vadd.f32 %v619_v16, %v220_v39  ;;  %v347_v46 = vadd.f32 %v619_v16, %v252_v41 }
  0xea   :  { %v381_v44 = vadd.f32 %v365_v34, %v349_v38  ;;  %v473_v47 = vpop.f32.mrf.mxu0  ;;  %v481_v49 = vpop.f32.mrf.mxu1 }
  0xeb   :  { %389 = vst [vmem:[#allocation3 + $0x18] sm:$0xff] %v373_v43  ;;  %v371_v51 = vadd.f32 %v355_v40, %v339_v45  ;;  %v379_v52 = vadd.f32 %v363_v42, %v347_v46  ;;  %v344_v53 = vadd.f32 %v473_v47, %v619_v16  ;;  %v352_v54 = vadd.f32 %v481_v49, %v619_v16 }
  0xec   :  { %397 = vst [vmem:[#allocation3 + $0x58] sm:$0xff] %v381_v44  ;;  %v233_v55 = vpop.f32.mrf.mxu0  ;;  %v265_v57 = vpop.f32.mrf.mxu1 }
  0xed   :  { %387 = vst [vmem:[#allocation3 + $0x8] sm:$0xff] %v371_v51  ;;  %395 = vst [vmem:[#allocation3 + $0x48] sm:$0xff] %v379_v52  ;;  %v376_v59 = vadd.f32 %v360_v48, %v344_v53  ;;  %v384_v60 = vadd.f32 %v368_v50, %v352_v54  ;;  %v342_v61 = vadd.f32 %v619_v16, %v233_v55 }
  0xee   :  { %v350_v62 = vadd.f32 %v619_v16, %v265_v57  ;;  %v474_v63 = vpop.f32.mrf.mxu0  ;;  %v482_v1 = vpop.f32.mrf.mxu1 }
  0xef   :  { %392 = vst [vmem:[#allocation3 + $0x30] sm:$0xff] %v376_v59  ;;  %400 = vst [vmem:[#allocation3 + $0x70] sm:$0xff] %v384_v60  ;;  %v374_v3 = vadd.f32 %v358_v56, %v342_v61  ;;  %v345_v5 = vadd.f32 %v474_v63, %v619_v16  ;;  %v353_v6 = vadd.f32 %v482_v1, %v619_v16 }
  0xf0   :  { %v382_v4 = vadd.f32 %v366_v58, %v350_v62  ;;  %v236_v7 = vpop.f32.mrf.mxu0  ;;  %v268_v9 = vpop.f32.mrf.mxu1 }
  0xf1   :  { %390 = vst [vmem:[#allocation3 + $0x20] sm:$0xff] %v374_v3  ;;  %v377_v11 = vadd.f32 %v361_v0, %v345_v5  ;;  %v385_v12 = vadd.f32 %v369_v2, %v353_v6  ;;  %v343_v13 = vadd.f32 %v619_v16, %v236_v7  ;;  %v351_v14 = vadd.f32 %v619_v16, %v268_v9 }
  0xf2   :  { %398 = vst [vmem:[#allocation3 + $0x60] sm:$0xff] %v382_v4 }
  0xf3   :  { %393 = vst [vmem:[#allocation3 + $0x38] sm:$0xff] %v377_v11  ;;  %401 = vst [vmem:[#allocation3 + $0x78] sm:$0xff] %v385_v12  ;;  %v375_v15 = vadd.f32 %v359_v8, %v343_v13  ;;  %v383_v17 = vadd.f32 %v367_v10, %v351_v14 }
  0xf5   :  { %391 = vst [vmem:[#allocation3 + $0x28] sm:$0xff] %v375_v15  ;;  %399 = vst [vmem:[#allocation3 + $0x68] sm:$0xff] %v383_v17 }
  0xf6   :  { %529 = shalt.err (!%p526_p4)
}
  0xf7   :  { %s541_s3 = smov 128   ;;  %s542_s2 = smov 8  }
  0xf8   :  { %413 = dma.vmem_to_hbm [thread:$0]  %s408_s22, 2048, %s692_s4, [#allocation4], %s541_s3, %s541_s3, %s542_s2  }
  0xf9   :  { %538 = dma.done.wait [#allocation4], 2048  }
  0xfa   :  { %539 = vsyncadd [#allocation4], 4294965248 }
  0xfb   :  { %417 = vsyncpa [#allocation4], 1 }

</bundles_post_ra>
